<compile_context>
chip_gen: v7x
topology: tpu7x:2x2x1
jax: 0.10.0
libtpu: 0.0.40
codegen_flags: <defaults>
</compile_context>

<pallas_src>
import numpy as np
import jax
import jax.numpy as jnp
from jax.experimental import pallas as pl
from jax.experimental.pallas import tpu as pltpu

EPS_LN = 1e-5
EPS_BN = 1e-5


def _round_up(n, m):
    return pl.cdiv(n, m) * m


# ---------------------------------------------------------------------------
# Kernel 1: fused walk encoder, fully lane-dense (wb, L*H) layout.
#   centered [wx|we|pe] projection -> LayerNorm (variance via two small
#   averaging matmuls) -> depthwise Conv1d (+BN folded) as banded matmul ->
#   ReLU -> pointwise Conv1d as block-diagonal matmul -> ReLU
# ---------------------------------------------------------------------------
def walk_encoder_kernel(win_ref, wproj_ref, b0_ref, ssum_ref, sbc_ref,
                        g_ref, beta_ref, conv_ref, cs_ref, pw_ref, pb_ref,
                        out_ref):
    # centered projection: c = ([wx|we|pe] @ Wcomb + b0) - segment_mean(...)
    c = jnp.dot(win_ref[...], wproj_ref[...],
                preferred_element_type=jnp.float32) + b0_ref[...]
    # per-(walk, position) variance over the 32-channel segment (low-rank avg)
    ss = jnp.dot(c * c, ssum_ref[...], preferred_element_type=jnp.float32)
    var = jnp.dot(ss, sbc_ref[...], preferred_element_type=jnp.float32)
    h = c * jax.lax.rsqrt(var + EPS_LN) * g_ref[...] + beta_ref[...]
    # depthwise conv along walk_length (+ folded BN shift) as a banded matmul
    a = jnp.dot(h.astype(jnp.bfloat16), conv_ref[...],
                preferred_element_type=jnp.float32) + cs_ref[...]
    a = jnp.maximum(a, 0.0)
    # pointwise (1x1) conv as a block-diagonal matmul
    y = jnp.dot(a.astype(jnp.bfloat16), pw_ref[...],
                preferred_element_type=jnp.float32) + pb_ref[...]
    out_ref[...] = jnp.maximum(y, 0.0).astype(out_ref.dtype)


# ---------------------------------------------------------------------------
# Kernel 2: merged node/edge output-projection MLP with residual.
#   base + Linear(W1 with BN folded) -> ReLU -> Linear(W2)
# ---------------------------------------------------------------------------
def out_proj_kernel(sid_ref, base_ref, agg_ref, w1_ref, b1_ref, w2_ref, b2_ref,
                    out_ref):
    del sid_ref  # only used by the index_maps
    h = jnp.dot(agg_ref[...].astype(jnp.bfloat16), w1_ref[...],
                preferred_element_type=jnp.float32) + b1_ref[...]
    h = jnp.maximum(h, 0.0)                      # BatchNorm folded into W1/b1
    h = jnp.dot(h.astype(jnp.bfloat16), w2_ref[...],
                preferred_element_type=jnp.float32) + b2_ref[...]
    out_ref[...] = base_ref[...] + h


# ---------------------------------------------------------------------------
# Wrappers
# ---------------------------------------------------------------------------
def _block_diag_tile(w_seg, L):
    """(F, H) -> (L*F, L*H) block-diagonal with L copies of w_seg."""
    F, H = w_seg.shape
    eye_l = jnp.eye(L, dtype=w_seg.dtype)
    return (eye_l[:, None, :, None] * w_seg[None, :, None, :]).reshape(L * F, L * H)


def _tile_row(v, L):
    return jnp.tile(v, L).reshape(1, -1).astype(jnp.float32)


def walk_encoder_pallas(win, p, H, walk_block=128):
    """win: (W, L, F) bf16 fused [wx | we | pe | feature-pad]."""
    W, L, F = win.shape
    P = p["pe_W"].shape[0]
    K = p["dw_W"].shape[0]
    pad = K // 2
    LH, LF = L * H, L * F
    f32, bf16 = jnp.float32, jnp.bfloat16

    wb = min(walk_block, _round_up(W, 8))
    W_pad = _round_up(W, wb)
    win_p = jnp.pad(win, ((0, W_pad - W), (0, 0), (0, 0))).reshape(W_pad, LF)

    # fused [identity | edge_W | pe_W | 0] projection; LayerNorm mean-centering
    # is linear, so fold (I - 1/H) into the weights / bias.
    w_comb = jnp.concatenate(
        [jnp.eye(H, dtype=f32), p["edge_W"], p["pe_W"],
         jnp.zeros((F - 2 * H - P, H), f32)], axis=0)                    # (F, H)
    center = jnp.eye(H, dtype=f32) - jnp.full((H, H), 1.0 / H, f32)
    w_proj = _block_diag_tile(w_comb @ center, L).astype(bf16)           # (LF, LH)
    b0_c = _tile_row((p["edge_b"] + p["pe_b"]) @ center, L)

    # segment (32-channel) averaging operators for the LayerNorm variance
    seg = jnp.arange(LH) // H
    s_sum = (seg[:, None] == jnp.arange(L)[None, :]).astype(f32) / H     # (LH, L)
    s_bc = (jnp.arange(L)[:, None] == seg[None, :]).astype(f32)          # (L, LH)

    # depthwise conv taps with BatchNorm(eval) + conv bias folded in,
    # expressed as a banded (LH, LH) matrix (zero padding built in).
    rs = p["bn1_g"] * jax.lax.rsqrt(p["bn1_v"] + EPS_BN)
    dw_s = p["dw_W"] * rs[None, :]                                        # (K, H)
    cshift = (p["dw_b"] - p["bn1_m"]) * rs + p["bn1_b"]
    sel = np.stack([np.eye(L, k=pad - k, dtype=np.float32) for k in range(K)])
    t4 = jnp.einsum("kst,kc->sct", jnp.asarray(sel), dw_s)               # (L, H, L)
    conv_mat = (t4[:, :, :, None] * jnp.eye(H, dtype=f32)[None, :, None, :]
                ).reshape(LH, LH).astype(bf16)

    pw_bd = _block_diag_tile(p["pw_W"], L).astype(bf16)                  # (LH, LH)

    full = lambda shape: pl.BlockSpec(shape, lambda i: (0,) * len(shape))

    out = pl.pallas_call(
        walk_encoder_kernel,
        out_shape=jax.ShapeDtypeStruct((W_pad, LH), jnp.bfloat16),
        grid=(W_pad // wb,),
        in_specs=[
            pl.BlockSpec((wb, LF), lambda i: (i, 0)),
            full((LF, LH)), full((1, LH)),
            full((LH, L)), full((L, LH)),
            full((1, LH)), full((1, LH)),
            full((LH, LH)), full((1, LH)),
            full((LH, LH)), full((1, LH)),
        ],
        out_specs=pl.BlockSpec((wb, LH), lambda i: (i, 0)),
        compiler_params=pltpu.CompilerParams(
            dimension_semantics=("parallel",),
            vmem_limit_bytes=32 * 1024 * 1024),
    )(win_p, w_proj, b0_c,
      s_sum, s_bc,
      _tile_row(p["ln_g"], L), _tile_row(p["ln_b"], L),
      conv_mat, _tile_row(cshift, L),
      pw_bd, _tile_row(p["pw_b"], L))
    # TODO(synk): for very long walks (L*H >> 512) the (LH, LH) operators should
    # be tiled over L instead of materialized whole.
    return out[:W].reshape(W, L, H)


def out_proj_pallas(x, node_agg, edge_attr, edge_agg, p_node, p_edge,
                    block_rows=256):
    """Node + edge out-projections fused into one pallas_call (weight set per
    row block chosen via a scalar-prefetched block->set id)."""
    H = x.shape[-1]

    def fold(p):
        s = p["bn_g"] * jax.lax.rsqrt(p["bn_v"] + EPS_BN)
        w1 = (p["W1"] * s[None, :]).astype(jnp.bfloat16)
        b1 = p["b1"] * s + p["bn_b"] - p["bn_m"] * s
        return w1, b1, p["W2"].astype(jnp.bfloat16), p["b2"]

    w1n, b1n, w2n, b2n = fold(p_node)
    w1e, b1e, w2e, b2e = fold(p_edge)
    w1s = jnp.stack([w1n, w1e])
    b1s = jnp.stack([b1n, b1e]).reshape(2, 1, H)
    w2s = jnp.stack([w2n, w2e])
    b2s = jnp.stack([b2n, b2e]).reshape(2, 1, H)

    n_n, n_e = x.shape[0], edge_attr.shape[0]
    bn = min(block_rows, max(_round_up(n_n, 8), _round_up(n_e, 8)))
    n_n_p, n_e_p = _round_up(n_n, bn), _round_up(n_e, bn)
    padr = lambda a, n: jnp.pad(a, ((0, n - a.shape[0]), (0, 0)))
    base = jnp.concatenate([padr(x, n_n_p), padr(edge_attr, n_e_p)], axis=0)
    agg = jnp.concatenate([padr(node_agg, n_n_p), padr(edge_agg, n_e_p)], axis=0)
    set_id = jnp.concatenate([jnp.zeros(n_n_p // bn, jnp.int32),
                              jnp.ones(n_e_p // bn, jnp.int32)])

    rspec = pl.BlockSpec((bn, H), lambda i, sid: (i, 0))
    wspec = pl.BlockSpec((None, H, H), lambda i, sid: (sid[i], 0, 0))
    bspec = pl.BlockSpec((None, 1, H), lambda i, sid: (sid[i], 0, 0))

    out = pl.pallas_call(
        out_proj_kernel,
        out_shape=jax.ShapeDtypeStruct((n_n_p + n_e_p, H), jnp.float32),
        grid_spec=pltpu.PrefetchScalarGridSpec(
            num_scalar_prefetch=1,
            grid=((n_n_p + n_e_p) // bn,),
            in_specs=[rspec, rspec, wspec, bspec, wspec, bspec],
            out_specs=rspec),
        compiler_params=pltpu.CompilerParams(
            dimension_semantics=("arbitrary",)),
    )(set_id, base, agg, w1s, b1s, w2s, b2s)
    return out[:n_n], out[n_n_p:n_n_p + n_e]


def _scatter_mean(vals, idx, valid, size, H):
    # data-dependent scatter -> plain JAX glue (scatter_mean: count clamped to 1)
    w = valid.reshape(-1).astype(jnp.float32)
    v = vals.reshape(-1, H).astype(jnp.float32) * w[:, None]
    s = jax.ops.segment_sum(v, idx.reshape(-1), num_segments=size)
    c = jax.ops.segment_sum(w, idx.reshape(-1), num_segments=size)
    return s / jnp.maximum(c, 1.0)[:, None]


def neural_walker_layer(params, batch):
    x, ea = batch["x"], batch["edge_attr"]
    wni, wei = batch["walk_node_idx"], batch["walk_edge_idx"]
    wnm, wem = batch["walk_node_mask"], batch["walk_edge_mask"]
    pe = batch["walk_pe"]
    W, L = wni.shape
    H = x.shape[-1]
    P = pe.shape[-1]
    F = int(_round_up(2 * H + P, 8))

    # Gathers + masking + feature concat fused in XLA; one bf16 input stream.
    # TODO(synk): the x[wni]/ea[wei] gathers could move in-kernel via scalar
    # prefetch + manual DMA gather to avoid the (W, L, F) HBM round trip.
    parts = [jnp.where(wnm[:, :, None], 0.0, x[wni]),
             jnp.where(wem[:, :, None], 0.0, ea[wei]),
             pe]
    if F > 2 * H + P:
        parts.append(jnp.zeros((W, L, F - 2 * H - P), jnp.float32))
    win = jnp.concatenate(parts, axis=-1).astype(jnp.bfloat16)

    walk_x = walk_encoder_pallas(win, params, H)

    node_agg = _scatter_mean(walk_x, wni, ~wnm, x.shape[0], H)
    edge_agg = _scatter_mean(walk_x, wei, ~wem, ea.shape[0], H)

    x_new, ea_new = out_proj_pallas(x, node_agg, ea, edge_agg,
                                    params["node_proj"], params["edge_out_proj"])

    # TODO(synk): MessagePassingLayer source not provided; identity pass-through.
    return {"x": x_new, "edge_attr": ea_new, "walk_x": walk_x}


# ---------------------------------------------------------------------------
# Pure-JAX f32 reference (for correctness check)
# ---------------------------------------------------------------------------
def reference(params, batch):
    x, ea = batch["x"], batch["edge_attr"]
    wni, wei = batch["walk_node_idx"], batch["walk_edge_idx"]
    wnm, wem = batch["walk_node_mask"], batch["walk_edge_mask"]
    pe = batch["walk_pe"]
    H = x.shape[-1]
    p = params

    wx = jnp.where(wnm[:, :, None], 0.0, x[wni])
    we = jnp.where(wem[:, :, None], 0.0, ea[wei])
    wx = wx + we @ p["edge_W"] + p["edge_b"]
    wx = wx + pe @ p["pe_W"] + p["pe_b"]
    mu = wx.mean(-1, keepdims=True)
    var = ((wx - mu) ** 2).mean(-1, keepdims=True)
    wx = (wx - mu) / jnp.sqrt(var + EPS_LN) * p["ln_g"] + p["ln_b"]

    K = p["dw_W"].shape[0]
    pad = K // 2
    L = wx.shape[1]
    xp = jnp.pad(wx, ((0, 0), (pad, pad), (0, 0)))
    acc = jnp.zeros_like(wx)
    for k in range(K):
        acc = acc + xp[:, k:k + L, :] * p["dw_W"][k][None, None, :]
    acc = acc + p["dw_b"]
    acc = (acc - p["bn1_m"]) / jnp.sqrt(p["bn1_v"] + EPS_BN) * p["bn1_g"] + p["bn1_b"]
    acc = jnp.maximum(acc, 0.0)
    walk_x = jnp.maximum(acc @ p["pw_W"] + p["pw_b"], 0.0)

    node_agg = _scatter_mean(walk_x, wni, ~wnm, x.shape[0], H)
    edge_agg = _scatter_mean(walk_x, wei, ~wem, ea.shape[0], H)

    def proj(base, agg, pp):
        h = agg @ pp["W1"] + pp["b1"]
        h = (h - pp["bn_m"]) / jnp.sqrt(pp["bn_v"] + EPS_BN) * pp["bn_g"] + pp["bn_b"]
        h = jnp.maximum(h, 0.0)
        return base + h @ pp["W2"] + pp["b2"]

    return {"x": proj(x, node_agg, p["node_proj"]),
            "edge_attr": proj(ea, edge_agg, p["edge_out_proj"])}


# ---------------------------------------------------------------------------
# Deterministic parameter init
# ---------------------------------------------------------------------------
def init_params(key, hidden, pe_dim, d_conv):
    ks = iter(jax.random.split(key, 40))
    nrm = lambda shape, s=0.1: s * jax.random.normal(next(ks), shape, jnp.float32)

    def proj_params():
        return {
            "W1": nrm((hidden, hidden)), "b1": nrm((hidden,)),
            "bn_g": 1.0 + nrm((hidden,)), "bn_b": nrm((hidden,)),
            "bn_m": nrm((hidden,)), "bn_v": 1.0 + jnp.abs(nrm((hidden,))),
            "W2": nrm((hidden, hidden)), "b2": nrm((hidden,)),
        }

    return {
        "edge_W": nrm((hidden, hidden)), "edge_b": nrm((hidden,)),
        "pe_W": nrm((pe_dim, hidden)), "pe_b": nrm((hidden,)),
        "ln_g": 1.0 + nrm((hidden,)), "ln_b": nrm((hidden,)),
        "dw_W": nrm((d_conv, hidden)), "dw_b": nrm((hidden,)),
        "bn1_g": 1.0 + nrm((hidden,)), "bn1_b": nrm((hidden,)),
        "bn1_m": nrm((hidden,)), "bn1_v": 1.0 + jnp.abs(nrm((hidden,))),
        "pw_W": nrm((hidden, hidden)), "pw_b": nrm((hidden,)),
        "node_proj": proj_params(),
        "edge_out_proj": proj_params(),
    }


if __name__ == "__main__":
    hidden = 32
    walk_length = 16
    num_walks = 8
    num_nodes = 24
    num_edges = 40
    window_size = 8
    d_conv = 9
    pe_dim = window_size * 2 - 1  # 15

    key = jax.random.PRNGKey(0)
    kp, kd = jax.random.split(key)
    params = init_params(kp, hidden, pe_dim, d_conv)

    ks = iter(jax.random.split(kd, 10))
    batch = {
        "x": jax.random.normal(next(ks), (num_nodes, hidden), jnp.float32),
        "edge_attr": jax.random.normal(next(ks), (num_edges, hidden), jnp.float32),
        "walk_node_idx": jax.random.randint(next(ks), (num_walks, walk_length), 0, num_nodes),
        "walk_edge_idx": jax.random.randint(next(ks), (num_walks, walk_length), 0, num_edges),
        "walk_node_mask": jax.random.bernoulli(next(ks), 0.15, (num_walks, walk_length)),
        "walk_edge_mask": jax.random.bernoulli(next(ks), 0.25, (num_walks, walk_length)),
        "walk_pe": jax.random.normal(next(ks), (num_walks, walk_length, pe_dim), jnp.float32),
    }

    out = neural_walker_layer(params, batch)
    jax.block_until_ready(out)

    ref = reference(params, batch)
    # bf16 matmul / storage path vs f32 reference
    assert jnp.allclose(out["x"], ref["x"], atol=5e-2, rtol=5e-2)
    assert jnp.allclose(out["edge_attr"], ref["edge_attr"], atol=5e-2, rtol=5e-2)

    print("KERNEL_OK")
</pallas_src>

<mosaic_0001>
module attributes {stable_mosaic.version = 11 : i64} {
  func.func @walk_encoder_kernel(%arg0: i32, %arg1: memref<8x1280xbf16, #tpu.memory_space<vmem>>, %arg2: memref<1280x512xbf16, #tpu.memory_space<vmem>>, %arg3: memref<1x512xf32, #tpu.memory_space<vmem>>, %arg4: memref<512x16xf32, #tpu.memory_space<vmem>>, %arg5: memref<16x512xf32, #tpu.memory_space<vmem>>, %arg6: memref<1x512xf32, #tpu.memory_space<vmem>>, %arg7: memref<1x512xf32, #tpu.memory_space<vmem>>, %arg8: memref<512x512xbf16, #tpu.memory_space<vmem>>, %arg9: memref<1x512xf32, #tpu.memory_space<vmem>>, %arg10: memref<512x512xbf16, #tpu.memory_space<vmem>>, %arg11: memref<1x512xf32, #tpu.memory_space<vmem>>, %arg12: memref<8x512xbf16, #tpu.memory_space<vmem>>) attributes {dimension_semantics = [#tpu.dimension_semantics<parallel>], iteration_bounds = array<i64: 1>, scalar_prefetch = 0 : i64, scratch_operands = 0 : i64, tpu.core_type = #tpu.core_type<tc>, window_params = [{transform_indices = @transform_0, window_bounds = array<i64: 8, 1280>}, {pipeline_mode = #tpu.pipeline_mode<synchronous>, transform_indices = @transform_1, window_bounds = array<i64: 1280, 512>}, {pipeline_mode = #tpu.pipeline_mode<synchronous>, transform_indices = @transform_2, window_bounds = array<i64: 1, 512>}, {pipeline_mode = #tpu.pipeline_mode<synchronous>, transform_indices = @transform_3, window_bounds = array<i64: 512, 16>}, {pipeline_mode = #tpu.pipeline_mode<synchronous>, transform_indices = @transform_4, window_bounds = array<i64: 16, 512>}, {pipeline_mode = #tpu.pipeline_mode<synchronous>, transform_indices = @transform_5, window_bounds = array<i64: 1, 512>}, {pipeline_mode = #tpu.pipeline_mode<synchronous>, transform_indices = @transform_6, window_bounds = array<i64: 1, 512>}, {pipeline_mode = #tpu.pipeline_mode<synchronous>, transform_indices = @transform_7, window_bounds = array<i64: 512, 512>}, {pipeline_mode = #tpu.pipeline_mode<synchronous>, transform_indices = @transform_8, window_bounds = array<i64: 1, 512>}, {pipeline_mode = #tpu.pipeline_mode<synchronous>, transform_indices = @transform_9, window_bounds = array<i64: 512, 512>}, {pipeline_mode = #tpu.pipeline_mode<synchronous>, transform_indices = @transform_10, window_bounds = array<i64: 1, 512>}, {transform_indices = @transform_11, window_bounds = array<i64: 8, 512>}]} {
    %c0 = arith.constant 0 : index
    %c0_0 = arith.constant 0 : index
    %0 = vector.load %arg1[%c0, %c0_0] : memref<8x1280xbf16, #tpu.memory_space<vmem>>, vector<8x1280xbf16>
    %c0_1 = arith.constant 0 : index
    %c0_2 = arith.constant 0 : index
    %1 = vector.load %arg2[%c0_1, %c0_2] : memref<1280x512xbf16, #tpu.memory_space<vmem>>, vector<1280x512xbf16>
    %cst = arith.constant dense<0.000000e+00> : vector<8x512xf32>
    %2 = tpu.matmul %0, %1, %cst {dimension_numbers = #tpu.dot_dimension_numbers<[1], [0], [0], [1], [0, 0, 1, 1], [], []>} : vector<8x1280xbf16>, vector<1280x512xbf16>, vector<8x512xf32> -> vector<8x512xf32>
    %c0_3 = arith.constant 0 : index
    %c0_4 = arith.constant 0 : index
    %3 = vector.load %arg3[%c0_3, %c0_4] : memref<1x512xf32, #tpu.memory_space<vmem>>, vector<1x512xf32>
    %4 = vector.broadcast %3 : vector<1x512xf32> to vector<8x512xf32>
    %5 = arith.addf %2, %4 : vector<8x512xf32>
    %6 = arith.mulf %5, %5 : vector<8x512xf32>
    %c0_5 = arith.constant 0 : index
    %c0_6 = arith.constant 0 : index
    %7 = vector.load %arg4[%c0_5, %c0_6] : memref<512x16xf32, #tpu.memory_space<vmem>>, vector<512x16xf32>
    %cst_7 = arith.constant dense<0.000000e+00> : vector<8x16xf32>
    %8 = tpu.matmul %6, %7, %cst_7 {dimension_numbers = #tpu.dot_dimension_numbers<[1], [0], [0], [1], [0, 0, 1, 1], [], []>} : vector<8x512xf32>, vector<512x16xf32>, vector<8x16xf32> -> vector<8x16xf32>
    %c0_8 = arith.constant 0 : index
    %c0_9 = arith.constant 0 : index
    %9 = vector.load %arg5[%c0_8, %c0_9] : memref<16x512xf32, #tpu.memory_space<vmem>>, vector<16x512xf32>
    %cst_10 = arith.constant dense<0.000000e+00> : vector<8x512xf32>
    %10 = tpu.matmul %8, %9, %cst_10 {dimension_numbers = #tpu.dot_dimension_numbers<[1], [0], [0], [1], [0, 0, 1, 1], [], []>} : vector<8x16xf32>, vector<16x512xf32>, vector<8x512xf32> -> vector<8x512xf32>
    %cst_11 = arith.constant 9.99999974E-6 : f32
    %11 = vector.broadcast %cst_11 : f32 to vector<8x512xf32>
    %12 = arith.addf %10, %11 : vector<8x512xf32>
    %13 = math.rsqrt %12 : vector<8x512xf32>
    %14 = arith.mulf %5, %13 : vector<8x512xf32>
    %c0_12 = arith.constant 0 : index
    %c0_13 = arith.constant 0 : index
    %15 = vector.load %arg6[%c0_12, %c0_13] : memref<1x512xf32, #tpu.memory_space<vmem>>, vector<1x512xf32>
    %16 = vector.broadcast %15 : vector<1x512xf32> to vector<8x512xf32>
    %17 = arith.mulf %14, %16 : vector<8x512xf32>
    %c0_14 = arith.constant 0 : index
    %c0_15 = arith.constant 0 : index
    %18 = vector.load %arg7[%c0_14, %c0_15] : memref<1x512xf32, #tpu.memory_space<vmem>>, vector<1x512xf32>
    %19 = vector.broadcast %18 : vector<1x512xf32> to vector<8x512xf32>
    %20 = arith.addf %17, %19 : vector<8x512xf32>
    %21 = arith.truncf %20 : vector<8x512xf32> to vector<8x512xbf16>
    %c0_16 = arith.constant 0 : index
    %c0_17 = arith.constant 0 : index
    %22 = vector.load %arg8[%c0_16, %c0_17] : memref<512x512xbf16, #tpu.memory_space<vmem>>, vector<512x512xbf16>
    %cst_18 = arith.constant dense<0.000000e+00> : vector<8x512xf32>
    %23 = tpu.matmul %21, %22, %cst_18 {dimension_numbers = #tpu.dot_dimension_numbers<[1], [0], [0], [1], [0, 0, 1, 1], [], []>} : vector<8x512xbf16>, vector<512x512xbf16>, vector<8x512xf32> -> vector<8x512xf32>
    %c0_19 = arith.constant 0 : index
    %c0_20 = arith.constant 0 : index
    %24 = vector.load %arg9[%c0_19, %c0_20] : memref<1x512xf32, #tpu.memory_space<vmem>>, vector<1x512xf32>
    %25 = vector.broadcast %24 : vector<1x512xf32> to vector<8x512xf32>
    %26 = arith.addf %23, %25 : vector<8x512xf32>
    %cst_21 = arith.constant 0.000000e+00 : f32
    %27 = vector.broadcast %cst_21 : f32 to vector<8x512xf32>
    %28 = arith.maximumf %26, %27 : vector<8x512xf32>
    %29 = arith.truncf %28 : vector<8x512xf32> to vector<8x512xbf16>
    %c0_22 = arith.constant 0 : index
    %c0_23 = arith.constant 0 : index
    %30 = vector.load %arg10[%c0_22, %c0_23] : memref<512x512xbf16, #tpu.memory_space<vmem>>, vector<512x512xbf16>
    %cst_24 = arith.constant dense<0.000000e+00> : vector<8x512xf32>
    %31 = tpu.matmul %29, %30, %cst_24 {dimension_numbers = #tpu.dot_dimension_numbers<[1], [0], [0], [1], [0, 0, 1, 1], [], []>} : vector<8x512xbf16>, vector<512x512xbf16>, vector<8x512xf32> -> vector<8x512xf32>
    %c0_25 = arith.constant 0 : index
    %c0_26 = arith.constant 0 : index
    %32 = vector.load %arg11[%c0_25, %c0_26] : memref<1x512xf32, #tpu.memory_space<vmem>>, vector<1x512xf32>
    %33 = vector.broadcast %32 : vector<1x512xf32> to vector<8x512xf32>
    %34 = arith.addf %31, %33 : vector<8x512xf32>
    %cst_27 = arith.constant 0.000000e+00 : f32
    %35 = vector.broadcast %cst_27 : f32 to vector<8x512xf32>
    %36 = arith.maximumf %34, %35 : vector<8x512xf32>
    %37 = arith.truncf %36 : vector<8x512xf32> to vector<8x512xbf16>
    %c0_28 = arith.constant 0 : index
    %c0_29 = arith.constant 0 : index
    %38 = vector.load %arg12[%c0_28, %c0_29] : memref<8x512xbf16, #tpu.memory_space<vmem>>, vector<8x512xbf16>
    tpu.vector_store %arg12[%c0_28, %c0_29], %37 {strides = array<i32>} : memref<8x512xbf16, #tpu.memory_space<vmem>>, vector<8x512xbf16>,
    return
  }
  func.func @transform_0(%arg0: i32) -> (i32, i32) {
    %c0_i32 = arith.constant 0 : i32
    %c0_i32_0 = arith.constant 0 : i32
    return %arg0, %c0_i32 : i32, i32
  }
  func.func @transform_1(%arg0: i32) -> (i32, i32) {
    %c0_i32 = arith.constant 0 : i32
    %c0_i32_0 = arith.constant 0 : i32
    %c0_i32_1 = arith.constant 0 : i32
    return %c0_i32, %c0_i32_0 : i32, i32
  }
  func.func @transform_2(%arg0: i32) -> (i32, i32) {
    %c0_i32 = arith.constant 0 : i32
    %c0_i32_0 = arith.constant 0 : i32
    %c0_i32_1 = arith.constant 0 : i32
    return %c0_i32, %c0_i32_0 : i32, i32
  }
  func.func @transform_3(%arg0: i32) -> (i32, i32) {
    %c0_i32 = arith.constant 0 : i32
    %c0_i32_0 = arith.constant 0 : i32
    %c0_i32_1 = arith.constant 0 : i32
    return %c0_i32, %c0_i32_0 : i32, i32
  }
  func.func @transform_4(%arg0: i32) -> (i32, i32) {
    %c0_i32 = arith.constant 0 : i32
    %c0_i32_0 = arith.constant 0 : i32
    %c0_i32_1 = arith.constant 0 : i32
    return %c0_i32, %c0_i32_0 : i32, i32
  }
  func.func @transform_5(%arg0: i32) -> (i32, i32) {
    %c0_i32 = arith.constant 0 : i32
    %c0_i32_0 = arith.constant 0 : i32
    %c0_i32_1 = arith.constant 0 : i32
    return %c0_i32, %c0_i32_0 : i32, i32
  }
  func.func @transform_6(%arg0: i32) -> (i32, i32) {
    %c0_i32 = arith.constant 0 : i32
    %c0_i32_0 = arith.constant 0 : i32
    %c0_i32_1 = arith.constant 0 : i32
    return %c0_i32, %c0_i32_0 : i32, i32
  }
  func.func @transform_7(%arg0: i32) -> (i32, i32) {
    %c0_i32 = arith.constant 0 : i32
    %c0_i32_0 = arith.constant 0 : i32
    %c0_i32_1 = arith.constant 0 : i32
    return %c0_i32, %c0_i32_0 : i32, i32
  }
  func.func @transform_8(%arg0: i32) -> (i32, i32) {
    %c0_i32 = arith.constant 0 : i32
    %c0_i32_0 = arith.constant 0 : i32
    %c0_i32_1 = arith.constant 0 : i32
    return %c0_i32, %c0_i32_0 : i32, i32
  }
  func.func @transform_9(%arg0: i32) -> (i32, i32) {
    %c0_i32 = arith.constant 0 : i32
    %c0_i32_0 = arith.constant 0 : i32
    %c0_i32_1 = arith.constant 0 : i32
    return %c0_i32, %c0_i32_0 : i32, i32
  }
  func.func @transform_10(%arg0: i32) -> (i32, i32) {
    %c0_i32 = arith.constant 0 : i32
    %c0_i32_0 = arith.constant 0 : i32
    %c0_i32_1 = arith.constant 0 : i32
    return %c0_i32, %c0_i32_0 : i32, i32
  }
  func.func @transform_11(%arg0: i32) -> (i32, i32) {
    %c0_i32 = arith.constant 0 : i32
    %c0_i32_0 = arith.constant 0 : i32
    return %arg0, %c0_i32 : i32, i32
  }
}

</mosaic_0001>

<bundles_post_ra>
// kernel: tpu_custom_call.1
= control target key start
LH: loop header
LB: loop body
LE: loop exit
PB: predicated region body
PF: predicated region fallthrough
CT: control target
= control target key end

     0   :  { %16 = vsyncpa [#allocation3], 0  ;;  %s7388_s0 = inlined_call_operand.hbm [shape: bf16[8,1280], index: 0, kind: input, shape index: {}]   ;;  %s7389_s1 = inlined_call_operand.hbm [shape: bf16[1280,512], index: 1, kind: input, shape index: {}]   ;;  %s7390_s2 = inlined_call_operand.hbm [shape: f32[1,512], index: 2, kind: input, shape index: {}]   ;;  %s7391_s3 = inlined_call_operand.vmem [shape: f32[512,16], index: 3, kind: input, shape index: {}]   ;;  %s7392_s4 = inlined_call_operand.hbm [shape: f32[16,512], index: 4, kind: input, shape index: {}]   ;;  %s7393_s5 = inlined_call_operand.hbm [shape: f32[1,512], index: 5, kind: input, shape index: {}]   ;;  %s7394_s6 = inlined_call_operand.hbm [shape: f32[1,512], index: 6, kind: input, shape index: {}]   ;;  %s7395_s7 = inlined_call_operand.hbm [shape: bf16[512,512], index: 7, kind: input, shape index: {}]   ;;  %s7396_s8 = inlined_call_operand.hbm [shape: f32[1,512], index: 8, kind: input, shape index: {}]   ;;  %s7397_s9 = inlined_call_operand.hbm [shape: bf16[512,512], index: 9, kind: input, shape index: {}]   ;;  %s7398_s10 = inlined_call_operand.hbm [shape: f32[1,512], index: 10, kind: input, shape index: {}]   ;;  %s7399_s11 = inlined_call_operand.hbm [shape: bf16[8,512], index: 11, kind: output, shape index: {}]  }
   0x1   :  { %17 = vsyncpa [#allocation6], 0 }
   0x2   :  { %18 = vsyncpa [#allocation9], 0 }
   0x3   :  { %19 = vsyncpa [#allocation12], 0 }
   0x4   :  { %20 = vsyncpa [#allocation15], 0 }
   0x5   :  { %21 = vsyncpa [#allocation18], 0 }
   0x6   :  { %22 = vsyncpa [#allocation4], 0  ;;  %s6887_s17 = smov [#allocation5]   ;;  %s6631_s21 = scalar_lea.hbm %s7389_s1, 40960 }
   0x7   :  { %s38_s18 = sshll.u32 %s6887_s17, 4  ;;  %p6632_p0 = scmp.ne.s32.totalorder %s7389_s1, %s6631_s21  ;;  %s39_s18 = int_to_ptr.vmem [resolvable:$true] %s38_s18 }
   0x8   :  { %p6635_p1 = scmp.lt.u32.totalorder %s6631_s21, %s7389_s1 }
   0xa   :  { %p6637_p2 = pnand %p6635_p1, %p6632_p0 }
   0xc   :  { %6640 = shalt.err (!%p6637_p2)
}
   0xd   :  { %s6641_s26 = scalar_lea.vmem %s39_s18, 40960  ;;  %p6646_p4 = scmp.lt.s32.totalorder %s39_s18, %s39_s18 }
   0xe   :  { %p6642_p3 = scmp.ne.s32.totalorder %s39_s18, %s6641_s26  ;;  %p6647_p5 = scmp.lt.s32.totalorder %s6641_s26, %s6641_s26 }
  0x10   :  { %p6648_p6 = por %p6647_p5, %p6646_p4 }
  0x12   :  { %p6649_p7 = pnand %p6648_p6, %p6642_p3 }
  0x14   :  { %6652 = shalt.err (!%p6649_p7)
}
  0x15   :  { %s6888_s27 = smov 256   ;;  %s6889_s28 = smov 16  }
  0x16   :  { %44 = dma.hbm_to_vmem [thread:$0]  %s7389_s1, 40960, %s39_s18, [#allocation6], %s6888_s27, %s6888_s27, %s6889_s28  }
  0x17   :  { %s6890_s12 = smov [#allocation8]   ;;  %s6653_s16 = scalar_lea.hbm %s7392_s4, 1024 }
  0x18   :  { %s62_s13 = sshll.u32 %s6890_s12, 4  ;;  %p6654_p8 = scmp.ne.s32.totalorder %s7392_s4, %s6653_s16  ;;  %s63_s13 = int_to_ptr.vmem [resolvable:$true] %s62_s13 }
  0x19   :  { %p6657_p9 = scmp.lt.u32.totalorder %s6653_s16, %s7392_s4 }
  0x1b   :  { %p6659_p10 = pnand %p6657_p9, %p6654_p8 }
  0x1d   :  { %6662 = shalt.err (!%p6659_p10)
}
  0x1e   :  { %s6663_s22 = scalar_lea.vmem %s63_s13, 1024  ;;  %p6668_p12 = scmp.lt.s32.totalorder %s63_s13, %s63_s13 }
  0x1f   :  { %p6664_p11 = scmp.ne.s32.totalorder %s63_s13, %s6663_s22  ;;  %p6669_p13 = scmp.lt.s32.totalorder %s6663_s22, %s6663_s22 }
  0x21   :  { %p6670_p0 = por %p6669_p13, %p6668_p12 }
  0x23   :  { %p6671_p1 = pnand %p6670_p0, %p6664_p11 }
  0x25   :  { %6674 = shalt.err (!%p6671_p1)
}
  0x26   :  { %s6891_s1 = smov 512   ;;  %s6892_s18 = smov 32  }
  0x27   :  { %68 = dma.hbm_to_vmem [thread:$0]  %s7392_s4, 1024, %s63_s13, [#allocation9], %s6891_s1, %s6891_s1, %s6892_s18  }
  0x28   :  { %s6893_s25 = smov [#allocation11]   ;;  %s6894_s29 = smov [#allocation14]  }
  0x29   :  { %s85_s26 = sshll.u32 %s6893_s25, 4  ;;  %s107_s30 = sshll.u32 %s6894_s29, 4  ;;  %s86_s26 = int_to_ptr.vmem [resolvable:$true] %s85_s26  ;;  %s108_s30 = int_to_ptr.vmem [resolvable:$true] %s107_s30 }
  0x2a   :  { %s6675_s15 = scalar_lea.hbm %s7394_s6, 64 }
  0x2b   :  { %p6676_p2 = scmp.ne.s32.totalorder %s7394_s6, %s6675_s15  ;;  %p6679_p3 = scmp.lt.u32.totalorder %s6675_s15, %s7394_s6 }
  0x2d   :  { %p6681_p4 = pnand %p6679_p3, %p6676_p2 }
  0x2f   :  { %6684 = shalt.err (!%p6681_p4)
}
  0x30   :  { %s6685_s4 = scalar_lea.vmem %s86_s26, 64  ;;  %p6690_p6 = scmp.lt.s32.totalorder %s86_s26, %s86_s26 }
  0x31   :  { %p6686_p5 = scmp.ne.s32.totalorder %s86_s26, %s6685_s4  ;;  %p6691_p7 = scmp.lt.s32.totalorder %s6685_s4, %s6685_s4 }
  0x33   :  { %p6692_p8 = por %p6691_p7, %p6690_p6 }
  0x35   :  { %p6693_p9 = pnand %p6692_p8, %p6686_p5 }
  0x37   :  { %6696 = shalt.err (!%p6693_p9)
}
  0x38   :  { %88 = dma.hbm_to_vmem [thread:$0]  %s7394_s6, 64, %s86_s26, [#allocation12]  }
  0x39   :  { %s6697_s18 = scalar_lea.hbm %s7396_s8, 64 }
  0x3a   :  { %p6698_p10 = scmp.ne.s32.totalorder %s7396_s8, %s6697_s18  ;;  %p6701_p11 = scmp.lt.u32.totalorder %s6697_s18, %s7396_s8 }
  0x3c   :  { %p6703_p12 = pnand %p6701_p11, %p6698_p10 }
  0x3e   :  { %6706 = shalt.err (!%p6703_p12)
}
  0x3f   :  { %s6707_s12 = scalar_lea.vmem %s108_s30, 64  ;;  %p6712_p0 = scmp.lt.s32.totalorder %s108_s30, %s108_s30 }
  0x40   :  { %p6708_p13 = scmp.ne.s32.totalorder %s108_s30, %s6707_s12  ;;  %p6713_p1 = scmp.lt.s32.totalorder %s6707_s12, %s6707_s12 }
  0x42   :  { %p6714_p2 = por %p6713_p1, %p6712_p0 }
  0x44   :  { %p6715_p3 = pnand %p6714_p2, %p6708_p13 }
  0x46   :  { %6718 = shalt.err (!%p6715_p3)
}
  0x47   :  { %110 = dma.hbm_to_vmem [thread:$0]  %s7396_s8, 64, %s108_s30, [#allocation15]  }
  0x48   :  { %s6895_s14 = smov [#allocation2]   ;;  %s6896_s16 = smov [#allocation7]  }
  0x49   :  { %s29_s15 = sshll.u32 %s6895_s14, 4  ;;  %s51_s17 = sshll.u32 %s6896_s16, 4  ;;  %s30_s15 = int_to_ptr.vmem [resolvable:$true] %s29_s15  ;;  %s52_s17 = int_to_ptr.vmem [resolvable:$true] %s51_s17 }
  0x4a   :  { %s6719_s4 = scalar_lea.hbm %s7388_s0, 640 }
  0x4b   :  { %p6720_p4 = scmp.ne.s32.totalorder %s7388_s0, %s6719_s4  ;;  %p6723_p5 = scmp.lt.u32.totalorder %s6719_s4, %s7388_s0 }
  0x4d   :  { %p6725_p6 = pnand %p6723_p5, %p6720_p4 }
  0x4f   :  { %6728 = shalt.err (!%p6725_p6)
}
  0x50   :  { %s6729_s8 = scalar_lea.vmem %s30_s15, 640  ;;  %p6734_p8 = scmp.lt.s32.totalorder %s30_s15, %s30_s15 }
  0x51   :  { %p6730_p7 = scmp.ne.s32.totalorder %s30_s15, %s6729_s8  ;;  %p6735_p9 = scmp.lt.s32.totalorder %s6729_s8, %s6729_s8 }
  0x53   :  { %p6736_p10 = por %p6735_p9, %p6734_p8 }
  0x55   :  { %p6737_p11 = pnand %p6736_p10, %p6730_p7 }
  0x57   :  { %6740 = shalt.err (!%p6737_p11)
}
  0x58   :  { %32 = dma.hbm_to_vmem [thread:$0]  %s7388_s0, 640, %s30_s15, [#allocation3]  }
  0x59   :  { %s6741_s25 = scalar_lea.hbm %s7390_s2, 64 }
  0x5a   :  { %p6742_p12 = scmp.ne.s32.totalorder %s7390_s2, %s6741_s25  ;;  %p6745_p13 = scmp.lt.u32.totalorder %s6741_s25, %s7390_s2 }
  0x5c   :  { %p6747_p0 = pnand %p6745_p13, %p6742_p12 }
  0x5e   :  { %6750 = shalt.err (!%p6747_p0)
}
  0x5f   :  { %s6751_s14 = scalar_lea.vmem %s52_s17, 64  ;;  %p6756_p2 = scmp.lt.s32.totalorder %s52_s17, %s52_s17 }
  0x60   :  { %p6752_p1 = scmp.ne.s32.totalorder %s52_s17, %s6751_s14  ;;  %p6757_p3 = scmp.lt.s32.totalorder %s6751_s14, %s6751_s14 }
  0x62   :  { %p6758_p4 = por %p6757_p3, %p6756_p2 }
  0x64   :  { %p6759_p5 = pnand %p6758_p4, %p6752_p1 }
  0x66   :  { %6762 = shalt.err (!%p6759_p5)
}
  0x67   :  { %54 = dma.hbm_to_vmem [thread:$0]  %s7390_s2, 64, %s52_s17, [#allocation6]  }
  0x68   :  { %s6897_s16 = smov [#allocation10]   ;;  %s6898_s20 = smov [#allocation13]  }
  0x69   :  { %s75_s19 = sshll.u32 %s6897_s16, 4  ;;  %s94_s4 = sshll.u32 %s6898_s20, 4  ;;  %s76_s19 = int_to_ptr.vmem [resolvable:$true] %s75_s19  ;;  %s7038_s4 = int_to_ptr.vmem [resolvable:$true] %s94_s4 }
  0x6a   :  { %s6763_s22 = scalar_lea.hbm %s7393_s5, 64 }
  0x6b   :  { %p6764_p6 = scmp.ne.s32.totalorder %s7393_s5, %s6763_s22  ;;  %p6767_p7 = scmp.lt.u32.totalorder %s6763_s22, %s7393_s5 }
  0x6d   :  { %p6769_p8 = pnand %p6767_p7, %p6764_p6 }
  0x6f   :  { %6772 = shalt.err (!%p6769_p8)
}
  0x70   :  { %s6773_s2 = scalar_lea.vmem %s76_s19, 64  ;;  %p6778_p10 = scmp.lt.s32.totalorder %s76_s19, %s76_s19 }
  0x71   :  { %p6774_p9 = scmp.ne.s32.totalorder %s76_s19, %s6773_s2  ;;  %p6779_p11 = scmp.lt.s32.totalorder %s6773_s2, %s6773_s2 }
  0x73   :  { %p6780_p12 = por %p6779_p11, %p6778_p10 }
  0x75   :  { %p6781_p13 = pnand %p6780_p12, %p6774_p9 }
  0x77   :  { %6784 = shalt.err (!%p6781_p13)
}
  0x78   :  { %78 = dma.hbm_to_vmem [thread:$0]  %s7393_s5, 64, %s76_s19, [#allocation9]  }
  0x79   :  { %s6785_s29 = scalar_lea.hbm %s7395_s7, 16384 }
  0x7a   :  { %p6786_p0 = scmp.ne.s32.totalorder %s7395_s7, %s6785_s29  ;;  %p6789_p1 = scmp.lt.u32.totalorder %s6785_s29, %s7395_s7 }
  0x7c   :  { %p6791_p2 = pnand %p6789_p1, %p6786_p0 }
  0x7e   :  { %6794 = shalt.err (!%p6791_p2)
}
  0x7f   :  { %s6795_s0 = scalar_lea.vmem %s7038_s4, 16384  ;;  %p6800_p4 = scmp.lt.s32.totalorder %s7038_s4, %s7038_s4 }
  0x80   :  { %p6796_p3 = scmp.ne.s32.totalorder %s7038_s4, %s6795_s0  ;;  %p6801_p5 = scmp.lt.s32.totalorder %s6795_s0, %s6795_s0 }
  0x82   :  { %p6802_p6 = por %p6801_p5, %p6800_p4 }
  0x84   :  { %p6803_p7 = pnand %p6802_p6, %p6796_p3 }
  0x86   :  { %6806 = shalt.err (!%p6803_p7)
}
  0x87   :  { %100 = dma.hbm_to_vmem [thread:$0]  %s7395_s7, 16384, %s7038_s4, [#allocation12], %s6888_s27, %s6888_s27, %s6889_s28  }
  0x88   :  { %s6899_s16 = smov [#allocation16]   ;;  %s6900_s20 = smov [#allocation17]  }
  0x89   :  { %s116_s19 = sshll.u32 %s6899_s16, 4  ;;  %s129_s13 = sshll.u32 %s6900_s20, 4  ;;  %s117_s19 = int_to_ptr.vmem [resolvable:$true] %s116_s19  ;;  %s130_s13 = int_to_ptr.vmem [resolvable:$true] %s129_s13 }
  0x8a   :  { %s6807_s1 = scalar_lea.hbm %s7397_s9, 16384 }
  0x8b   :  { %p6808_p8 = scmp.ne.s32.totalorder %s7397_s9, %s6807_s1  ;;  %p6811_p9 = scmp.lt.u32.totalorder %s6807_s1, %s7397_s9 }
  0x8d   :  { %p6813_p10 = pnand %p6811_p9, %p6808_p8 }
  0x8f   :  { %6816 = shalt.err (!%p6813_p10)
}
  0x90   :  { %s6817_s7 = scalar_lea.vmem %s117_s19, 16384  ;;  %p6822_p12 = scmp.lt.s32.totalorder %s117_s19, %s117_s19 }
  0x91   :  { %p6818_p11 = scmp.ne.s32.totalorder %s117_s19, %s6817_s7  ;;  %p6823_p13 = scmp.lt.s32.totalorder %s6817_s7, %s6817_s7 }
  0x93   :  { %p6824_p0 = por %p6823_p13, %p6822_p12 }
  0x95   :  { %p6825_p1 = pnand %p6824_p0, %p6818_p11 }
  0x97   :  { %6828 = shalt.err (!%p6825_p1)
}
  0x98   :  { %122 = dma.hbm_to_vmem [thread:$0]  %s7397_s9, 16384, %s117_s19, [#allocation15], %s6888_s27, %s6888_s27, %s6889_s28  }
  0x99   :  { %s6829_s25 = scalar_lea.hbm %s7398_s10, 64 }
  0x9a   :  { %p6830_p2 = scmp.ne.s32.totalorder %s7398_s10, %s6829_s25  ;;  %p6833_p3 = scmp.lt.u32.totalorder %s6829_s25, %s7398_s10 }
  0x9c   :  { %p6835_p4 = pnand %p6833_p3, %p6830_p2 }
  0x9e   :  { %6838 = shalt.err (!%p6835_p4)
}
  0x9f   :  { %s6839_s14 = scalar_lea.vmem %s130_s13, 64  ;;  %p6844_p6 = scmp.lt.s32.totalorder %s130_s13, %s130_s13 }
  0xa0   :  { %p6840_p5 = scmp.ne.s32.totalorder %s130_s13, %s6839_s14  ;;  %p6845_p7 = scmp.lt.s32.totalorder %s6839_s14, %s6839_s14 }
  0xa2   :  { %p6846_p8 = por %p6845_p7, %p6844_p6 }
  0xa4   :  { %p6847_p9 = pnand %p6846_p8, %p6840_p5 }
  0xa6   :  { %6850 = shalt.err (!%p6847_p9)
}
  0xa7   :  { %132 = dma.hbm_to_vmem [thread:$0]  %s7398_s10, 64, %s130_s13, [#allocation18]  }
  0xa8   :  { %6873 = dma.done.wait [#allocation3], 640  }
  0xa9   :  { %6874 = vsyncadd [#allocation3], 4294966656 }
  0xaa   :  { %6875 = dma.done.wait [#allocation6], 41024  }
  0xab   :  { %6876 = vsyncadd [#allocation6], 4294926272 }
  0xac   :  { %6877 = dma.done.wait [#allocation9], 1088  }
  0xad   :  { %6878 = vsyncadd [#allocation9], 4294966208 }
  0xae   :  { %6879 = dma.done.wait [#allocation12], 16448  }
  0xaf   :  { %6880 = vsyncadd [#allocation12], 4294950848 }
  0xb0   :  { %6881 = dma.done.wait [#allocation15], 16448  }
  0xb1   :  { %6882 = vsyncadd [#allocation15], 4294950848 }
  0xb2   :  { %6883 = dma.done.wait [#allocation18], 64  }
  0xb3   :  { %6884 = vsyncadd [#allocation18], 4294967232  ;;  %v5749_v0 = vld [vmem:[#allocation5 + $0x4] ss:$16 sps:$4 sm:$0xff]   ;;  %v5751_v1 = vld [vmem:[#allocation5 + $0xc] ss:$16 sps:$4 sm:$0xff]  }
  0xb4   :  { %2145 = vmatprep.subr.bf16.mxu0 %v5749_v0  ;;  %v5753_v2 = vld [vmem:[#allocation5] ss:$16 sps:$4 sm:$0xff]   ;;  %v5754_v3 = vld [vmem:[#allocation5 + $0x8] ss:$16 sps:$4 sm:$0xff]   ;;  %2350 = vmatprep.subr.bf16.mxu1 %v5751_v1  ;;  %v5755_v4 = vld [vmem:[#allocation5 + $0x24] ss:$16 sps:$4 sm:$0xff]  }
  0xb5   :  { %2146 = vmatpush1.bf16.msra.mxu0 %v5753_v2  ;;  %2351 = vmatpush1.bf16.msra.mxu1 %v5754_v3  ;;  %v5757_v5 = vld [vmem:[#allocation5 + $0x2c] ss:$16 sps:$4 sm:$0xff]   ;;  %v5759_v6 = vld [vmem:[#allocation5 + $0x20] ss:$16 sps:$4 sm:$0xff]   ;;  %v5760_v7 = vld [vmem:[#allocation5 + $0x28] ss:$16 sps:$4 sm:$0xff]  }
  0xb6   :  { %2147 = vmatprep.subr.bf16.mxu0 %v5755_v4  ;;  %2352 = vmatprep.subr.bf16.mxu1 %v5757_v5  ;;  %v5761_v8 = vld [vmem:[#allocation5 + $0x44] ss:$16 sps:$4 sm:$0xff]   ;;  %v5763_v9 = vld [vmem:[#allocation5 + $0x4c] ss:$16 sps:$4 sm:$0xff]   ;;  %v5765_v10 = vld [vmem:[#allocation5 + $0x40] ss:$16 sps:$4 sm:$0xff]  }
  0xb7   :  { %v5766_v11 = vld [vmem:[#allocation5 + $0x48] ss:$16 sps:$4 sm:$0xff]   ;;  %v5767_v12 = vld [vmem:[#allocation5 + $0x64] ss:$16 sps:$4 sm:$0xff]   ;;  %v5769_v13 = vld [vmem:[#allocation5 + $0x6c] ss:$16 sps:$4 sm:$0xff]  }
  0xb8   :  { %v5771_v14 = vld [vmem:[#allocation5 + $0x60] ss:$16 sps:$4 sm:$0xff]   ;;  %v5772_v15 = vld [vmem:[#allocation5 + $0x68] ss:$16 sps:$4 sm:$0xff]   ;;  %v5773_v16 = vld [vmem:[#allocation5 + $0x84] ss:$16 sps:$4 sm:$0xff]  }
  0xb9   :  { %2148 = vmatpush1.bf16.msra.mxu0 %v5759_v6  ;;  %2353 = vmatpush1.bf16.msra.mxu1 %v5760_v7  ;;  %v5775_v17 = vld [vmem:[#allocation5 + $0x8c] ss:$16 sps:$4 sm:$0xff]   ;;  %v5777_v18 = vld [vmem:[#allocation5 + $0x80] ss:$16 sps:$4 sm:$0xff]   ;;  %v5778_v19 = vld [vmem:[#allocation5 + $0x88] ss:$16 sps:$4 sm:$0xff]  }
  0xba   :  { %2149 = vmatprep.subr.bf16.mxu0 %v5761_v8  ;;  %2354 = vmatprep.subr.bf16.mxu1 %v5763_v9  ;;  %v5779_v20 = vld [vmem:[#allocation5 + $0xa4] ss:$16 sps:$4 sm:$0xff]   ;;  %v5781_v21 = vld [vmem:[#allocation5 + $0xac] ss:$16 sps:$4 sm:$0xff]   ;;  %v5783_v22 = vld [vmem:[#allocation5 + $0xa0] ss:$16 sps:$4 sm:$0xff]  }
  0xbb   :  { %v5784_v23 = vld [vmem:[#allocation5 + $0xa8] ss:$16 sps:$4 sm:$0xff]   ;;  %v5785_v24 = vld [vmem:[#allocation5 + $0xc4] ss:$16 sps:$4 sm:$0xff]   ;;  %v5787_v25 = vld [vmem:[#allocation5 + $0xcc] ss:$16 sps:$4 sm:$0xff]  }
  0xbc   :  { %v5789_v26 = vld [vmem:[#allocation5 + $0xc0] ss:$16 sps:$4 sm:$0xff]   ;;  %v5790_v27 = vld [vmem:[#allocation5 + $0xc8] ss:$16 sps:$4 sm:$0xff]   ;;  %v5791_v28 = vld [vmem:[#allocation5 + $0xe4] ss:$16 sps:$4 sm:$0xff]  }
  0xbd   :  { %2150 = vmatpush1.bf16.msra.mxu0 %v5765_v10  ;;  %2355 = vmatpush1.bf16.msra.mxu1 %v5766_v11  ;;  %v5793_v29 = vld [vmem:[#allocation5 + $0xec] ss:$16 sps:$4 sm:$0xff]   ;;  %v5795_v30 = vld [vmem:[#allocation5 + $0xe0] ss:$16 sps:$4 sm:$0xff]   ;;  %v5796_v31 = vld [vmem:[#allocation5 + $0xe8] ss:$16 sps:$4 sm:$0xff]  }
  0xbe   :  { %2151 = vmatprep.subr.bf16.mxu0 %v5767_v12  ;;  %2356 = vmatprep.subr.bf16.mxu1 %v5769_v13  ;;  %v5797_v32 = vld [vmem:[#allocation5 + $0x104] ss:$16 sps:$4 sm:$0xff]   ;;  %v5799_v33 = vld [vmem:[#allocation5 + $0x10c] ss:$16 sps:$4 sm:$0xff]   ;;  %v5801_v34 = vld [vmem:[#allocation5 + $0x100] ss:$16 sps:$4 sm:$0xff]  }
  0xbf   :  { %v5802_v35 = vld [vmem:[#allocation5 + $0x108] ss:$16 sps:$4 sm:$0xff]   ;;  %v5803_v36 = vld [vmem:[#allocation5 + $0x124] ss:$16 sps:$4 sm:$0xff]   ;;  %v5805_v37 = vld [vmem:[#allocation5 + $0x12c] ss:$16 sps:$4 sm:$0xff]  }
  0xc0   :  { %v5807_v38 = vld [vmem:[#allocation5 + $0x120] ss:$16 sps:$4 sm:$0xff]   ;;  %v5808_v39 = vld [vmem:[#allocation5 + $0x128] ss:$16 sps:$4 sm:$0xff]   ;;  %v5809_v40 = vld [vmem:[#allocation5 + $0x144] ss:$16 sps:$4 sm:$0xff]  }
  0xc1   :  { %2152 = vmatpush1.bf16.msra.mxu0 %v5771_v14  ;;  %2357 = vmatpush1.bf16.msra.mxu1 %v5772_v15  ;;  %v5811_v41 = vld [vmem:[#allocation5 + $0x14c] ss:$16 sps:$4 sm:$0xff]   ;;  %v5813_v42 = vld [vmem:[#allocation5 + $0x140] ss:$16 sps:$4 sm:$0xff]   ;;  %v5814_v43 = vld [vmem:[#allocation5 + $0x148] ss:$16 sps:$4 sm:$0xff]  }
  0xc2   :  { %2153 = vmatprep.subr.bf16.mxu0 %v5773_v16  ;;  %2358 = vmatprep.subr.bf16.mxu1 %v5775_v17  ;;  %v5815_v44 = vld [vmem:[#allocation5 + $0x164] ss:$16 sps:$4 sm:$0xff]   ;;  %v5817_v45 = vld [vmem:[#allocation5 + $0x16c] ss:$16 sps:$4 sm:$0xff]   ;;  %v5819_v47 = vld [vmem:[#allocation5 + $0x160] ss:$16 sps:$4 sm:$0xff]  }
  0xc3   :  { %v163_v46 = vld [vmem:[#allocation2] sm:$0xff]  ;;  %v5821_v50 = vld [vmem:[#allocation5 + $0x184] ss:$16 sps:$4 sm:$0xff]   ;;  %v5825_v52 = vld [vmem:[#allocation5 + $0x180] ss:$16 sps:$4 sm:$0xff]   ;;  %vm2771_vm0 = vcmask 130048  }
  0xc4   :  { %v4940_v48 = vcombine.high %v163_v46, %v163_v46  ;;  %v5820_v49 = vld [vmem:[#allocation5 + $0x168] ss:$16 sps:$4 sm:$0xff]   ;;  %v5823_v51 = vld [vmem:[#allocation5 + $0x18c] ss:$16 sps:$4 sm:$0xff]   ;;  %v5827_v54 = vld [vmem:[#allocation5 + $0x1a4] ss:$16 sps:$4 sm:$0xff]   ;;  %v4939_v4 = vcombine.low %v163_v46, %v163_v46 }
  0xc5   :  { %2154 = vmatpush1.bf16.msra.mxu0 %v5777_v18  ;;  %2359 = vmatpush1.bf16.msra.mxu1 %v5778_v19  ;;  %v5826_v53 = vld [vmem:[#allocation5 + $0x188] ss:$16 sps:$4 sm:$0xff]   ;;  %v5829_v55 = vld [vmem:[#allocation5 + $0x1ac] ss:$16 sps:$4 sm:$0xff]   ;;  %v5831_v56 = vld [vmem:[#allocation5 + $0x1a0] ss:$16 sps:$4 sm:$0xff]  }
  0xc6   :  { %2155 = vmatprep.subr.bf16.mxu0 %v5779_v20  ;;  %2360 = vmatprep.subr.bf16.mxu1 %v5781_v21  ;;  %v5832_v57 = vld [vmem:[#allocation5 + $0x1a8] ss:$16 sps:$4 sm:$0xff]   ;;  %v5833_v58 = vld [vmem:[#allocation5 + $0x1c4] ss:$16 sps:$4 sm:$0xff]   ;;  %v5835_v59 = vld [vmem:[#allocation5 + $0x1cc] ss:$16 sps:$4 sm:$0xff]  }
  0xc7   :  { %2177 = vmatprep.mubr.bf16.mxu0 %v4940_v48  ;;  %2382 = vmatprep.mubr.bf16.mxu1 %v4940_v48  ;;  %v5837_v60 = vld [vmem:[#allocation5 + $0x1c0] ss:$16 sps:$4 sm:$0xff]   ;;  %v5838_v61 = vld [vmem:[#allocation5 + $0x1c8] ss:$16 sps:$4 sm:$0xff]   ;;  %v5839_v62 = vld [vmem:[#allocation5 + $0x1e4] ss:$16 sps:$4 sm:$0xff]  }
  0xc8   :  { %v5841_v63 = vld [vmem:[#allocation5 + $0x1ec] ss:$16 sps:$4 sm:$0xff]   ;;  %v5843_v0 = vld [vmem:[#allocation5 + $0x1e0] ss:$16 sps:$4 sm:$0xff]   ;;  %v5844_v1 = vld [vmem:[#allocation5 + $0x1e8] ss:$16 sps:$4 sm:$0xff]  }
  0xc9   :  { %2156 = vmatpush1.bf16.msra.mxu0 %v5783_v22  ;;  %2361 = vmatpush1.bf16.msra.mxu1 %v5784_v23  ;;  %v5849_v2 = vld [vmem:[#allocation5 + $0x204] ss:$16 sps:$4 sm:$0xff]   ;;  %v5852_v3 = vld [vmem:[#allocation5 + $0x20c] ss:$16 sps:$4 sm:$0xff]   ;;  %v5847_v5 = vld [vmem:[#allocation5 + $0x200] ss:$16 sps:$4 sm:$0xff]  }
  0xca   :  { %2157 = vmatprep.subr.bf16.mxu0 %v5785_v24  ;;  %2362 = vmatprep.subr.bf16.mxu1 %v5787_v25  ;;  %v5850_v6 = vld [vmem:[#allocation5 + $0x208] ss:$16 sps:$4 sm:$0xff]   ;;  %v5855_v7 = vld [vmem:[#allocation5 + $0x224] ss:$16 sps:$4 sm:$0xff]   ;;  %v5858_v8 = vld [vmem:[#allocation5 + $0x22c] ss:$16 sps:$4 sm:$0xff]  }
  0xcb   :  { %v5853_v9 = vld [vmem:[#allocation5 + $0x220] ss:$16 sps:$4 sm:$0xff]   ;;  %v5856_v10 = vld [vmem:[#allocation5 + $0x228] ss:$16 sps:$4 sm:$0xff]   ;;  %v5861_v11 = vld [vmem:[#allocation5 + $0x244] ss:$16 sps:$4 sm:$0xff]  }
  0xcc   :  { %v5864_v12 = vld [vmem:[#allocation5 + $0x24c] ss:$16 sps:$4 sm:$0xff]   ;;  %v5859_v13 = vld [vmem:[#allocation5 + $0x240] ss:$16 sps:$4 sm:$0xff]   ;;  %v5862_v14 = vld [vmem:[#allocation5 + $0x248] ss:$16 sps:$4 sm:$0xff]  }
  0xcd   :  { %2158 = vmatpush1.bf16.msra.mxu0 %v5789_v26  ;;  %2363 = vmatpush1.bf16.msra.mxu1 %v5790_v27  ;;  %v5867_v15 = vld [vmem:[#allocation5 + $0x264] ss:$16 sps:$4 sm:$0xff]   ;;  %v5870_v16 = vld [vmem:[#allocation5 + $0x26c] ss:$16 sps:$4 sm:$0xff]   ;;  %v5865_v17 = vld [vmem:[#allocation5 + $0x260] ss:$16 sps:$4 sm:$0xff]  }
  0xce   :  { %2159 = vmatprep.subr.bf16.mxu0 %v5791_v28  ;;  %2364 = vmatprep.subr.bf16.mxu1 %v5793_v29  ;;  %v5868_v18 = vld [vmem:[#allocation5 + $0x268] ss:$16 sps:$4 sm:$0xff]   ;;  %v5873_v19 = vld [vmem:[#allocation5 + $0x284] ss:$16 sps:$4 sm:$0xff]   ;;  %v5876_v20 = vld [vmem:[#allocation5 + $0x28c] ss:$16 sps:$4 sm:$0xff]  }
  0xcf   :  { %v5871_v21 = vld [vmem:[#allocation5 + $0x280] ss:$16 sps:$4 sm:$0xff]   ;;  %v5874_v22 = vld [vmem:[#allocation5 + $0x288] ss:$16 sps:$4 sm:$0xff]   ;;  %v5879_v23 = vld [vmem:[#allocation5 + $0x2a4] ss:$16 sps:$4 sm:$0xff]  }
  0xd0   :  { %v5882_v24 = vld [vmem:[#allocation5 + $0x2ac] ss:$16 sps:$4 sm:$0xff]   ;;  %v5877_v25 = vld [vmem:[#allocation5 + $0x2a0] ss:$16 sps:$4 sm:$0xff]   ;;  %v5880_v26 = vld [vmem:[#allocation5 + $0x2a8] ss:$16 sps:$4 sm:$0xff]  }
  0xd1   :  { %2160 = vmatpush1.bf16.msra.mxu0 %v5795_v30  ;;  %2365 = vmatpush1.bf16.msra.mxu1 %v5796_v31  ;;  %v5885_v27 = vld [vmem:[#allocation5 + $0x2c4] ss:$16 sps:$4 sm:$0xff]   ;;  %v5888_v28 = vld [vmem:[#allocation5 + $0x2cc] ss:$16 sps:$4 sm:$0xff]   ;;  %v5883_v31 = vld [vmem:[#allocation5 + $0x2c0] ss:$16 sps:$4 sm:$0xff]  }
  0xd2   :  { %2161 = vmatprep.subr.bf16.mxu0 %v5797_v32  ;;  %2366 = vmatprep.subr.bf16.mxu1 %v5799_v33  ;;  %v7099_v29 = vld [vmem:[#allocation2 + $0x8] sm:$0xff]  ;;  %v5886_v32 = vld [vmem:[#allocation5 + $0x2c8] ss:$16 sps:$4 sm:$0xff]   ;;  %v5912_v46 = vld [vmem:[#allocation5 + $0x34c] ss:$16 sps:$4 sm:$0xff]  }
  0xd3   :  { %v4942_v30 = vcombine.high %v7099_v29, %v7099_v29  ;;  %v5891_v33 = vld [vmem:[#allocation5 + $0x2e4] ss:$16 sps:$4 sm:$0xff]   ;;  %v5910_v48 = vld [vmem:[#allocation5 + $0x348] ss:$16 sps:$4 sm:$0xff]  }
  0xd5   :  { %2162 = vmatpush1.bf16.msra.mxu0 %v5801_v34  ;;  %2367 = vmatpush1.bf16.msra.mxu1 %v5802_v35  ;;  %v5894_v34 = vld [vmem:[#allocation5 + $0x2ec] ss:$16 sps:$4 sm:$0xff]   ;;  %v5889_v35 = vld [vmem:[#allocation5 + $0x2e0] ss:$16 sps:$4 sm:$0xff]  }
  0xd6   :  { %2163 = vmatprep.subr.bf16.mxu0 %v5803_v36  ;;  %2368 = vmatprep.subr.bf16.mxu1 %v5805_v37  ;;  %v5892_v36 = vld [vmem:[#allocation5 + $0x2e8] ss:$16 sps:$4 sm:$0xff]   ;;  %v5897_v37 = vld [vmem:[#allocation5 + $0x304] ss:$16 sps:$4 sm:$0xff]  }
  0xd9   :  { %2164 = vmatpush1.bf16.msra.mxu0 %v5807_v38  ;;  %2369 = vmatpush1.bf16.msra.mxu1 %v5808_v39  ;;  %v5900_v38 = vld [vmem:[#allocation5 + $0x30c] ss:$16 sps:$4 sm:$0xff]   ;;  %v5895_v39 = vld [vmem:[#allocation5 + $0x300] ss:$16 sps:$4 sm:$0xff]  }
  0xda   :  { %2165 = vmatprep.subr.bf16.mxu0 %v5809_v40  ;;  %2370 = vmatprep.subr.bf16.mxu1 %v5811_v41  ;;  %v5898_v40 = vld [vmem:[#allocation5 + $0x308] ss:$16 sps:$4 sm:$0xff]   ;;  %v5903_v41 = vld [vmem:[#allocation5 + $0x324] ss:$16 sps:$4 sm:$0xff]  }
  0xdd   :  { %2166 = vmatpush1.bf16.msra.mxu0 %v5813_v42  ;;  %2371 = vmatpush1.bf16.msra.mxu1 %v5814_v43  ;;  %v5906_v42 = vld [vmem:[#allocation5 + $0x32c] ss:$16 sps:$4 sm:$0xff]   ;;  %v5901_v43 = vld [vmem:[#allocation5 + $0x320] ss:$16 sps:$4 sm:$0xff]  }
  0xde   :  { %2167 = vmatprep.subr.bf16.mxu0 %v5815_v44  ;;  %2372 = vmatprep.subr.bf16.mxu1 %v5817_v45  ;;  %v5904_v44 = vld [vmem:[#allocation5 + $0x328] ss:$16 sps:$4 sm:$0xff]   ;;  %v5909_v45 = vld [vmem:[#allocation5 + $0x344] ss:$16 sps:$4 sm:$0xff]  }
  0xe1   :  { %2168 = vmatpush1.bf16.msra.mxu0 %v5819_v47  ;;  %2373 = vmatpush1.bf16.msra.mxu1 %v5820_v49  ;;  %v5907_v47 = vld [vmem:[#allocation5 + $0x340] ss:$16 sps:$4 sm:$0xff]   ;;  %v5915_v49 = vld [vmem:[#allocation5 + $0x364] ss:$16 sps:$4 sm:$0xff]  }
  0xe2   :  { %2169 = vmatprep.subr.bf16.mxu0 %v5821_v50  ;;  %2374 = vmatprep.subr.bf16.mxu1 %v5823_v51  ;;  %v5918_v50 = vld [vmem:[#allocation5 + $0x36c] ss:$16 sps:$4 sm:$0xff]   ;;  %v5913_v51 = vld [vmem:[#allocation5 + $0x360] ss:$16 sps:$4 sm:$0xff]  }
  0xe5   :  { %2170 = vmatpush1.bf16.msra.mxu0 %v5825_v52  ;;  %2375 = vmatpush1.bf16.msra.mxu1 %v5826_v53  ;;  %v5916_v52 = vld [vmem:[#allocation5 + $0x368] ss:$16 sps:$4 sm:$0xff]   ;;  %v5921_v53 = vld [vmem:[#allocation5 + $0x384] ss:$16 sps:$4 sm:$0xff]  }
  0xe6   :  { %2171 = vmatprep.subr.bf16.mxu0 %v5827_v54  ;;  %2376 = vmatprep.subr.bf16.mxu1 %v5829_v55  ;;  %v5924_v54 = vld [vmem:[#allocation5 + $0x38c] ss:$16 sps:$4 sm:$0xff]   ;;  %v5919_v55 = vld [vmem:[#allocation5 + $0x380] ss:$16 sps:$4 sm:$0xff]  }
  0xe9   :  { %2172 = vmatpush1.bf16.msra.mxu0 %v5831_v56  ;;  %2377 = vmatpush1.bf16.msra.mxu1 %v5832_v57  ;;  %v5922_v56 = vld [vmem:[#allocation5 + $0x388] ss:$16 sps:$4 sm:$0xff]   ;;  %v5927_v57 = vld [vmem:[#allocation5 + $0x3a4] ss:$16 sps:$4 sm:$0xff]  }
  0xea   :  { %2173 = vmatprep.subr.bf16.mxu0 %v5833_v58  ;;  %2378 = vmatprep.subr.bf16.mxu1 %v5835_v59  ;;  %v5930_v58 = vld [vmem:[#allocation5 + $0x3ac] ss:$16 sps:$4 sm:$0xff]   ;;  %v5925_v59 = vld [vmem:[#allocation5 + $0x3a0] ss:$16 sps:$4 sm:$0xff]  }
  0xed   :  { %2174 = vmatpush1.bf16.msra.mxu0 %v5837_v60  ;;  %2379 = vmatpush1.bf16.msra.mxu1 %v5838_v61  ;;  %v5928_v60 = vld [vmem:[#allocation5 + $0x3a8] ss:$16 sps:$4 sm:$0xff]   ;;  %v5933_v61 = vld [vmem:[#allocation5 + $0x3c4] ss:$16 sps:$4 sm:$0xff]  }
  0xee   :  { %2175 = vmatprep.subr.bf16.mxu0 %v5839_v62  ;;  %2380 = vmatprep.subr.bf16.mxu1 %v5841_v63  ;;  %v5936_v62 = vld [vmem:[#allocation5 + $0x3cc] ss:$16 sps:$4 sm:$0xff]   ;;  %v5931_v63 = vld [vmem:[#allocation5 + $0x3c0] ss:$16 sps:$4 sm:$0xff]  }
  0xf1   :  { %2176 = vmatpush1.bf16.msra.mxu0 %v5843_v0  ;;  %2381 = vmatpush1.bf16.msra.mxu1 %v5844_v1  ;;  %v5934_v0 = vld [vmem:[#allocation5 + $0x3c8] ss:$16 sps:$4 sm:$0xff]   ;;  %v5939_v1 = vld [vmem:[#allocation5 + $0x3e4] ss:$16 sps:$4 sm:$0xff]  }
  0xf2   :  { %2186 = vmatprep.subr.bf16.mxu0 %v5849_v2  ;;  %2391 = vmatprep.subr.bf16.mxu1 %v5852_v3  ;;  %v5942_v2 = vld [vmem:[#allocation5 + $0x3ec] ss:$16 sps:$4 sm:$0xff]   ;;  %v5937_v3 = vld [vmem:[#allocation5 + $0x3e0] ss:$16 sps:$4 sm:$0xff]  }
  0xf4   :  { %2178 = vmatmul.mubr.bf16.vlgmr.msra.gmra.mrb[0].mxu0 %v4939_v4  ;;  %2383 = vmatmul.mubr.bf16.vlgmr.msra.gmra.mrb[0].mxu1 %v4939_v4  ;;  %v5940_v4 = vld [vmem:[#allocation5 + $0x3e8] ss:$16 sps:$4 sm:$0xff]  }
  0xf5   :  { %2187 = vmatpush1.bf16.msra.mxu0 %v5847_v5  ;;  %2392 = vmatpush1.bf16.msra.mxu1 %v5850_v6  ;;  %v5947_v5 = vld [vmem:[#allocation5 + $0x404] ss:$16 sps:$4 sm:$0xff]   ;;  %v5950_v6 = vld [vmem:[#allocation5 + $0x40c] ss:$16 sps:$4 sm:$0xff]  }
  0xf6   :  { %2188 = vmatprep.subr.bf16.mxu0 %v5855_v7  ;;  %2393 = vmatprep.subr.bf16.mxu1 %v5858_v8  ;;  %v4941_v7 = vcombine.low %v7099_v29, %v7099_v29  ;;  %v5945_v8 = vld [vmem:[#allocation5 + $0x400] ss:$16 sps:$4 sm:$0xff]   ;;  %v5980_v29 = vld [vmem:[#allocation5 + $0x4ac] ss:$16 sps:$4 sm:$0xff]  }
  0xf7   :  { %2218 = vmatprep.mubr.bf16.mxu0 %v4942_v30  ;;  %2423 = vmatprep.mubr.bf16.mxu1 %v4942_v30  ;;  %v5975_v30 = vld [vmem:[#allocation5 + $0x4a0] ss:$16 sps:$4 sm:$0xff]  }
  0xf9   :  { %2189 = vmatpush1.bf16.msra.mxu0 %v5853_v9  ;;  %2394 = vmatpush1.bf16.msra.mxu1 %v5856_v10  ;;  %v5948_v9 = vld [vmem:[#allocation5 + $0x408] ss:$16 sps:$4 sm:$0xff]   ;;  %v5953_v10 = vld [vmem:[#allocation5 + $0x424] ss:$16 sps:$4 sm:$0xff]  }
  0xfa   :  { %2190 = vmatprep.subr.bf16.mxu0 %v5861_v11  ;;  %2395 = vmatprep.subr.bf16.mxu1 %v5864_v12  ;;  %v7105_v11 = vld [vmem:[#allocation2 + $0x10] sm:$0xff] }
  0xfb   :  { %v5956_v12 = vld [vmem:[#allocation5 + $0x42c] ss:$16 sps:$4 sm:$0xff]  }
  0xfd   :  { %2191 = vmatpush1.bf16.msra.mxu0 %v5859_v13  ;;  %2396 = vmatpush1.bf16.msra.mxu1 %v5862_v14  ;;  %v4944_v13 = vcombine.high %v7105_v11, %v7105_v11  ;;  %v5951_v14 = vld [vmem:[#allocation5 + $0x420] ss:$16 sps:$4 sm:$0xff]  }
  0xfe   :  { %2192 = vmatprep.subr.bf16.mxu0 %v5867_v15  ;;  %2397 = vmatprep.subr.bf16.mxu1 %v5870_v16  ;;  %v5954_v15 = vld [vmem:[#allocation5 + $0x428] ss:$16 sps:$4 sm:$0xff]   ;;  %v5959_v16 = vld [vmem:[#allocation5 + $0x444] ss:$16 sps:$4 sm:$0xff]  }
 0x101   :  { %2193 = vmatpush1.bf16.msra.mxu0 %v5865_v17  ;;  %2398 = vmatpush1.bf16.msra.mxu1 %v5868_v18  ;;  %v5962_v17 = vld [vmem:[#allocation5 + $0x44c] ss:$16 sps:$4 sm:$0xff]   ;;  %v5957_v18 = vld [vmem:[#allocation5 + $0x440] ss:$16 sps:$4 sm:$0xff]  }
 0x102   :  { %2194 = vmatprep.subr.bf16.mxu0 %v5873_v19  ;;  %2399 = vmatprep.subr.bf16.mxu1 %v5876_v20  ;;  %v5960_v19 = vld [vmem:[#allocation5 + $0x448] ss:$16 sps:$4 sm:$0xff]   ;;  %v5965_v20 = vld [vmem:[#allocation5 + $0x464] ss:$16 sps:$4 sm:$0xff]  }
 0x105   :  { %2195 = vmatpush1.bf16.msra.mxu0 %v5871_v21  ;;  %2400 = vmatpush1.bf16.msra.mxu1 %v5874_v22  ;;  %v5968_v21 = vld [vmem:[#allocation5 + $0x46c] ss:$16 sps:$4 sm:$0xff]   ;;  %v5963_v22 = vld [vmem:[#allocation5 + $0x460] ss:$16 sps:$4 sm:$0xff]  }
 0x106   :  { %2196 = vmatprep.subr.bf16.mxu0 %v5879_v23  ;;  %2401 = vmatprep.subr.bf16.mxu1 %v5882_v24  ;;  %v5966_v23 = vld [vmem:[#allocation5 + $0x468] ss:$16 sps:$4 sm:$0xff]   ;;  %v5971_v24 = vld [vmem:[#allocation5 + $0x484] ss:$16 sps:$4 sm:$0xff]  }
 0x109   :  { %2197 = vmatpush1.bf16.msra.mxu0 %v5877_v25  ;;  %2402 = vmatpush1.bf16.msra.mxu1 %v5880_v26  ;;  %v5974_v25 = vld [vmem:[#allocation5 + $0x48c] ss:$16 sps:$4 sm:$0xff]   ;;  %v5969_v26 = vld [vmem:[#allocation5 + $0x480] ss:$16 sps:$4 sm:$0xff]  }
 0x10a   :  { %2198 = vmatprep.subr.bf16.mxu0 %v5885_v27  ;;  %2403 = vmatprep.subr.bf16.mxu1 %v5888_v28  ;;  %v5972_v27 = vld [vmem:[#allocation5 + $0x488] ss:$16 sps:$4 sm:$0xff]   ;;  %v5977_v28 = vld [vmem:[#allocation5 + $0x4a4] ss:$16 sps:$4 sm:$0xff]  }
 0x10d   :  { %2199 = vmatpush1.bf16.msra.mxu0 %v5883_v31  ;;  %2404 = vmatpush1.bf16.msra.mxu1 %v5886_v32  ;;  %v5978_v31 = vld [vmem:[#allocation5 + $0x4a8] ss:$16 sps:$4 sm:$0xff]   ;;  %v5983_v32 = vld [vmem:[#allocation5 + $0x4c4] ss:$16 sps:$4 sm:$0xff]  }
 0x10e   :  { %2200 = vmatprep.subr.bf16.mxu0 %v5891_v33  ;;  %2405 = vmatprep.subr.bf16.mxu1 %v5894_v34  ;;  %v5986_v33 = vld [vmem:[#allocation5 + $0x4cc] ss:$16 sps:$4 sm:$0xff]   ;;  %v5981_v34 = vld [vmem:[#allocation5 + $0x4c0] ss:$16 sps:$4 sm:$0xff]  }
 0x111   :  { %2201 = vmatpush1.bf16.msra.mxu0 %v5889_v35  ;;  %2406 = vmatpush1.bf16.msra.mxu1 %v5892_v36  ;;  %v5984_v35 = vld [vmem:[#allocation5 + $0x4c8] ss:$16 sps:$4 sm:$0xff]   ;;  %v5989_v36 = vld [vmem:[#allocation5 + $0x4e4] ss:$16 sps:$4 sm:$0xff]  }
 0x112   :  { %2202 = vmatprep.subr.bf16.mxu0 %v5897_v37  ;;  %2407 = vmatprep.subr.bf16.mxu1 %v5900_v38  ;;  %v5992_v37 = vld [vmem:[#allocation5 + $0x4ec] ss:$16 sps:$4 sm:$0xff]   ;;  %v5987_v38 = vld [vmem:[#allocation5 + $0x4e0] ss:$16 sps:$4 sm:$0xff]  }
 0x115   :  { %2203 = vmatpush1.bf16.msra.mxu0 %v5895_v39  ;;  %2408 = vmatpush1.bf16.msra.mxu1 %v5898_v40  ;;  %v5990_v39 = vld [vmem:[#allocation5 + $0x4e8] ss:$16 sps:$4 sm:$0xff]   ;;  %v5995_v40 = vld [vmem:[#allocation5 + $0x504] ss:$16 sps:$4 sm:$0xff]  }
 0x116   :  { %2204 = vmatprep.subr.bf16.mxu0 %v5903_v41  ;;  %2409 = vmatprep.subr.bf16.mxu1 %v5906_v42  ;;  %v5998_v41 = vld [vmem:[#allocation5 + $0x50c] ss:$16 sps:$4 sm:$0xff]   ;;  %v5993_v42 = vld [vmem:[#allocation5 + $0x500] ss:$16 sps:$4 sm:$0xff]  }
 0x119   :  { %2205 = vmatpush1.bf16.msra.mxu0 %v5901_v43  ;;  %2410 = vmatpush1.bf16.msra.mxu1 %v5904_v44  ;;  %v5996_v43 = vld [vmem:[#allocation5 + $0x508] ss:$16 sps:$4 sm:$0xff]   ;;  %v6001_v44 = vld [vmem:[#allocation5 + $0x524] ss:$16 sps:$4 sm:$0xff]  }
 0x11a   :  { %2206 = vmatprep.subr.bf16.mxu0 %v5909_v45  ;;  %2411 = vmatprep.subr.bf16.mxu1 %v5912_v46  ;;  %v6004_v45 = vld [vmem:[#allocation5 + $0x52c] ss:$16 sps:$4 sm:$0xff]   ;;  %v5999_v46 = vld [vmem:[#allocation5 + $0x520] ss:$16 sps:$4 sm:$0xff]  }
 0x11d   :  { %2207 = vmatpush1.bf16.msra.mxu0 %v5907_v47  ;;  %2412 = vmatpush1.bf16.msra.mxu1 %v5910_v48  ;;  %v6002_v47 = vld [vmem:[#allocation5 + $0x528] ss:$16 sps:$4 sm:$0xff]   ;;  %v6007_v48 = vld [vmem:[#allocation5 + $0x544] ss:$16 sps:$4 sm:$0xff]  }
 0x11e   :  { %2208 = vmatprep.subr.bf16.mxu0 %v5915_v49  ;;  %2413 = vmatprep.subr.bf16.mxu1 %v5918_v50  ;;  %v6010_v49 = vld [vmem:[#allocation5 + $0x54c] ss:$16 sps:$4 sm:$0xff]   ;;  %v6005_v50 = vld [vmem:[#allocation5 + $0x540] ss:$16 sps:$4 sm:$0xff]  }
 0x121   :  { %2209 = vmatpush1.bf16.msra.mxu0 %v5913_v51  ;;  %2414 = vmatpush1.bf16.msra.mxu1 %v5916_v52  ;;  %v6008_v51 = vld [vmem:[#allocation5 + $0x548] ss:$16 sps:$4 sm:$0xff]   ;;  %v6013_v52 = vld [vmem:[#allocation5 + $0x564] ss:$16 sps:$4 sm:$0xff]  }
 0x122   :  { %2210 = vmatprep.subr.bf16.mxu0 %v5921_v53  ;;  %2415 = vmatprep.subr.bf16.mxu1 %v5924_v54  ;;  %v6016_v53 = vld [vmem:[#allocation5 + $0x56c] ss:$16 sps:$4 sm:$0xff]   ;;  %v6011_v54 = vld [vmem:[#allocation5 + $0x560] ss:$16 sps:$4 sm:$0xff]  }
 0x125   :  { %2211 = vmatpush1.bf16.msra.mxu0 %v5919_v55  ;;  %2416 = vmatpush1.bf16.msra.mxu1 %v5922_v56  ;;  %v6014_v55 = vld [vmem:[#allocation5 + $0x568] ss:$16 sps:$4 sm:$0xff]   ;;  %v6019_v56 = vld [vmem:[#allocation5 + $0x584] ss:$16 sps:$4 sm:$0xff]  }
 0x126   :  { %2212 = vmatprep.subr.bf16.mxu0 %v5927_v57  ;;  %2417 = vmatprep.subr.bf16.mxu1 %v5930_v58  ;;  %v6022_v57 = vld [vmem:[#allocation5 + $0x58c] ss:$16 sps:$4 sm:$0xff]   ;;  %v6017_v58 = vld [vmem:[#allocation5 + $0x580] ss:$16 sps:$4 sm:$0xff]  }
 0x129   :  { %2213 = vmatpush1.bf16.msra.mxu0 %v5925_v59  ;;  %2418 = vmatpush1.bf16.msra.mxu1 %v5928_v60  ;;  %v6020_v59 = vld [vmem:[#allocation5 + $0x588] ss:$16 sps:$4 sm:$0xff]   ;;  %v6025_v60 = vld [vmem:[#allocation5 + $0x5a4] ss:$16 sps:$4 sm:$0xff]  }
 0x12a   :  { %2214 = vmatprep.subr.bf16.mxu0 %v5933_v61  ;;  %2419 = vmatprep.subr.bf16.mxu1 %v5936_v62  ;;  %v6028_v61 = vld [vmem:[#allocation5 + $0x5ac] ss:$16 sps:$4 sm:$0xff]   ;;  %v6023_v62 = vld [vmem:[#allocation5 + $0x5a0] ss:$16 sps:$4 sm:$0xff]  }
 0x12d   :  { %2215 = vmatpush1.bf16.msra.mxu0 %v5931_v63  ;;  %2420 = vmatpush1.bf16.msra.mxu1 %v5934_v0  ;;  %v6026_v63 = vld [vmem:[#allocation5 + $0x5a8] ss:$16 sps:$4 sm:$0xff]   ;;  %v6031_v0 = vld [vmem:[#allocation5 + $0x5c4] ss:$16 sps:$4 sm:$0xff]  }
 0x12e   :  { %2216 = vmatprep.subr.bf16.mxu0 %v5939_v1  ;;  %2421 = vmatprep.subr.bf16.mxu1 %v5942_v2  ;;  %v6034_v1 = vld [vmem:[#allocation5 + $0x5cc] ss:$16 sps:$4 sm:$0xff]   ;;  %v6029_v2 = vld [vmem:[#allocation5 + $0x5c0] ss:$16 sps:$4 sm:$0xff]  }
 0x131   :  { %2217 = vmatpush1.bf16.msra.mxu0 %v5937_v3  ;;  %2422 = vmatpush1.bf16.msra.mxu1 %v5940_v4  ;;  %v6032_v3 = vld [vmem:[#allocation5 + $0x5c8] ss:$16 sps:$4 sm:$0xff]   ;;  %v6037_v4 = vld [vmem:[#allocation5 + $0x5e4] ss:$16 sps:$4 sm:$0xff]  }
 0x132   :  { %2227 = vmatprep.subr.bf16.mxu0 %v5947_v5  ;;  %2432 = vmatprep.subr.bf16.mxu1 %v5950_v6  ;;  %v6040_v5 = vld [vmem:[#allocation5 + $0x5ec] ss:$16 sps:$4 sm:$0xff]   ;;  %v6035_v6 = vld [vmem:[#allocation5 + $0x5e0] ss:$16 sps:$4 sm:$0xff]  }
 0x134   :  { %2219 = vmatmul.mubr.bf16.vlgmr.msra.gmra.mrb[0].mxu0 %v4941_v7  ;;  %2424 = vmatmul.mubr.bf16.vlgmr.msra.gmra.mrb[0].mxu1 %v4941_v7  ;;  %v6038_v7 = vld [vmem:[#allocation5 + $0x5e8] ss:$16 sps:$4 sm:$0xff]  }
 0x135   :  { %2228 = vmatpush1.bf16.msra.mxu0 %v5945_v8  ;;  %2433 = vmatpush1.bf16.msra.mxu1 %v5948_v9  ;;  %v6045_v8 = vld [vmem:[#allocation5 + $0x604] ss:$16 sps:$4 sm:$0xff]   ;;  %v6048_v9 = vld [vmem:[#allocation5 + $0x60c] ss:$16 sps:$4 sm:$0xff]  }
 0x136   :  { %2229 = vmatprep.subr.bf16.mxu0 %v5953_v10  ;;  %2434 = vmatprep.subr.bf16.mxu1 %v5956_v12  ;;  %v6043_v10 = vld [vmem:[#allocation5 + $0x600] ss:$16 sps:$4 sm:$0xff]   ;;  %v4943_v12 = vcombine.low %v7105_v11, %v7105_v11  ;;  %v6060_v11 = vld [vmem:[#allocation5 + $0x64c] ss:$16 sps:$4 sm:$0xff]  }
 0x137   :  { %2259 = vmatprep.mubr.bf16.mxu0 %v4944_v13  ;;  %2464 = vmatprep.mubr.bf16.mxu1 %v4944_v13  ;;  %v6046_v13 = vld [vmem:[#allocation5 + $0x608] ss:$16 sps:$4 sm:$0xff]  }
 0x139   :  { %2230 = vmatpush1.bf16.msra.mxu0 %v5951_v14  ;;  %2435 = vmatpush1.bf16.msra.mxu1 %v5954_v15  ;;  %v7111_v14 = vld [vmem:[#allocation2 + $0x18] sm:$0xff] }
 0x13a   :  { %2231 = vmatprep.subr.bf16.mxu0 %v5959_v16  ;;  %2436 = vmatprep.subr.bf16.mxu1 %v5962_v17  ;;  %v6051_v15 = vld [vmem:[#allocation5 + $0x624] ss:$16 sps:$4 sm:$0xff]   ;;  %v6054_v16 = vld [vmem:[#allocation5 + $0x62c] ss:$16 sps:$4 sm:$0xff]   ;;  %v4946_v17 = vcombine.high %v7111_v14, %v7111_v14 }
 0x13d   :  { %2232 = vmatpush1.bf16.msra.mxu0 %v5957_v18  ;;  %2437 = vmatpush1.bf16.msra.mxu1 %v5960_v19  ;;  %v6049_v18 = vld [vmem:[#allocation5 + $0x620] ss:$16 sps:$4 sm:$0xff]   ;;  %v6052_v19 = vld [vmem:[#allocation5 + $0x628] ss:$16 sps:$4 sm:$0xff]  }
 0x13e   :  { %2233 = vmatprep.subr.bf16.mxu0 %v5965_v20  ;;  %2438 = vmatprep.subr.bf16.mxu1 %v5968_v21  ;;  %v6057_v20 = vld [vmem:[#allocation5 + $0x644] ss:$16 sps:$4 sm:$0xff]   ;;  %v6055_v21 = vld [vmem:[#allocation5 + $0x640] ss:$16 sps:$4 sm:$0xff]  }
 0x141   :  { %2234 = vmatpush1.bf16.msra.mxu0 %v5963_v22  ;;  %2439 = vmatpush1.bf16.msra.mxu1 %v5966_v23  ;;  %v6058_v22 = vld [vmem:[#allocation5 + $0x648] ss:$16 sps:$4 sm:$0xff]   ;;  %v6063_v23 = vld [vmem:[#allocation5 + $0x664] ss:$16 sps:$4 sm:$0xff]  }
 0x142   :  { %2235 = vmatprep.subr.bf16.mxu0 %v5971_v24  ;;  %2440 = vmatprep.subr.bf16.mxu1 %v5974_v25  ;;  %v6066_v24 = vld [vmem:[#allocation5 + $0x66c] ss:$16 sps:$4 sm:$0xff]   ;;  %v6061_v25 = vld [vmem:[#allocation5 + $0x660] ss:$16 sps:$4 sm:$0xff]  }
 0x145   :  { %2236 = vmatpush1.bf16.msra.mxu0 %v5969_v26  ;;  %2441 = vmatpush1.bf16.msra.mxu1 %v5972_v27  ;;  %v6064_v26 = vld [vmem:[#allocation5 + $0x668] ss:$16 sps:$4 sm:$0xff]   ;;  %v6069_v27 = vld [vmem:[#allocation5 + $0x684] ss:$16 sps:$4 sm:$0xff]  }
 0x146   :  { %2237 = vmatprep.subr.bf16.mxu0 %v5977_v28  ;;  %2442 = vmatprep.subr.bf16.mxu1 %v5980_v29  ;;  %v6072_v28 = vld [vmem:[#allocation5 + $0x68c] ss:$16 sps:$4 sm:$0xff]   ;;  %v6067_v29 = vld [vmem:[#allocation5 + $0x680] ss:$16 sps:$4 sm:$0xff]  }
 0x149   :  { %2238 = vmatpush1.bf16.msra.mxu0 %v5975_v30  ;;  %2443 = vmatpush1.bf16.msra.mxu1 %v5978_v31  ;;  %v6070_v30 = vld [vmem:[#allocation5 + $0x688] ss:$16 sps:$4 sm:$0xff]   ;;  %v6075_v31 = vld [vmem:[#allocation5 + $0x6a4] ss:$16 sps:$4 sm:$0xff]  }
 0x14a   :  { %2239 = vmatprep.subr.bf16.mxu0 %v5983_v32  ;;  %2444 = vmatprep.subr.bf16.mxu1 %v5986_v33  ;;  %v6078_v32 = vld [vmem:[#allocation5 + $0x6ac] ss:$16 sps:$4 sm:$0xff]   ;;  %v6073_v33 = vld [vmem:[#allocation5 + $0x6a0] ss:$16 sps:$4 sm:$0xff]  }
 0x14d   :  { %2240 = vmatpush1.bf16.msra.mxu0 %v5981_v34  ;;  %2445 = vmatpush1.bf16.msra.mxu1 %v5984_v35  ;;  %v6076_v34 = vld [vmem:[#allocation5 + $0x6a8] ss:$16 sps:$4 sm:$0xff]   ;;  %v6081_v35 = vld [vmem:[#allocation5 + $0x6c4] ss:$16 sps:$4 sm:$0xff]  }
 0x14e   :  { %2241 = vmatprep.subr.bf16.mxu0 %v5989_v36  ;;  %2446 = vmatprep.subr.bf16.mxu1 %v5992_v37  ;;  %v6084_v36 = vld [vmem:[#allocation5 + $0x6cc] ss:$16 sps:$4 sm:$0xff]   ;;  %v6079_v37 = vld [vmem:[#allocation5 + $0x6c0] ss:$16 sps:$4 sm:$0xff]  }
 0x151   :  { %2242 = vmatpush1.bf16.msra.mxu0 %v5987_v38  ;;  %2447 = vmatpush1.bf16.msra.mxu1 %v5990_v39  ;;  %v6082_v38 = vld [vmem:[#allocation5 + $0x6c8] ss:$16 sps:$4 sm:$0xff]   ;;  %v6087_v39 = vld [vmem:[#allocation5 + $0x6e4] ss:$16 sps:$4 sm:$0xff]  }
 0x152   :  { %2243 = vmatprep.subr.bf16.mxu0 %v5995_v40  ;;  %2448 = vmatprep.subr.bf16.mxu1 %v5998_v41  ;;  %v6090_v40 = vld [vmem:[#allocation5 + $0x6ec] ss:$16 sps:$4 sm:$0xff]   ;;  %v6085_v41 = vld [vmem:[#allocation5 + $0x6e0] ss:$16 sps:$4 sm:$0xff]  }
 0x155   :  { %2244 = vmatpush1.bf16.msra.mxu0 %v5993_v42  ;;  %2449 = vmatpush1.bf16.msra.mxu1 %v5996_v43  ;;  %v6088_v42 = vld [vmem:[#allocation5 + $0x6e8] ss:$16 sps:$4 sm:$0xff]   ;;  %v6093_v43 = vld [vmem:[#allocation5 + $0x704] ss:$16 sps:$4 sm:$0xff]  }
 0x156   :  { %2245 = vmatprep.subr.bf16.mxu0 %v6001_v44  ;;  %2450 = vmatprep.subr.bf16.mxu1 %v6004_v45  ;;  %v6096_v44 = vld [vmem:[#allocation5 + $0x70c] ss:$16 sps:$4 sm:$0xff]   ;;  %v6091_v45 = vld [vmem:[#allocation5 + $0x700] ss:$16 sps:$4 sm:$0xff]  }
 0x159   :  { %2246 = vmatpush1.bf16.msra.mxu0 %v5999_v46  ;;  %2451 = vmatpush1.bf16.msra.mxu1 %v6002_v47  ;;  %v6094_v46 = vld [vmem:[#allocation5 + $0x708] ss:$16 sps:$4 sm:$0xff]   ;;  %v6099_v47 = vld [vmem:[#allocation5 + $0x724] ss:$16 sps:$4 sm:$0xff]  }
 0x15a   :  { %2247 = vmatprep.subr.bf16.mxu0 %v6007_v48  ;;  %2452 = vmatprep.subr.bf16.mxu1 %v6010_v49  ;;  %v6102_v48 = vld [vmem:[#allocation5 + $0x72c] ss:$16 sps:$4 sm:$0xff]   ;;  %v6097_v49 = vld [vmem:[#allocation5 + $0x720] ss:$16 sps:$4 sm:$0xff]  }
 0x15d   :  { %2248 = vmatpush1.bf16.msra.mxu0 %v6005_v50  ;;  %2453 = vmatpush1.bf16.msra.mxu1 %v6008_v51  ;;  %v6100_v50 = vld [vmem:[#allocation5 + $0x728] ss:$16 sps:$4 sm:$0xff]   ;;  %v6105_v51 = vld [vmem:[#allocation5 + $0x744] ss:$16 sps:$4 sm:$0xff]  }
 0x15e   :  { %2249 = vmatprep.subr.bf16.mxu0 %v6013_v52  ;;  %2454 = vmatprep.subr.bf16.mxu1 %v6016_v53  ;;  %v6108_v52 = vld [vmem:[#allocation5 + $0x74c] ss:$16 sps:$4 sm:$0xff]   ;;  %v6103_v53 = vld [vmem:[#allocation5 + $0x740] ss:$16 sps:$4 sm:$0xff]  }
 0x161   :  { %2250 = vmatpush1.bf16.msra.mxu0 %v6011_v54  ;;  %2455 = vmatpush1.bf16.msra.mxu1 %v6014_v55  ;;  %v6106_v54 = vld [vmem:[#allocation5 + $0x748] ss:$16 sps:$4 sm:$0xff]   ;;  %v6111_v55 = vld [vmem:[#allocation5 + $0x764] ss:$16 sps:$4 sm:$0xff]  }
 0x162   :  { %2251 = vmatprep.subr.bf16.mxu0 %v6019_v56  ;;  %2456 = vmatprep.subr.bf16.mxu1 %v6022_v57  ;;  %v6114_v56 = vld [vmem:[#allocation5 + $0x76c] ss:$16 sps:$4 sm:$0xff]   ;;  %v6109_v57 = vld [vmem:[#allocation5 + $0x760] ss:$16 sps:$4 sm:$0xff]  }
 0x165   :  { %2252 = vmatpush1.bf16.msra.mxu0 %v6017_v58  ;;  %2457 = vmatpush1.bf16.msra.mxu1 %v6020_v59  ;;  %v6112_v58 = vld [vmem:[#allocation5 + $0x768] ss:$16 sps:$4 sm:$0xff]   ;;  %v6117_v59 = vld [vmem:[#allocation5 + $0x784] ss:$16 sps:$4 sm:$0xff]  }
 0x166   :  { %2253 = vmatprep.subr.bf16.mxu0 %v6025_v60  ;;  %2458 = vmatprep.subr.bf16.mxu1 %v6028_v61  ;;  %v6120_v60 = vld [vmem:[#allocation5 + $0x78c] ss:$16 sps:$4 sm:$0xff]   ;;  %v6115_v61 = vld [vmem:[#allocation5 + $0x780] ss:$16 sps:$4 sm:$0xff]  }
 0x169   :  { %2254 = vmatpush1.bf16.msra.mxu0 %v6023_v62  ;;  %2459 = vmatpush1.bf16.msra.mxu1 %v6026_v63  ;;  %v6118_v62 = vld [vmem:[#allocation5 + $0x788] ss:$16 sps:$4 sm:$0xff]   ;;  %v6123_v63 = vld [vmem:[#allocation5 + $0x7a4] ss:$16 sps:$4 sm:$0xff]  }
 0x16a   :  { %2255 = vmatprep.subr.bf16.mxu0 %v6031_v0  ;;  %2460 = vmatprep.subr.bf16.mxu1 %v6034_v1  ;;  %v6126_v0 = vld [vmem:[#allocation5 + $0x7ac] ss:$16 sps:$4 sm:$0xff]   ;;  %v6121_v1 = vld [vmem:[#allocation5 + $0x7a0] ss:$16 sps:$4 sm:$0xff]  }
 0x16d   :  { %2256 = vmatpush1.bf16.msra.mxu0 %v6029_v2  ;;  %2461 = vmatpush1.bf16.msra.mxu1 %v6032_v3  ;;  %v6124_v2 = vld [vmem:[#allocation5 + $0x7a8] ss:$16 sps:$4 sm:$0xff]   ;;  %v6129_v3 = vld [vmem:[#allocation5 + $0x7c4] ss:$16 sps:$4 sm:$0xff]  }
 0x16e   :  { %2257 = vmatprep.subr.bf16.mxu0 %v6037_v4  ;;  %2462 = vmatprep.subr.bf16.mxu1 %v6040_v5  ;;  %v6132_v4 = vld [vmem:[#allocation5 + $0x7cc] ss:$16 sps:$4 sm:$0xff]   ;;  %v6127_v5 = vld [vmem:[#allocation5 + $0x7c0] ss:$16 sps:$4 sm:$0xff]  }
 0x171   :  { %2258 = vmatpush1.bf16.msra.mxu0 %v6035_v6  ;;  %2463 = vmatpush1.bf16.msra.mxu1 %v6038_v7  ;;  %v6130_v6 = vld [vmem:[#allocation5 + $0x7c8] ss:$16 sps:$4 sm:$0xff]   ;;  %v6135_v7 = vld [vmem:[#allocation5 + $0x7e4] ss:$16 sps:$4 sm:$0xff]  }
 0x172   :  { %2268 = vmatprep.subr.bf16.mxu0 %v6045_v8  ;;  %2473 = vmatprep.subr.bf16.mxu1 %v6048_v9  ;;  %v6138_v8 = vld [vmem:[#allocation5 + $0x7ec] ss:$16 sps:$4 sm:$0xff]   ;;  %v6133_v9 = vld [vmem:[#allocation5 + $0x7e0] ss:$16 sps:$4 sm:$0xff]  }
 0x174   :  { %2260 = vmatmul.mubr.bf16.vlgmr.msra.gmra.mrb[0].mxu0 %v4943_v12  ;;  %2465 = vmatmul.mubr.bf16.vlgmr.msra.gmra.mrb[0].mxu1 %v4943_v12  ;;  %v6143_v12 = vld [vmem:[#allocation5 + $0x804] ss:$16 sps:$4 sm:$0xff]  }
 0x175   :  { %2269 = vmatpush1.bf16.msra.mxu0 %v6043_v10  ;;  %2474 = vmatpush1.bf16.msra.mxu1 %v6046_v13  ;;  %v6136_v10 = vld [vmem:[#allocation5 + $0x7e8] ss:$16 sps:$4 sm:$0xff]   ;;  %v6146_v13 = vld [vmem:[#allocation5 + $0x80c] ss:$16 sps:$4 sm:$0xff]  }
 0x176   :  { %2270 = vmatprep.subr.bf16.mxu0 %v6051_v15  ;;  %2475 = vmatprep.subr.bf16.mxu1 %v6054_v16  ;;  %v7115_v15 = vld [vmem:[#allocation2 + $0x20] sm:$0xff]  ;;  %v6141_v16 = vld [vmem:[#allocation5 + $0x800] ss:$16 sps:$4 sm:$0xff]  }
 0x177   :  { %2300 = vmatprep.mubr.bf16.mxu0 %v4946_v17  ;;  %2505 = vmatprep.mubr.bf16.mxu1 %v4946_v17  ;;  %v6144_v17 = vld [vmem:[#allocation5 + $0x808] ss:$16 sps:$4 sm:$0xff]  }
 0x179   :  { %2271 = vmatpush1.bf16.msra.mxu0 %v6049_v18  ;;  %2476 = vmatpush1.bf16.msra.mxu1 %v6052_v19  ;;  %v4945_v18 = vcombine.low %v7111_v14, %v7111_v14  ;;  %v6149_v19 = vld [vmem:[#allocation5 + $0x824] ss:$16 sps:$4 sm:$0xff]   ;;  %v6153_v14 = vld [vmem:[#allocation5 + $0x840] ss:$16 sps:$4 sm:$0xff]  }
 0x17a   :  { %2272 = vmatprep.subr.bf16.mxu0 %v6057_v20  ;;  %2477 = vmatprep.subr.bf16.mxu1 %v6060_v11  ;;  %v6152_v20 = vld [vmem:[#allocation5 + $0x82c] ss:$16 sps:$4 sm:$0xff]   ;;  %v6147_v11 = vld [vmem:[#allocation5 + $0x820] ss:$16 sps:$4 sm:$0xff]  }
 0x17d   :  { %2273 = vmatpush1.bf16.msra.mxu0 %v6055_v21  ;;  %2478 = vmatpush1.bf16.msra.mxu1 %v6058_v22  ;;  %v6150_v21 = vld [vmem:[#allocation5 + $0x828] ss:$16 sps:$4 sm:$0xff]   ;;  %v4948_v22 = vcombine.high %v7115_v15, %v7115_v15 }
 0x17e   :  { %2274 = vmatprep.subr.bf16.mxu0 %v6063_v23  ;;  %2479 = vmatprep.subr.bf16.mxu1 %v6066_v24  ;;  %v6155_v23 = vld [vmem:[#allocation5 + $0x844] ss:$16 sps:$4 sm:$0xff]   ;;  %v6158_v24 = vld [vmem:[#allocation5 + $0x84c] ss:$16 sps:$4 sm:$0xff]  }
 0x181   :  { %2275 = vmatpush1.bf16.msra.mxu0 %v6061_v25  ;;  %2480 = vmatpush1.bf16.msra.mxu1 %v6064_v26  ;;  %v6156_v25 = vld [vmem:[#allocation5 + $0x848] ss:$16 sps:$4 sm:$0xff]   ;;  %v6161_v26 = vld [vmem:[#allocation5 + $0x864] ss:$16 sps:$4 sm:$0xff]  }
 0x182   :  { %2276 = vmatprep.subr.bf16.mxu0 %v6069_v27  ;;  %2481 = vmatprep.subr.bf16.mxu1 %v6072_v28  ;;  %v6164_v27 = vld [vmem:[#allocation5 + $0x86c] ss:$16 sps:$4 sm:$0xff]   ;;  %v6159_v28 = vld [vmem:[#allocation5 + $0x860] ss:$16 sps:$4 sm:$0xff]  }
 0x185   :  { %2277 = vmatpush1.bf16.msra.mxu0 %v6067_v29  ;;  %2482 = vmatpush1.bf16.msra.mxu1 %v6070_v30  ;;  %v6162_v29 = vld [vmem:[#allocation5 + $0x868] ss:$16 sps:$4 sm:$0xff]   ;;  %v6167_v30 = vld [vmem:[#allocation5 + $0x884] ss:$16 sps:$4 sm:$0xff]  }
 0x186   :  { %2278 = vmatprep.subr.bf16.mxu0 %v6075_v31  ;;  %2483 = vmatprep.subr.bf16.mxu1 %v6078_v32  ;;  %v6170_v31 = vld [vmem:[#allocation5 + $0x88c] ss:$16 sps:$4 sm:$0xff]   ;;  %v6165_v32 = vld [vmem:[#allocation5 + $0x880] ss:$16 sps:$4 sm:$0xff]  }
 0x189   :  { %2279 = vmatpush1.bf16.msra.mxu0 %v6073_v33  ;;  %2484 = vmatpush1.bf16.msra.mxu1 %v6076_v34  ;;  %v6168_v33 = vld [vmem:[#allocation5 + $0x888] ss:$16 sps:$4 sm:$0xff]   ;;  %v6173_v34 = vld [vmem:[#allocation5 + $0x8a4] ss:$16 sps:$4 sm:$0xff]  }
 0x18a   :  { %2280 = vmatprep.subr.bf16.mxu0 %v6081_v35  ;;  %2485 = vmatprep.subr.bf16.mxu1 %v6084_v36  ;;  %v6176_v35 = vld [vmem:[#allocation5 + $0x8ac] ss:$16 sps:$4 sm:$0xff]   ;;  %v6171_v36 = vld [vmem:[#allocation5 + $0x8a0] ss:$16 sps:$4 sm:$0xff]  }
 0x18d   :  { %2281 = vmatpush1.bf16.msra.mxu0 %v6079_v37  ;;  %2486 = vmatpush1.bf16.msra.mxu1 %v6082_v38  ;;  %v6174_v37 = vld [vmem:[#allocation5 + $0x8a8] ss:$16 sps:$4 sm:$0xff]   ;;  %v6179_v38 = vld [vmem:[#allocation5 + $0x8c4] ss:$16 sps:$4 sm:$0xff]  }
 0x18e   :  { %2282 = vmatprep.subr.bf16.mxu0 %v6087_v39  ;;  %2487 = vmatprep.subr.bf16.mxu1 %v6090_v40  ;;  %v6182_v39 = vld [vmem:[#allocation5 + $0x8cc] ss:$16 sps:$4 sm:$0xff]   ;;  %v6177_v40 = vld [vmem:[#allocation5 + $0x8c0] ss:$16 sps:$4 sm:$0xff]  }
 0x191   :  { %2283 = vmatpush1.bf16.msra.mxu0 %v6085_v41  ;;  %2488 = vmatpush1.bf16.msra.mxu1 %v6088_v42  ;;  %v6180_v41 = vld [vmem:[#allocation5 + $0x8c8] ss:$16 sps:$4 sm:$0xff]   ;;  %v6185_v42 = vld [vmem:[#allocation5 + $0x8e4] ss:$16 sps:$4 sm:$0xff]  }
 0x192   :  { %2284 = vmatprep.subr.bf16.mxu0 %v6093_v43  ;;  %2489 = vmatprep.subr.bf16.mxu1 %v6096_v44  ;;  %v6188_v43 = vld [vmem:[#allocation5 + $0x8ec] ss:$16 sps:$4 sm:$0xff]   ;;  %v6183_v44 = vld [vmem:[#allocation5 + $0x8e0] ss:$16 sps:$4 sm:$0xff]  }
 0x195   :  { %2285 = vmatpush1.bf16.msra.mxu0 %v6091_v45  ;;  %2490 = vmatpush1.bf16.msra.mxu1 %v6094_v46  ;;  %v6186_v45 = vld [vmem:[#allocation5 + $0x8e8] ss:$16 sps:$4 sm:$0xff]   ;;  %v6191_v46 = vld [vmem:[#allocation5 + $0x904] ss:$16 sps:$4 sm:$0xff]  }
 0x196   :  { %2286 = vmatprep.subr.bf16.mxu0 %v6099_v47  ;;  %2491 = vmatprep.subr.bf16.mxu1 %v6102_v48  ;;  %v6194_v47 = vld [vmem:[#allocation5 + $0x90c] ss:$16 sps:$4 sm:$0xff]   ;;  %v6189_v48 = vld [vmem:[#allocation5 + $0x900] ss:$16 sps:$4 sm:$0xff]  }
 0x199   :  { %2287 = vmatpush1.bf16.msra.mxu0 %v6097_v49  ;;  %2492 = vmatpush1.bf16.msra.mxu1 %v6100_v50  ;;  %v6192_v49 = vld [vmem:[#allocation5 + $0x908] ss:$16 sps:$4 sm:$0xff]   ;;  %v6197_v50 = vld [vmem:[#allocation5 + $0x924] ss:$16 sps:$4 sm:$0xff]  }
 0x19a   :  { %2288 = vmatprep.subr.bf16.mxu0 %v6105_v51  ;;  %2493 = vmatprep.subr.bf16.mxu1 %v6108_v52  ;;  %v6200_v51 = vld [vmem:[#allocation5 + $0x92c] ss:$16 sps:$4 sm:$0xff]   ;;  %v6195_v52 = vld [vmem:[#allocation5 + $0x920] ss:$16 sps:$4 sm:$0xff]  }
 0x19d   :  { %2289 = vmatpush1.bf16.msra.mxu0 %v6103_v53  ;;  %2494 = vmatpush1.bf16.msra.mxu1 %v6106_v54  ;;  %v6198_v53 = vld [vmem:[#allocation5 + $0x928] ss:$16 sps:$4 sm:$0xff]   ;;  %v6203_v54 = vld [vmem:[#allocation5 + $0x944] ss:$16 sps:$4 sm:$0xff]  }
 0x19e   :  { %2290 = vmatprep.subr.bf16.mxu0 %v6111_v55  ;;  %2495 = vmatprep.subr.bf16.mxu1 %v6114_v56  ;;  %v6206_v55 = vld [vmem:[#allocation5 + $0x94c] ss:$16 sps:$4 sm:$0xff]   ;;  %v6201_v56 = vld [vmem:[#allocation5 + $0x940] ss:$16 sps:$4 sm:$0xff]  }
 0x1a1   :  { %2291 = vmatpush1.bf16.msra.mxu0 %v6109_v57  ;;  %2496 = vmatpush1.bf16.msra.mxu1 %v6112_v58  ;;  %v6204_v57 = vld [vmem:[#allocation5 + $0x948] ss:$16 sps:$4 sm:$0xff]   ;;  %v6209_v58 = vld [vmem:[#allocation5 + $0x964] ss:$16 sps:$4 sm:$0xff]  }
 0x1a2   :  { %2292 = vmatprep.subr.bf16.mxu0 %v6117_v59  ;;  %2497 = vmatprep.subr.bf16.mxu1 %v6120_v60  ;;  %v6212_v59 = vld [vmem:[#allocation5 + $0x96c] ss:$16 sps:$4 sm:$0xff]   ;;  %v6207_v60 = vld [vmem:[#allocation5 + $0x960] ss:$16 sps:$4 sm:$0xff]  }
 0x1a5   :  { %2293 = vmatpush1.bf16.msra.mxu0 %v6115_v61  ;;  %2498 = vmatpush1.bf16.msra.mxu1 %v6118_v62  ;;  %v6210_v61 = vld [vmem:[#allocation5 + $0x968] ss:$16 sps:$4 sm:$0xff]   ;;  %v6215_v62 = vld [vmem:[#allocation5 + $0x984] ss:$16 sps:$4 sm:$0xff]  }
 0x1a6   :  { %2294 = vmatprep.subr.bf16.mxu0 %v6123_v63  ;;  %2499 = vmatprep.subr.bf16.mxu1 %v6126_v0  ;;  %v6218_v63 = vld [vmem:[#allocation5 + $0x98c] ss:$16 sps:$4 sm:$0xff]   ;;  %v6213_v0 = vld [vmem:[#allocation5 + $0x980] ss:$16 sps:$4 sm:$0xff]  }
 0x1a9   :  { %2295 = vmatpush1.bf16.msra.mxu0 %v6121_v1  ;;  %2500 = vmatpush1.bf16.msra.mxu1 %v6124_v2  ;;  %v6216_v1 = vld [vmem:[#allocation5 + $0x988] ss:$16 sps:$4 sm:$0xff]   ;;  %v6221_v2 = vld [vmem:[#allocation5 + $0x9a4] ss:$16 sps:$4 sm:$0xff]  }
 0x1aa   :  { %2296 = vmatprep.subr.bf16.mxu0 %v6129_v3  ;;  %2501 = vmatprep.subr.bf16.mxu1 %v6132_v4  ;;  %v6224_v3 = vld [vmem:[#allocation5 + $0x9ac] ss:$16 sps:$4 sm:$0xff]   ;;  %v6219_v4 = vld [vmem:[#allocation5 + $0x9a0] ss:$16 sps:$4 sm:$0xff]  }
 0x1ad   :  { %2297 = vmatpush1.bf16.msra.mxu0 %v6127_v5  ;;  %2502 = vmatpush1.bf16.msra.mxu1 %v6130_v6  ;;  %v6222_v5 = vld [vmem:[#allocation5 + $0x9a8] ss:$16 sps:$4 sm:$0xff]   ;;  %v6227_v6 = vld [vmem:[#allocation5 + $0x9c4] ss:$16 sps:$4 sm:$0xff]  }
 0x1ae   :  { %2298 = vmatprep.subr.bf16.mxu0 %v6135_v7  ;;  %2503 = vmatprep.subr.bf16.mxu1 %v6138_v8  ;;  %v6230_v7 = vld [vmem:[#allocation5 + $0x9cc] ss:$16 sps:$4 sm:$0xff]   ;;  %v6225_v8 = vld [vmem:[#allocation5 + $0x9c0] ss:$16 sps:$4 sm:$0xff]  }
 0x1b1   :  { %2299 = vmatpush1.bf16.msra.mxu0 %v6133_v9  ;;  %2504 = vmatpush1.bf16.msra.mxu1 %v6136_v10  ;;  %v6228_v9 = vld [vmem:[#allocation5 + $0x9c8] ss:$16 sps:$4 sm:$0xff]   ;;  %v6233_v10 = vld [vmem:[#allocation5 + $0x9e4] ss:$16 sps:$4 sm:$0xff]  }
 0x1b2   :  { %2309 = vmatprep.subr.bf16.mxu0 %v6143_v12  ;;  %2514 = vmatprep.subr.bf16.mxu1 %v6146_v13  ;;  %v6236_v12 = vld [vmem:[#allocation5 + $0x9ec] ss:$16 sps:$4 sm:$0xff]  }
 0x1b3   :  { %v2575_v13 = vld [vmem:[%s7391_s3 + $0x80] sm:$0xff] }
 0x1b4   :  { %2301 = vmatmul.mubr.bf16.vlgmr.msra.gmra.mrb[0].mxu0 %v4945_v18  ;;  %2506 = vmatmul.mubr.bf16.vlgmr.msra.gmra.mrb[0].mxu1 %v4945_v18  ;;  %v2608_v18 = vld [vmem:[%s7391_s3 + $0x188] sm:$0xff] }
 0x1b5   :  { %2310 = vmatpush1.bf16.msra.mxu0 %v6141_v16  ;;  %2515 = vmatpush1.bf16.msra.mxu1 %v6144_v17  ;;  %v2576_v16 = vld [vmem:[%s7391_s3 + $0x88] sm:$0xff]  ;;  %v2607_v17 = vld [vmem:[%s7391_s3 + $0x180] sm:$0xff] }
 0x1b6   :  { %2311 = vmatprep.subr.bf16.mxu0 %v6149_v19  ;;  %2516 = vmatprep.subr.bf16.mxu1 %v6152_v20  ;;  %v6231_v19 = vld [vmem:[#allocation5 + $0x9e0] ss:$16 sps:$4 sm:$0xff]   ;;  %v6234_v20 = vld [vmem:[#allocation5 + $0x9e8] ss:$16 sps:$4 sm:$0xff]  }
 0x1b7   :  { %2341 = vmatprep.mubr.bf16.mxu0 %v4948_v22  ;;  %2546 = vmatprep.mubr.bf16.mxu1 %v4948_v22  ;;  %v2591_v22 = vld [vmem:[%s7391_s3 + $0x100] sm:$0xff] }
 0x1b9   :  { %2312 = vmatpush1.bf16.msra.mxu0 %v6147_v11  ;;  %2517 = vmatpush1.bf16.msra.mxu1 %v6150_v21  ;;  %v2559_v11 = vld [vmem:[%s7391_s3] sm:$0xff]  ;;  %v2560_v21 = vld [vmem:[%s7391_s3 + $0x8] sm:$0xff] }
 0x1ba   :  { %2313 = vmatprep.subr.bf16.mxu0 %v6155_v23  ;;  %2518 = vmatprep.subr.bf16.mxu1 %v6158_v24  ;;  %v2592_v23 = vld [vmem:[%s7391_s3 + $0x108] sm:$0xff]  ;;  %v2577_v24 = vld [vmem:[%s7391_s3 + $0x90] sm:$0xff] }
 0x1bd   :  { %2314 = vmatpush1.bf16.msra.mxu0 %v6153_v14  ;;  %2519 = vmatpush1.bf16.msra.mxu1 %v6156_v25  ;;  %v5601_v14 = vpack.c.bf16 %v2576_v16, %v2575_v13  ;;  %v5633_v25 = vpack.c.bf16 %v2608_v18, %v2607_v17  ;;  %v2618_v13 = vld [vmem:[%s7391_s3 + $0x1d8] sm:$0xff]  ;;  %v2569_v18 = vld [vmem:[%s7391_s3 + $0x50] sm:$0xff] }
 0x1be   :  { %2315 = vmatprep.subr.bf16.mxu0 %v6161_v26  ;;  %2520 = vmatprep.subr.bf16.mxu1 %v6164_v27  ;;  %v2578_v26 = vld [vmem:[%s7391_s3 + $0x98] sm:$0xff]  ;;  %v2609_v27 = vld [vmem:[%s7391_s3 + $0x190] sm:$0xff] }
 0x1c1   :  { %2316 = vmatpush1.bf16.msra.mxu0 %v6159_v28  ;;  %2521 = vmatpush1.bf16.msra.mxu1 %v6162_v29  ;;  %v2610_v28 = vld [vmem:[%s7391_s3 + $0x198] sm:$0xff]  ;;  %v4947_v29 = vcombine.low %v7115_v15, %v7115_v15  ;;  %v2593_v15 = vld [vmem:[%s7391_s3 + $0x110] sm:$0xff] }
 0x1c2   :  { %2317 = vmatprep.subr.bf16.mxu0 %v6167_v30  ;;  %2522 = vmatprep.subr.bf16.mxu1 %v6170_v31  ;;  %v5603_v30 = vpack.c.bf16 %v2560_v21, %v2559_v11  ;;  %v5635_v31 = vpack.c.bf16 %v2592_v23, %v2591_v22  ;;  %v2601_v21 = vld [vmem:[%s7391_s3 + $0x150] sm:$0xff]  ;;  %v2602_v22 = vld [vmem:[%s7391_s3 + $0x158] sm:$0xff]  ;;  %v2587_v23 = vld [vmem:[%s7391_s3 + $0xe0] sm:$0xff] }
 0x1c5   :  { %2318 = vmatpush1.bf16.msra.mxu0 %v6165_v32  ;;  %2523 = vmatpush1.bf16.msra.mxu1 %v6168_v33  ;;  %v2561_v32 = vld [vmem:[%s7391_s3 + $0x10] sm:$0xff]  ;;  %v2562_v33 = vld [vmem:[%s7391_s3 + $0x18] sm:$0xff] }
 0x1c6   :  { %2319 = vmatprep.subr.bf16.mxu0 %v6173_v34  ;;  %2524 = vmatprep.subr.bf16.mxu1 %v6176_v35  ;;  %v5605_v34 = vpack.c.bf16 %v2578_v26, %v2577_v24  ;;  %v5637_v35 = vpack.c.bf16 %v2610_v28, %v2609_v27  ;;  %v2588_v24 = vld [vmem:[%s7391_s3 + $0xe8] sm:$0xff]  ;;  %v5655_v27 = vpack.c.bf16 %v2602_v22, %v2601_v21  ;;  %v2765_v21 = vld [vmem:[#allocation8 + $0x10] sm:$0xff] }
 0x1c7   :  { %v5625_v28 = vpack.c.bf16 %v2588_v24, %v2587_v23  ;;  %v2769_v22 = vld [vmem:[#allocation8 + $0x30] sm:$0xff]  ;;  %v6901_v24 = vmov 0.0  }
 0x1c8   :  { %v5671_v23 = vpack.c.bf16 %v2769_v22, %v2765_v21  ;;  %v6310_v21 = vld [vmem:[#allocation13 + $0x16c] ss:$16 sps:$4 sm:$0xff]   ;;  %v6305_v22 = vld [vmem:[#allocation13 + $0x160] ss:$16 sps:$4 sm:$0xff]  }
 0x1c9   :  { %2320 = vmatpush1.bf16.msra.mxu0 %v6171_v36  ;;  %2525 = vmatpush1.bf16.msra.mxu1 %v6174_v37  ;;  %v2594_v36 = vld [vmem:[%s7391_s3 + $0x118] sm:$0xff]  ;;  %v2579_v37 = vld [vmem:[%s7391_s3 + $0xa0] sm:$0xff] }
 0x1ca   :  { %2321 = vmatprep.subr.bf16.mxu0 %v6179_v38  ;;  %2526 = vmatprep.subr.bf16.mxu1 %v6182_v39  ;;  %v2580_v38 = vld [vmem:[%s7391_s3 + $0xa8] sm:$0xff]  ;;  %v2611_v39 = vld [vmem:[%s7391_s3 + $0x1a0] sm:$0xff] }
 0x1cd   :  { %2322 = vmatpush1.bf16.msra.mxu0 %v6177_v40  ;;  %2527 = vmatpush1.bf16.msra.mxu1 %v6180_v41  ;;  %v2612_v40 = vld [vmem:[%s7391_s3 + $0x1a8] sm:$0xff]  ;;  %v5607_v41 = vpack.c.bf16 %v2562_v33, %v2561_v32  ;;  %v2603_v32 = vld [vmem:[%s7391_s3 + $0x160] sm:$0xff] }
 0x1ce   :  { %2323 = vmatprep.subr.bf16.mxu0 %v6185_v42  ;;  %2528 = vmatprep.subr.bf16.mxu1 %v6188_v43  ;;  %v5639_v42 = vpack.c.bf16 %v2594_v36, %v2593_v15  ;;  %v2563_v43 = vld [vmem:[%s7391_s3 + $0x20] sm:$0xff]  ;;  %v2589_v15 = vld [vmem:[%s7391_s3 + $0xf0] sm:$0xff]  ;;  %v2590_v36 = vld [vmem:[%s7391_s3 + $0xf8] sm:$0xff] }
 0x1d1   :  { %2324 = vmatpush1.bf16.msra.mxu0 %v6183_v44  ;;  %2529 = vmatpush1.bf16.msra.mxu1 %v6186_v45  ;;  %v2564_v44 = vld [vmem:[%s7391_s3 + $0x28] sm:$0xff]  ;;  %v5609_v45 = vpack.c.bf16 %v2580_v38, %v2579_v37  ;;  %v2621_v37 = vld [vmem:[%s7391_s3 + $0x1f0] sm:$0xff]  ;;  %v5629_v38 = vpack.c.bf16 %v2590_v36, %v2589_v15 }
 0x1d2   :  { %2325 = vmatprep.subr.bf16.mxu0 %v6191_v46  ;;  %2530 = vmatprep.subr.bf16.mxu1 %v6194_v47  ;;  %v5641_v46 = vpack.c.bf16 %v2612_v40, %v2611_v39  ;;  %v2595_v47 = vld [vmem:[%s7391_s3 + $0x120] sm:$0xff]  ;;  %v2622_v39 = vld [vmem:[%s7391_s3 + $0x1f8] sm:$0xff]  ;;  %v2573_v40 = vld [vmem:[%s7391_s3 + $0x70] sm:$0xff] }
 0x1d3   :  { %v6250_v15 = vld [vmem:[#allocation13 + $0x2c] ss:$16 sps:$4 sm:$0xff]   ;;  %v6245_v36 = vld [vmem:[#allocation13 + $0x20] ss:$16 sps:$4 sm:$0xff]  }
 0x1d5   :  { %2326 = vmatpush1.bf16.msra.mxu0 %v6189_v48  ;;  %2531 = vmatpush1.bf16.msra.mxu1 %v6192_v49  ;;  %v2596_v48 = vld [vmem:[%s7391_s3 + $0x128] sm:$0xff]  ;;  %v2581_v49 = vld [vmem:[%s7391_s3 + $0xb0] sm:$0xff] }
 0x1d6   :  { %2327 = vmatprep.subr.bf16.mxu0 %v6197_v50  ;;  %2532 = vmatprep.subr.bf16.mxu1 %v6200_v51  ;;  %v2582_v50 = vld [vmem:[%s7391_s3 + $0xb8] sm:$0xff]  ;;  %v2613_v51 = vld [vmem:[%s7391_s3 + $0x1b0] sm:$0xff] }
 0x1d9   :  { %2328 = vmatpush1.bf16.msra.mxu0 %v6195_v52  ;;  %2533 = vmatpush1.bf16.msra.mxu1 %v6198_v53  ;;  %v2614_v52 = vld [vmem:[%s7391_s3 + $0x1b8] sm:$0xff]  ;;  %v5611_v53 = vpack.c.bf16 %v2564_v44, %v2563_v43  ;;  %v2605_v44 = vld [vmem:[%s7391_s3 + $0x170] sm:$0xff] }
 0x1da   :  { %2329 = vmatprep.subr.bf16.mxu0 %v6203_v54  ;;  %2534 = vmatprep.subr.bf16.mxu1 %v6206_v55  ;;  %v5643_v54 = vpack.c.bf16 %v2596_v48, %v2595_v47  ;;  %v2565_v55 = vld [vmem:[%s7391_s3 + $0x30] sm:$0xff]  ;;  %v490_v47 = vlaneseq }
 0x1dc   :  { %v491_v48 = vshrl.u32 %v490_v47, 7  ;;  %v6268_v47 = vld [vmem:[#allocation13 + $0x8c] ss:$16 sps:$4 sm:$0xff]  }
 0x1dd   :  { %2330 = vmatpush1.bf16.msra.mxu0 %v6201_v56  ;;  %2535 = vmatpush1.bf16.msra.mxu1 %v6204_v57  ;;  %v2566_v56 = vld [vmem:[%s7391_s3 + $0x38] sm:$0xff]  ;;  %v5613_v57 = vpack.c.bf16 %v2582_v50, %v2581_v49 }
 0x1de   :  { %2331 = vmatprep.subr.bf16.mxu0 %v6209_v58  ;;  %2536 = vmatprep.subr.bf16.mxu1 %v6212_v59  ;;  %v5645_v58 = vpack.c.bf16 %v2614_v52, %v2613_v51  ;;  %v2597_v59 = vld [vmem:[%s7391_s3 + $0x130] sm:$0xff]  ;;  %v7315_v49 = vsub.s32 0, %v491_v48  ;;  %v7317_v50 = vsub.s32 2, %v491_v48  ;;  %v488_v51 = vld [vmem:[#allocation7] sm:$0xf]  ;;  %v7319_v52 = vsub.s32 1, %v491_v48 }
 0x1e1   :  { %2332 = vmatpush1.bf16.msra.mxu0 %v6207_v60  ;;  %2537 = vmatpush1.bf16.msra.mxu1 %v6210_v61  ;;  %v2598_v60 = vld [vmem:[%s7391_s3 + $0x138] sm:$0xff]  ;;  %v2583_v61 = vld [vmem:[%s7391_s3 + $0xc0] sm:$0xff] }
 0x1e2   :  { %2333 = vmatprep.subr.bf16.mxu0 %v6215_v62  ;;  %2538 = vmatprep.subr.bf16.mxu1 %v6218_v63  ;;  %v2584_v62 = vld [vmem:[%s7391_s3 + $0xc8] sm:$0xff]  ;;  %v2615_v63 = vld [vmem:[%s7391_s3 + $0x1c0] sm:$0xff] }
 0x1e5   :  { %2334 = vmatpush1.bf16.msra.mxu0 %v6213_v0  ;;  %2539 = vmatpush1.bf16.msra.mxu1 %v6216_v1  ;;  %v2616_v0 = vld [vmem:[%s7391_s3 + $0x1c8] sm:$0xff]  ;;  %v5615_v1 = vpack.c.bf16 %v2566_v56, %v2565_v55  ;;  %v501_v55 = vrot.slane %v488_v51, %v7317_v50  ;;  %v497_v56 = vrot.slane %v488_v51, %v7319_v52 }
 0x1e6   :  { %2335 = vmatprep.subr.bf16.mxu0 %v6221_v2  ;;  %2540 = vmatprep.subr.bf16.mxu1 %v6224_v3  ;;  %v5647_v2 = vpack.c.bf16 %v2598_v60, %v2597_v59  ;;  %v2567_v3 = vld [vmem:[%s7391_s3 + $0x40] sm:$0xff] }
 0x1e9   :  { %2336 = vmatpush1.bf16.msra.mxu0 %v6219_v4  ;;  %2541 = vmatpush1.bf16.msra.mxu1 %v6222_v5  ;;  %v2568_v4 = vld [vmem:[%s7391_s3 + $0x48] sm:$0xff]  ;;  %v5617_v5 = vpack.c.bf16 %v2584_v62, %v2583_v61 }
 0x1ea   :  { %2337 = vmatprep.subr.bf16.mxu0 %v6227_v6  ;;  %2542 = vmatprep.subr.bf16.mxu1 %v6230_v7  ;;  %v5649_v6 = vpack.c.bf16 %v2616_v0, %v2615_v63  ;;  %v2599_v7 = vld [vmem:[%s7391_s3 + $0x140] sm:$0xff]  ;;  %v5619_v16 = vpack.c.bf16 %v2568_v4, %v2567_v3 }
 0x1ed   :  { %2338 = vmatpush1.bf16.msra.mxu0 %v6225_v8  ;;  %2543 = vmatpush1.bf16.msra.mxu1 %v6228_v9  ;;  %v2600_v8 = vld [vmem:[%s7391_s3 + $0x148] sm:$0xff]  ;;  %v2585_v9 = vld [vmem:[%s7391_s3 + $0xd0] sm:$0xff] }
 0x1ee   :  { %2339 = vmatprep.subr.bf16.mxu0 %v6233_v10  ;;  %2544 = vmatprep.subr.bf16.mxu1 %v6236_v12  ;;  %v2586_v10 = vld [vmem:[%s7391_s3 + $0xd8] sm:$0xff]  ;;  %v2617_v12 = vld [vmem:[%s7391_s3 + $0x1d0] sm:$0xff]  ;;  %v5651_v17 = vpack.c.bf16 %v2600_v8, %v2599_v7 }
 0x1ef   :  { %v5653_v11 = vpack.c.bf16 %v2618_v13, %v2617_v12  ;;  %v2768_v12 = vld [vmem:[#allocation8 + $0x28] sm:$0xff]  ;;  %v2766_v13 = vld [vmem:[#allocation8 + $0x18] sm:$0xff] }
 0x1f1   :  { %2340 = vmatpush1.bf16.msra.mxu0 %v6231_v19  ;;  %2545 = vmatpush1.bf16.msra.mxu1 %v6234_v20  ;;  %v2570_v19 = vld [vmem:[%s7391_s3 + $0x58] sm:$0xff]  ;;  %v5621_v20 = vpack.c.bf16 %v2586_v10, %v2585_v9 }
 0x1f2   :  { %5602 = vmatprep.subr.bf16.mxu0 %v5601_v14  ;;  %5634 = vmatprep.subr.bf16.mxu1 %v5633_v25  ;;  %v2619_v14 = vld [vmem:[%s7391_s3 + $0x1e0] sm:$0xff]  ;;  %v2620_v25 = vld [vmem:[%s7391_s3 + $0x1e8] sm:$0xff]  ;;  %v5623_v26 = vpack.c.bf16 %v2570_v19, %v2569_v18  ;;  %v2764_v10 = vld [vmem:[#allocation8 + $0x8] sm:$0xff] }
 0x1f3   :  { %v2767_v18 = vld [vmem:[#allocation8 + $0x20] sm:$0xff]  ;;  %v2770_v19 = vld [vmem:[#allocation8 + $0x38] sm:$0xff] }
 0x1f4   :  { %2342 = vmatmul.mubr.bf16.vlgmr.msra.gmra.mrb[0].mxu0 %v4947_v29  ;;  %2547 = vmatmul.mubr.bf16.vlgmr.msra.gmra.mrb[0].mxu1 %v4947_v29  ;;  %v5657_v29 = vpack.c.bf16 %v2620_v25, %v2619_v14  ;;  %v6241_v14 = vld [vmem:[#allocation13 + $0x4] ss:$16 sps:$4 sm:$0xff]   ;;  %v6244_v25 = vld [vmem:[#allocation13 + $0xc] ss:$16 sps:$4 sm:$0xff]  }
 0x1f5   :  { %5604 = vmatpush3.bf16.msra.mxu0 %v5603_v30  ;;  %5636 = vmatpush3.bf16.msra.mxu1 %v5635_v31  ;;  %v2571_v30 = vld [vmem:[%s7391_s3 + $0x60] sm:$0xff]  ;;  %v2572_v31 = vld [vmem:[%s7391_s3 + $0x68] sm:$0xff] }
 0x1f6   :  { %5606 = vmatprep.subr.bf16.mxu0 %v5605_v34  ;;  %5638 = vmatprep.subr.bf16.mxu1 %v5637_v35  ;;  %v5627_v33 = vpack.c.bf16 %v2572_v31, %v2571_v30  ;;  %v2604_v34 = vld [vmem:[%s7391_s3 + $0x168] sm:$0xff] }
 0x1f7   :  { %v5659_v35 = vpack.c.bf16 %v2604_v34, %v2603_v32  ;;  %v6239_v32 = vld [vmem:[#allocation13] ss:$16 sps:$4 sm:$0xff]  }
 0x1f9   :  { %5608 = vmatpush3.bf16.msra.mxu0 %v5607_v41  ;;  %5640 = vmatpush3.bf16.msra.mxu1 %v5639_v42  ;;  %v2574_v41 = vld [vmem:[%s7391_s3 + $0x78] sm:$0xff]  ;;  %v5661_v42 = vpack.c.bf16 %v2622_v39, %v2621_v37  ;;  %v6256_v39 = vld [vmem:[#allocation13 + $0x4c] ss:$16 sps:$4 sm:$0xff]  }
 0x1fa   :  { %5610 = vmatprep.subr.bf16.mxu0 %v5609_v45  ;;  %5642 = vmatprep.subr.bf16.mxu1 %v5641_v46  ;;  %v5631_v43 = vpack.c.bf16 %v2574_v41, %v2573_v40  ;;  %v2606_v45 = vld [vmem:[%s7391_s3 + $0x178] sm:$0xff]  ;;  %v6251_v40 = vld [vmem:[#allocation13 + $0x40] ss:$16 sps:$4 sm:$0xff]   ;;  %s6902_s3 = smov [#allocation19]  }
 0x1fb   :  { %v5663_v46 = vpack.c.bf16 %v2606_v45, %v2605_v44  ;;  %v6248_v37 = vld [vmem:[#allocation13 + $0x28] ss:$16 sps:$4 sm:$0xff]   ;;  %v6257_v44 = vld [vmem:[#allocation13 + $0x60] ss:$16 sps:$4 sm:$0xff]   ;;  %s4925_s8 = sshll.u32 %s6902_s3, 4  ;;  %s4926_s8 = int_to_ptr.vmem [resolvable:$true] %s4925_s8 }
 0x1fc   :  { %v6254_v41 = vld [vmem:[#allocation13 + $0x48] ss:$16 sps:$4 sm:$0xff]   ;;  %s6851_s30 = scalar_lea.vmem %s4926_s8, 256  ;;  %p6856_p11 = scmp.lt.s32.totalorder %s4926_s8, %s4926_s8 }
 0x1fd   :  { %5612 = vmatpush3.bf16.msra.mxu0 %v5611_v53  ;;  %5644 = vmatpush3.bf16.msra.mxu1 %v5643_v54  ;;  %v7321_v53 = vsub.s32 3, %v491_v48  ;;  %v493_v54 = vrot.slane %v488_v51, %v7315_v49  ;;  %v6260_v45 = vld [vmem:[#allocation13 + $0x68] ss:$16 sps:$4 sm:$0xff]   ;;  %v6263_v48 = vld [vmem:[#allocation13 + $0x80] ss:$16 sps:$4 sm:$0xff]   ;;  %p6852_p10 = scmp.ne.s32.totalorder %s4926_s8, %s6851_s30  ;;  %p6857_p12 = scmp.lt.s32.totalorder %s6851_s30, %s6851_s30 }
 0x1fe   :  { %5614 = vmatprep.subr.bf16.mxu0 %v5613_v57  ;;  %5646 = vmatprep.subr.bf16.mxu1 %v5645_v58 }
 0x1ff   :  { %v505_v57 = vrot.slane %v488_v51, %v7321_v53  ;;  %v6266_v51 = vld [vmem:[#allocation13 + $0x88] ss:$16 sps:$4 sm:$0xff]   ;;  %p6858_p13 = por %p6857_p12, %p6856_p11 }
 0x201   :  { %5616 = vmatpush3.bf16.msra.mxu0 %v5615_v1  ;;  %5648 = vmatpush3.bf16.msra.mxu1 %v5647_v2  ;;  %p6859_p0 = pnand %p6858_p13, %p6852_p10 }
 0x202   :  { %5618 = vmatprep.subr.bf16.mxu0 %v5617_v5  ;;  %5650 = vmatprep.subr.bf16.mxu1 %v5649_v6 }
 0x205   :  { %5620 = vmatpush3.bf16.msra.mxu0 %v5619_v16  ;;  %5652 = vmatpush3.bf16.msra.mxu1 %v5651_v17  ;;  %v5665_v16 = vpack.c.bf16 %v2768_v12, %v2764_v10  ;;  %v2763_v17 = vld [vmem:[#allocation8] sm:$0xff]  ;;  %v6295_v10 = vld [vmem:[#allocation13 + $0x124] ss:$16 sps:$4 sm:$0xff]  }
 0x206   :  { %5622 = vmatprep.subr.bf16.mxu0 %v5621_v20  ;;  %5654 = vmatprep.subr.bf16.mxu1 %v5653_v11  ;;  %v5667_v20 = vpack.c.bf16 %v2767_v18, %v2763_v17  ;;  %v5669_v11 = vpack.c.bf16 %v2770_v19, %v2766_v13  ;;  %v6298_v12 = vld [vmem:[#allocation13 + $0x12c] ss:$16 sps:$4 sm:$0xff]   ;;  %v6293_v13 = vld [vmem:[#allocation13 + $0x120] ss:$16 sps:$4 sm:$0xff]   ;;  %v6301_v17 = vld [vmem:[#allocation13 + $0x144] ss:$16 sps:$4 sm:$0xff]  }
 0x207   :  { %v6304_v18 = vld [vmem:[#allocation13 + $0x14c] ss:$16 sps:$4 sm:$0xff]   ;;  %v6299_v19 = vld [vmem:[#allocation13 + $0x140] ss:$16 sps:$4 sm:$0xff]  }
 0x209   :  { %5624 = vmatpush3.bf16.msra.mxu0 %v5623_v26  ;;  %5656 = vmatpush3.bf16.msra.mxu1 %v5655_v27 }
 0x20a   :  { %5626 = vmatprep.subr.bf16.mxu0 %v5625_v28  ;;  %5658 = vmatprep.subr.bf16.mxu1 %v5657_v29 }
 0x20d   :  { %5628 = vmatpush3.bf16.msra.mxu0 %v5627_v33  ;;  %5660 = vmatpush3.bf16.msra.mxu1 %v5659_v35  ;;  %v6242_v33 = vld [vmem:[#allocation13 + $0x8] ss:$16 sps:$4 sm:$0xff]   ;;  %v6247_v35 = vld [vmem:[#allocation13 + $0x24] ss:$16 sps:$4 sm:$0xff]  }
 0x20e   :  { %5630 = vmatprep.subr.bf16.mxu0 %v5629_v38  ;;  %5662 = vmatprep.subr.bf16.mxu1 %v5661_v42  ;;  %v6253_v38 = vld [vmem:[#allocation13 + $0x44] ss:$16 sps:$4 sm:$0xff]  }
 0x20f   :  { %v6259_v42 = vld [vmem:[#allocation13 + $0x64] ss:$16 sps:$4 sm:$0xff]  }
 0x211   :  { %5632 = vmatpush3.bf16.msra.mxu0 %v5631_v43  ;;  %5664 = vmatpush3.bf16.msra.mxu1 %v5663_v46  ;;  %v6262_v43 = vld [vmem:[#allocation13 + $0x6c] ss:$16 sps:$4 sm:$0xff]   ;;  %v6265_v46 = vld [vmem:[#allocation13 + $0x84] ss:$16 sps:$4 sm:$0xff]  }
 0x212   :  { %5666 = vmatprep.subr.bf16.mxu0 %v5665_v16  ;;  %5670 = vmatprep.subr.bf16.mxu1 %v5669_v11  ;;  %v6296_v16 = vld [vmem:[#allocation13 + $0x128] ss:$16 sps:$4 sm:$0xff]   ;;  %v6307_v11 = vld [vmem:[#allocation13 + $0x164] ss:$16 sps:$4 sm:$0xff]  }
 0x2c7   :  { %v2343_v58 = vpop.f32.mrb[0].mxu0  ;;  %v2548_v59 = vpop.f32.mrb[0].mxu1 }
 0x2c8   :  { %v7327_v60 = vadd.f32 %v2343_v58, %v493_v54  ;;  %v7329_v61 = vadd.f32 %v2548_v59, %v501_v55  ;;  %v2345_v62 = vpop.f32.mrb[1].mxu0  ;;  %v2550_v63 = vpop.f32.mrb[1].mxu1  ;;  %v6271_v54 = vld [vmem:[#allocation13 + $0xa4] ss:$16 sps:$4 sm:$0xff]   ;;  %v6274_v55 = vld [vmem:[#allocation13 + $0xac] ss:$16 sps:$4 sm:$0xff]  }
 0x2c9   :  { %v7331_v0 = vadd.f32 %v2345_v62, %v497_v56  ;;  %v7333_v1 = vadd.f32 %v2550_v63, %v505_v57  ;;  %v2347_v2 = vpop.f32.mrb[2].mxu0  ;;  %v2552_v3 = vpop.f32.mrb[2].mxu1  ;;  %v6269_v56 = vld [vmem:[#allocation13 + $0xa0] ss:$16 sps:$4 sm:$0xff]   ;;  %v6272_v57 = vld [vmem:[#allocation13 + $0xa8] ss:$16 sps:$4 sm:$0xff]  }
 0x2ca   :  { %v2348_v4 = vpop.f32.mrb[3].mxu0  ;;  %v2553_v5 = vpop.f32.mrb[3].mxu1  ;;  %v2555_v8 = vmul.f32 %v7327_v60, %v7327_v60  ;;  %v2557_v9 = vmul.f32 %v7329_v61, %v7329_v61  ;;  %v6277_v58 = vld [vmem:[#allocation13 + $0xc4] ss:$16 sps:$4 sm:$0xff]   ;;  %v6280_v59 = vld [vmem:[#allocation13 + $0xcc] ss:$16 sps:$4 sm:$0xff]  }
 0x2cb   :  { %v2556_v6 = vmul.f32 %v7331_v0, %v7331_v0  ;;  %v2558_v7 = vmul.f32 %v7333_v1, %v7333_v1  ;;  %v6275_v62 = vld [vmem:[#allocation13 + $0xc0] ss:$16 sps:$4 sm:$0xff]   ;;  %v6278_v63 = vld [vmem:[#allocation13 + $0xc8] ss:$16 sps:$4 sm:$0xff]   ;;  %v6283_v2 = vld [vmem:[#allocation13 + $0xe4] ss:$16 sps:$4 sm:$0xff]  }
 0x2cc   :  { %v6286_v3 = vld [vmem:[#allocation13 + $0xec] ss:$16 sps:$4 sm:$0xff]   ;;  %v6281_v4 = vld [vmem:[#allocation13 + $0xe0] ss:$16 sps:$4 sm:$0xff]   ;;  %v6284_v5 = vld [vmem:[#allocation13 + $0xe8] ss:$16 sps:$4 sm:$0xff]  }
 0x2cd   :  { %2687 = vmatprep.mubr.f32.mxu0 %v2556_v6  ;;  %2757 = vmatprep.mubr.f32.mxu1 %v2558_v7  ;;  %v6289_v6 = vld [vmem:[#allocation13 + $0x104] ss:$16 sps:$4 sm:$0xff]   ;;  %v6292_v7 = vld [vmem:[#allocation13 + $0x10c] ss:$16 sps:$4 sm:$0xff]  }
 0x2ce   :  { %2688 = vmatmul.mubr.f32.vlgmr.msra.gmra.mrb[4].mxu0 %v2555_v8  ;;  %2758 = vmatmul.mubr.f32.vlgmr.msra.gmra.mrb[4].mxu1 %v2557_v9  ;;  %v6287_v8 = vld [vmem:[#allocation13 + $0x100] ss:$16 sps:$4 sm:$0xff]   ;;  %v6290_v9 = vld [vmem:[#allocation13 + $0x108] ss:$16 sps:$4 sm:$0xff]  }
 0x2cf   :  { %5668 = vmatpush1.bf16.msra.mxu0 %v5667_v20  ;;  %5672 = vmatpush1.bf16.msra.mxu1 %v5671_v23  ;;  %v6302_v20 = vld [vmem:[#allocation13 + $0x148] ss:$16 sps:$4 sm:$0xff]  }
 0x2d0   :  { %2839 = vmatprep.mubr.f32.mxu0 %v6901_v24  ;;  %2910 = vmatprep.mubr.f32.mxu1 %v6901_v24  ;;  %v6308_v23 = vld [vmem:[#allocation13 + $0x168] ss:$16 sps:$4 sm:$0xff]   ;;  %v6311_v24 = vld [vmem:[#allocation13 + $0x180] ss:$16 sps:$4 sm:$0xff]  }
 0x2d1   :  { %3771 = vmatprep.subr.bf16.mxu0 %v6241_v14  ;;  %3853 = vmatprep.subr.bf16.mxu1 %v6244_v25  ;;  %v6313_v14 = vld [vmem:[#allocation13 + $0x184] ss:$16 sps:$4 sm:$0xff]   ;;  %v6314_v25 = vld [vmem:[#allocation13 + $0x188] ss:$16 sps:$4 sm:$0xff]  }
 0x3a1   :  { %v5563_v26 = vpop.f32.mrb[4].mxu0  ;;  %v5598_v27 = vpop.f32.mrb[4].mxu1 }
 0x3a2   :  { %v5564_v28 = vpop.f32.mrb[5].mxu0  ;;  %v5599_v29 = vpop.f32.mrb[5].mxu1 }
 0x3a3   :  { %v5565_v30 = vadd.f32 %v5564_v28, %v5563_v26  ;;  %v5600_v31 = vadd.f32 %v5599_v29, %v5598_v27  ;;  %v6316_v26 = vld [vmem:[#allocation13 + $0x18c] ss:$16 sps:$4 sm:$0xff]   ;;  %v6319_v27 = vld [vmem:[#allocation13 + $0x1a4] ss:$16 sps:$4 sm:$0xff]   ;;  %v6317_v29 = vld [vmem:[#allocation13 + $0x1a0] ss:$16 sps:$4 sm:$0xff]  }
 0x3a4   :  { %v6322_v28 = vld [vmem:[#allocation13 + $0x1ac] ss:$16 sps:$4 sm:$0xff]  }
 0x3a5   :  { %v2760_v34 = vadd.f32 %v5600_v31, %v5565_v30  ;;  %v6320_v30 = vld [vmem:[#allocation13 + $0x1a8] ss:$16 sps:$4 sm:$0xff]   ;;  %v6325_v31 = vld [vmem:[#allocation13 + $0x1c4] ss:$16 sps:$4 sm:$0xff]  }
 0x3a7   :  { %5269 = vmatmul.mubr.msk.f32.vlgmr.msra.gmra.mrb[6].mxu0 %vm2771_vm0, %v2760_v34  ;;  %5270 = vmatmul.mubr.msk.f32.vlgmr.msra.gmra.mrb[6].mxu1 %vm2771_vm0, %v2760_v34  ;;  %v6326_v34 = vld [vmem:[#allocation13 + $0x1c8] ss:$16 sps:$4 sm:$0xff]  }
 0x3a8   :  { %3772 = vmatpush1.bf16.msra.mxu0 %v6239_v32  ;;  %3854 = vmatpush1.bf16.msra.mxu1 %v6242_v33  ;;  %v6328_v32 = vld [vmem:[#allocation13 + $0x1cc] ss:$16 sps:$4 sm:$0xff]   ;;  %v6323_v33 = vld [vmem:[#allocation13 + $0x1c0] ss:$16 sps:$4 sm:$0xff]  }
 0x3a9   :  { %3773 = vmatprep.subr.bf16.mxu0 %v6247_v35  ;;  %3855 = vmatprep.subr.bf16.mxu1 %v6250_v15  ;;  %v6331_v35 = vld [vmem:[#allocation13 + $0x1e4] ss:$16 sps:$4 sm:$0xff]   ;;  %v6334_v15 = vld [vmem:[#allocation13 + $0x1ec] ss:$16 sps:$4 sm:$0xff]  }
 0x3ac   :  { %3774 = vmatpush1.bf16.msra.mxu0 %v6245_v36  ;;  %3856 = vmatpush1.bf16.msra.mxu1 %v6248_v37  ;;  %v6329_v36 = vld [vmem:[#allocation13 + $0x1e0] ss:$16 sps:$4 sm:$0xff]   ;;  %v6332_v37 = vld [vmem:[#allocation13 + $0x1e8] ss:$16 sps:$4 sm:$0xff]  }
 0x3ad   :  { %3775 = vmatprep.subr.bf16.mxu0 %v6253_v38  ;;  %3857 = vmatprep.subr.bf16.mxu1 %v6256_v39  ;;  %v6337_v38 = vld [vmem:[#allocation13 + $0x204] ss:$16 sps:$4 sm:$0xff]   ;;  %v6340_v39 = vld [vmem:[#allocation13 + $0x20c] ss:$16 sps:$4 sm:$0xff]  }
 0x3b0   :  { %3776 = vmatpush1.bf16.msra.mxu0 %v6251_v40  ;;  %3858 = vmatpush1.bf16.msra.mxu1 %v6254_v41 }
 0x3b1   :  { %3777 = vmatprep.subr.bf16.mxu0 %v6259_v42  ;;  %3859 = vmatprep.subr.bf16.mxu1 %v6262_v43 }
 0x3b4   :  { %3778 = vmatpush1.bf16.msra.mxu0 %v6257_v44  ;;  %3860 = vmatpush1.bf16.msra.mxu1 %v6260_v45 }
 0x3b5   :  { %3779 = vmatprep.subr.bf16.mxu0 %v6265_v46  ;;  %3861 = vmatprep.subr.bf16.mxu1 %v6268_v47 }
 0x3b8   :  { %3780 = vmatpush1.bf16.msra.mxu0 %v6263_v48  ;;  %3862 = vmatpush1.bf16.msra.mxu1 %v6266_v51  ;;  %v2925_v48 = vld [vmem:[#allocation10] sm:$0xf]  ;;  %v2951_v51 = vld [vmem:[#allocation11] sm:$0xf] }
 0x3b9   :  { %3781 = vmatprep.subr.bf16.mxu0 %v6271_v54  ;;  %3863 = vmatprep.subr.bf16.mxu1 %v6274_v55  ;;  %v2930_v54 = vrot.slane %v2925_v48, %v7315_v49 }
 0x3bc   :  { %3782 = vmatpush1.bf16.msra.mxu0 %v6269_v56  ;;  %3864 = vmatpush1.bf16.msra.mxu1 %v6272_v57  ;;  %v2938_v56 = vrot.slane %v2925_v48, %v7317_v50 }
 0x3bd   :  { %3783 = vmatprep.subr.bf16.mxu0 %v6277_v58  ;;  %3865 = vmatprep.subr.bf16.mxu1 %v6280_v59  ;;  %v2934_v58 = vrot.slane %v2925_v48, %v7319_v52 }
 0x3c0   :  { %3784 = vmatpush1.bf16.msra.mxu0 %v6275_v62  ;;  %3866 = vmatpush1.bf16.msra.mxu1 %v6278_v63  ;;  %v2956_v63 = vrot.slane %v2951_v51, %v7315_v49 }
 0x3c1   :  { %3785 = vmatprep.subr.bf16.mxu0 %v6283_v2  ;;  %3867 = vmatprep.subr.bf16.mxu1 %v6286_v3  ;;  %v2942_v2 = vrot.slane %v2925_v48, %v7321_v53  ;;  %v6388_v48 = vld [vmem:[#allocation13 + $0x30c] ss:$16 sps:$4 sm:$0xff]  }
 0x3c4   :  { %3786 = vmatpush1.bf16.msra.mxu0 %v6281_v4  ;;  %3868 = vmatpush1.bf16.msra.mxu1 %v6284_v5  ;;  %v2964_v4 = vrot.slane %v2951_v51, %v7317_v50 }
 0x3c5   :  { %3787 = vmatprep.subr.bf16.mxu0 %v6289_v6  ;;  %3869 = vmatprep.subr.bf16.mxu1 %v6292_v7  ;;  %v2960_v7 = vrot.slane %v2951_v51, %v7319_v52 }
 0x3c8   :  { %3788 = vmatpush1.bf16.msra.mxu0 %v6287_v8  ;;  %3870 = vmatpush1.bf16.msra.mxu1 %v6290_v9 }
 0x3c9   :  { %3789 = vmatprep.subr.bf16.mxu0 %v6295_v10  ;;  %3871 = vmatprep.subr.bf16.mxu1 %v6298_v12  ;;  %v2968_v10 = vrot.slane %v2951_v51, %v7321_v53  ;;  %v6383_v51 = vld [vmem:[#allocation13 + $0x300] ss:$16 sps:$4 sm:$0xff]  }
 0x3cc   :  { %3790 = vmatpush1.bf16.msra.mxu0 %v6293_v13  ;;  %3872 = vmatpush1.bf16.msra.mxu1 %v6296_v16 }
 0x3cd   :  { %3791 = vmatprep.subr.bf16.mxu0 %v6301_v17  ;;  %3873 = vmatprep.subr.bf16.mxu1 %v6304_v18 }
 0x3d0   :  { %3792 = vmatpush1.bf16.msra.mxu0 %v6299_v19  ;;  %3874 = vmatpush1.bf16.msra.mxu1 %v6302_v20  ;;  %v6335_v20 = vld [vmem:[#allocation13 + $0x200] ss:$16 sps:$4 sm:$0xff]  }
 0x3d1   :  { %3793 = vmatprep.subr.bf16.mxu0 %v6307_v11  ;;  %3875 = vmatprep.subr.bf16.mxu1 %v6310_v21  ;;  %v6338_v11 = vld [vmem:[#allocation13 + $0x208] ss:$16 sps:$4 sm:$0xff]  }
 0x3d4   :  { %3794 = vmatpush1.bf16.msra.mxu0 %v6305_v22  ;;  %3876 = vmatpush1.bf16.msra.mxu1 %v6308_v23  ;;  %v6346_v22 = vld [vmem:[#allocation13 + $0x22c] ss:$16 sps:$4 sm:$0xff]   ;;  %v6341_v23 = vld [vmem:[#allocation13 + $0x220] ss:$16 sps:$4 sm:$0xff]  }
 0x3d5   :  { %3795 = vmatprep.subr.bf16.mxu0 %v6313_v14  ;;  %3877 = vmatprep.subr.bf16.mxu1 %v6316_v26  ;;  %v6349_v14 = vld [vmem:[#allocation13 + $0x244] ss:$16 sps:$4 sm:$0xff]   ;;  %v6347_v26 = vld [vmem:[#allocation13 + $0x240] ss:$16 sps:$4 sm:$0xff]  }
 0x3d8   :  { %3796 = vmatpush1.bf16.msra.mxu0 %v6311_v24  ;;  %3878 = vmatpush1.bf16.msra.mxu1 %v6314_v25  ;;  %v6344_v24 = vld [vmem:[#allocation13 + $0x228] ss:$16 sps:$4 sm:$0xff]   ;;  %v6352_v25 = vld [vmem:[#allocation13 + $0x24c] ss:$16 sps:$4 sm:$0xff]  }
 0x3d9   :  { %3797 = vmatprep.subr.bf16.mxu0 %v6319_v27  ;;  %3879 = vmatprep.subr.bf16.mxu1 %v6322_v28  ;;  %v6350_v27 = vld [vmem:[#allocation13 + $0x248] ss:$16 sps:$4 sm:$0xff]   ;;  %v6355_v28 = vld [vmem:[#allocation13 + $0x264] ss:$16 sps:$4 sm:$0xff]  }
 0x3dc   :  { %3798 = vmatpush1.bf16.msra.mxu0 %v6317_v29  ;;  %3880 = vmatpush1.bf16.msra.mxu1 %v6320_v30  ;;  %v6358_v29 = vld [vmem:[#allocation13 + $0x26c] ss:$16 sps:$4 sm:$0xff]   ;;  %v6353_v30 = vld [vmem:[#allocation13 + $0x260] ss:$16 sps:$4 sm:$0xff]  }
 0x3dd   :  { %3799 = vmatprep.subr.bf16.mxu0 %v6325_v31  ;;  %3881 = vmatprep.subr.bf16.mxu1 %v6328_v32  ;;  %v6356_v31 = vld [vmem:[#allocation13 + $0x268] ss:$16 sps:$4 sm:$0xff]   ;;  %v6361_v32 = vld [vmem:[#allocation13 + $0x284] ss:$16 sps:$4 sm:$0xff]  }
 0x3e0   :  { %3800 = vmatpush1.bf16.msra.mxu0 %v6323_v33  ;;  %3882 = vmatpush1.bf16.msra.mxu1 %v6326_v34  ;;  %v6364_v33 = vld [vmem:[#allocation13 + $0x28c] ss:$16 sps:$4 sm:$0xff]   ;;  %v6359_v34 = vld [vmem:[#allocation13 + $0x280] ss:$16 sps:$4 sm:$0xff]  }
 0x3e1   :  { %3801 = vmatprep.subr.bf16.mxu0 %v6331_v35  ;;  %3883 = vmatprep.subr.bf16.mxu1 %v6334_v15  ;;  %v6362_v35 = vld [vmem:[#allocation13 + $0x288] ss:$16 sps:$4 sm:$0xff]   ;;  %v6367_v15 = vld [vmem:[#allocation13 + $0x2a4] ss:$16 sps:$4 sm:$0xff]  }
 0x3e4   :  { %3802 = vmatpush1.bf16.msra.mxu0 %v6329_v36  ;;  %3884 = vmatpush1.bf16.msra.mxu1 %v6332_v37  ;;  %v6370_v36 = vld [vmem:[#allocation13 + $0x2ac] ss:$16 sps:$4 sm:$0xff]   ;;  %v6365_v37 = vld [vmem:[#allocation13 + $0x2a0] ss:$16 sps:$4 sm:$0xff]  }
 0x3e5   :  { %3812 = vmatprep.subr.bf16.mxu0 %v6337_v38  ;;  %3894 = vmatprep.subr.bf16.mxu1 %v6340_v39  ;;  %v6368_v38 = vld [vmem:[#allocation13 + $0x2a8] ss:$16 sps:$4 sm:$0xff]   ;;  %v6373_v39 = vld [vmem:[#allocation13 + $0x2c4] ss:$16 sps:$4 sm:$0xff]  }
 0x47a   :  { %v2841_v40 = vpop.f32.mrb[6].mxu0  ;;  %v2912_v41 = vpop.f32.mrb[6].mxu1 }
 0x47b   :  { %v2842_v42 = vadd.f32 1e-05, %v2841_v40  ;;  %v2913_v43 = vadd.f32 1e-05, %v2912_v41  ;;  %v2843_v44 = vpop.f32.mrb[7].mxu0  ;;  %v2914_v45 = vpop.f32.mrb[7].mxu1 }
 0x47c   :  { %v2844_v46 = vadd.f32 1e-05, %v2843_v44  ;;  %v2915_v47 = vadd.f32 1e-05, %v2914_v45  ;;  %v6376_v40 = vld [vmem:[#allocation13 + $0x2cc] ss:$16 sps:$4 sm:$0xff]  }
 0x47d   :  { %6623 = vrsqrt.f32 %v2842_v42  ;;  %v6371_v41 = vld [vmem:[#allocation13 + $0x2c0] ss:$16 sps:$4 sm:$0xff]   ;;  %v6374_v42 = vld [vmem:[#allocation13 + $0x2c8] ss:$16 sps:$4 sm:$0xff]   ;;  %v6382_v44 = vld [vmem:[#allocation13 + $0x2ec] ss:$16 sps:$4 sm:$0xff]  }
 0x47e   :  { %6625 = vrsqrt.f32 %v2913_v43  ;;  %v6379_v43 = vld [vmem:[#allocation13 + $0x2e4] ss:$16 sps:$4 sm:$0xff]   ;;  %v6377_v45 = vld [vmem:[#allocation13 + $0x2e0] ss:$16 sps:$4 sm:$0xff]  }
 0x47f   :  { %6627 = vrsqrt.f32 %v2844_v46  ;;  %v6380_v46 = vld [vmem:[#allocation13 + $0x2e8] ss:$16 sps:$4 sm:$0xff]  }
 0x480   :  { %6629 = vrsqrt.f32 %v2915_v47  ;;  %v6385_v47 = vld [vmem:[#allocation13 + $0x304] ss:$16 sps:$4 sm:$0xff]  }
 0x487   :  { %v6624_v55 = vpop.eup %6623 }
 0x488   :  { %v6626_v57 = vpop.eup %6625  ;;  %v2921_v59 = vmul.f32 %v6624_v55, %v7327_v60  ;;  %v6391_v55 = vld [vmem:[#allocation13 + $0x324] ss:$16 sps:$4 sm:$0xff]  }
 0x489   :  { %v6628_v62 = vpop.eup %6627  ;;  %v2923_v3 = vmul.f32 %v6626_v57, %v7329_v61  ;;  %v6389_v57 = vld [vmem:[#allocation13 + $0x320] ss:$16 sps:$4 sm:$0xff]  }
 0x48a   :  { %v6630_v5 = vpop.eup %6629  ;;  %v2922_v6 = vmul.f32 %v6628_v62, %v7331_v0  ;;  %v2947_v8 = vmul.f32 %v2930_v54, %v2921_v59  ;;  %v6343_v0 = vld [vmem:[#allocation13 + $0x224] ss:$16 sps:$4 sm:$0xff]   ;;  %v6386_v54 = vld [vmem:[#allocation13 + $0x308] ss:$16 sps:$4 sm:$0xff]   ;;  %v6400_v62 = vld [vmem:[#allocation13 + $0x34c] ss:$16 sps:$4 sm:$0xff]  }
 0x48b   :  { %v2924_v9 = vmul.f32 %v6630_v5, %v7333_v1  ;;  %v2949_v60 = vmul.f32 %v2938_v56, %v2923_v3  ;;  %v6394_v56 = vld [vmem:[#allocation13 + $0x32c] ss:$16 sps:$4 sm:$0xff]   ;;  %v6397_v59 = vld [vmem:[#allocation13 + $0x344] ss:$16 sps:$4 sm:$0xff]   ;;  %v6401_v5 = vld [vmem:[#allocation13 + $0x360] ss:$16 sps:$4 sm:$0xff]  }
 0x48c   :  { %v2948_v12 = vmul.f32 %v2934_v58, %v2922_v6  ;;  %v2973_v13 = vadd.f32 %v2956_v63, %v2947_v8  ;;  %v6392_v58 = vld [vmem:[#allocation13 + $0x328] ss:$16 sps:$4 sm:$0xff]   ;;  %v6395_v63 = vld [vmem:[#allocation13 + $0x340] ss:$16 sps:$4 sm:$0xff]   ;;  %v6403_v3 = vld [vmem:[#allocation13 + $0x364] ss:$16 sps:$4 sm:$0xff]  }
 0x48d   :  { %v2950_v16 = vmul.f32 %v2942_v2, %v2924_v9  ;;  %v7355_v17 = vadd.f32 %v2964_v4, %v2949_v60  ;;  %v6398_v2 = vld [vmem:[#allocation13 + $0x348] ss:$16 sps:$4 sm:$0xff]   ;;  %v6406_v4 = vld [vmem:[#allocation13 + $0x36c] ss:$16 sps:$4 sm:$0xff]   ;;  %v6407_v9 = vld [vmem:[#allocation13 + $0x380] ss:$16 sps:$4 sm:$0xff]  }
 0x48e   :  { %v2974_v18 = vadd.f32 %v2960_v7, %v2948_v12  ;;  %v2977_v21 = vpack.c.bf16 %v2973_v13, %v2973_v13  ;;  %v6404_v6 = vld [vmem:[#allocation13 + $0x368] ss:$16 sps:$4 sm:$0xff]   ;;  %v6409_v7 = vld [vmem:[#allocation13 + $0x384] ss:$16 sps:$4 sm:$0xff]   ;;  %v6412_v8 = vld [vmem:[#allocation13 + $0x38c] ss:$16 sps:$4 sm:$0xff]  }
 0x48f   :  { %v2976_v61 = vadd.f32 %v2968_v10, %v2950_v16  ;;  %v6410_v10 = vld [vmem:[#allocation13 + $0x388] ss:$16 sps:$4 sm:$0xff]   ;;  %v6415_v60 = vld [vmem:[#allocation13 + $0x3a4] ss:$16 sps:$4 sm:$0xff]   ;;  %v6418_v12 = vld [vmem:[#allocation13 + $0x3ac] ss:$16 sps:$4 sm:$0xff]  }
 0x490   :  { %v2978_v19 = vpack.c.bf16 %v2974_v18, %v2974_v18  ;;  %v6413_v13 = vld [vmem:[#allocation13 + $0x3a0] ss:$16 sps:$4 sm:$0xff]   ;;  %v6416_v16 = vld [vmem:[#allocation13 + $0x3a8] ss:$16 sps:$4 sm:$0xff]   ;;  %v6421_v18 = vld [vmem:[#allocation13 + $0x3c4] ss:$16 sps:$4 sm:$0xff]  }
 0x491   :  { %v2980_v1 = vpack.c.bf16 %v2976_v61, %v2976_v61  ;;  %v6424_v61 = vld [vmem:[#allocation13 + $0x3cc] ss:$16 sps:$4 sm:$0xff]  }
 0x492   :  { %3803 = vmatprep.mubr.bf16.mxu0 %v2978_v19  ;;  %3885 = vmatprep.mubr.bf16.mxu1 %v2978_v19  ;;  %v6419_v19 = vld [vmem:[#allocation13 + $0x3c0] ss:$16 sps:$4 sm:$0xff]  }
 0x493   :  { %3804 = vmatmul.mubr.bf16.vlgmr.msra.gmra.mrb[8].mxu0 %v2977_v21  ;;  %3886 = vmatmul.mubr.bf16.vlgmr.msra.gmra.mrb[8].mxu1 %v2977_v21  ;;  %v6430_v21 = vld [vmem:[#allocation13 + $0x3ec] ss:$16 sps:$4 sm:$0xff]  }
 0x494   :  { %3813 = vmatpush1.bf16.msra.mxu0 %v6335_v20  ;;  %3895 = vmatpush1.bf16.msra.mxu1 %v6338_v11  ;;  %v6422_v20 = vld [vmem:[#allocation13 + $0x3c8] ss:$16 sps:$4 sm:$0xff]   ;;  %v6427_v11 = vld [vmem:[#allocation13 + $0x3e4] ss:$16 sps:$4 sm:$0xff]  }
 0x495   :  { %3844 = vmatprep.mubr.bf16.mxu0 %v2980_v1  ;;  %3926 = vmatprep.mubr.bf16.mxu1 %v2980_v1  ;;  %v6433_v1 = vld [vmem:[#allocation16 + $0x4] ss:$16 sps:$4 sm:$0xff]  }
 0x496   :  { %3814 = vmatprep.subr.bf16.mxu0 %v6343_v0  ;;  %3896 = vmatprep.subr.bf16.mxu1 %v6346_v22  ;;  %v6425_v0 = vld [vmem:[#allocation13 + $0x3e0] ss:$16 sps:$4 sm:$0xff]   ;;  %v6428_v22 = vld [vmem:[#allocation13 + $0x3e8] ss:$16 sps:$4 sm:$0xff]  }
 0x498   :  { %3815 = vmatpush1.bf16.msra.mxu0 %v6341_v23  ;;  %3897 = vmatpush1.bf16.msra.mxu1 %v6344_v24  ;;  %v6436_v23 = vld [vmem:[#allocation16 + $0xc] ss:$16 sps:$4 sm:$0xff]   ;;  %v6431_v24 = vld [vmem:[#allocation16] ss:$16 sps:$4 sm:$0xff]  }
 0x499   :  { %3816 = vmatprep.subr.bf16.mxu0 %v6349_v14  ;;  %3898 = vmatprep.subr.bf16.mxu1 %v6352_v25  ;;  %v6434_v14 = vld [vmem:[#allocation16 + $0x8] ss:$16 sps:$4 sm:$0xff]   ;;  %v2979_v25 = vpack.c.bf16 %v7355_v17, %v7355_v17  ;;  %v6451_v17 = vld [vmem:[#allocation16 + $0x64] ss:$16 sps:$4 sm:$0xff]  }
 0x49c   :  { %3817 = vmatpush1.bf16.msra.mxu0 %v6347_v26  ;;  %3899 = vmatpush1.bf16.msra.mxu1 %v6350_v27  ;;  %v6439_v26 = vld [vmem:[#allocation16 + $0x24] ss:$16 sps:$4 sm:$0xff]   ;;  %v6442_v27 = vld [vmem:[#allocation16 + $0x2c] ss:$16 sps:$4 sm:$0xff]  }
 0x49d   :  { %3818 = vmatprep.subr.bf16.mxu0 %v6355_v28  ;;  %3900 = vmatprep.subr.bf16.mxu1 %v6358_v29  ;;  %v6437_v28 = vld [vmem:[#allocation16 + $0x20] ss:$16 sps:$4 sm:$0xff]   ;;  %v6440_v29 = vld [vmem:[#allocation16 + $0x28] ss:$16 sps:$4 sm:$0xff]  }
 0x4a0   :  { %3819 = vmatpush1.bf16.msra.mxu0 %v6353_v30  ;;  %3901 = vmatpush1.bf16.msra.mxu1 %v6356_v31  ;;  %v6445_v30 = vld [vmem:[#allocation16 + $0x44] ss:$16 sps:$4 sm:$0xff]   ;;  %v6448_v31 = vld [vmem:[#allocation16 + $0x4c] ss:$16 sps:$4 sm:$0xff]  }
 0x4a1   :  { %3820 = vmatprep.subr.bf16.mxu0 %v6361_v32  ;;  %3902 = vmatprep.subr.bf16.mxu1 %v6364_v33  ;;  %v6443_v32 = vld [vmem:[#allocation16 + $0x40] ss:$16 sps:$4 sm:$0xff]   ;;  %v6446_v33 = vld [vmem:[#allocation16 + $0x48] ss:$16 sps:$4 sm:$0xff]  }
 0x4a4   :  { %3821 = vmatpush1.bf16.msra.mxu0 %v6359_v34  ;;  %3903 = vmatpush1.bf16.msra.mxu1 %v6362_v35  ;;  %v6454_v34 = vld [vmem:[#allocation16 + $0x6c] ss:$16 sps:$4 sm:$0xff]   ;;  %v6449_v35 = vld [vmem:[#allocation16 + $0x60] ss:$16 sps:$4 sm:$0xff]  }
 0x4a5   :  { %3822 = vmatprep.subr.bf16.mxu0 %v6367_v15  ;;  %3904 = vmatprep.subr.bf16.mxu1 %v6370_v36  ;;  %v6452_v15 = vld [vmem:[#allocation16 + $0x68] ss:$16 sps:$4 sm:$0xff]   ;;  %v6457_v36 = vld [vmem:[#allocation16 + $0x84] ss:$16 sps:$4 sm:$0xff]  }
 0x4a8   :  { %3823 = vmatpush1.bf16.msra.mxu0 %v6365_v37  ;;  %3905 = vmatpush1.bf16.msra.mxu1 %v6368_v38  ;;  %v6460_v37 = vld [vmem:[#allocation16 + $0x8c] ss:$16 sps:$4 sm:$0xff]   ;;  %v6455_v38 = vld [vmem:[#allocation16 + $0x80] ss:$16 sps:$4 sm:$0xff]  }
 0x4a9   :  { %3824 = vmatprep.subr.bf16.mxu0 %v6373_v39  ;;  %3906 = vmatprep.subr.bf16.mxu1 %v6376_v40  ;;  %v6458_v39 = vld [vmem:[#allocation16 + $0x88] ss:$16 sps:$4 sm:$0xff]   ;;  %v6463_v40 = vld [vmem:[#allocation16 + $0xa4] ss:$16 sps:$4 sm:$0xff]  }
 0x4ac   :  { %3825 = vmatpush1.bf16.msra.mxu0 %v6371_v41  ;;  %3907 = vmatpush1.bf16.msra.mxu1 %v6374_v42  ;;  %v6466_v41 = vld [vmem:[#allocation16 + $0xac] ss:$16 sps:$4 sm:$0xff]   ;;  %v6461_v42 = vld [vmem:[#allocation16 + $0xa0] ss:$16 sps:$4 sm:$0xff]  }
 0x4ad   :  { %3826 = vmatprep.subr.bf16.mxu0 %v6379_v43  ;;  %3908 = vmatprep.subr.bf16.mxu1 %v6382_v44  ;;  %v6464_v43 = vld [vmem:[#allocation16 + $0xa8] ss:$16 sps:$4 sm:$0xff]   ;;  %v6469_v44 = vld [vmem:[#allocation16 + $0xc4] ss:$16 sps:$4 sm:$0xff]  }
 0x4b0   :  { %3827 = vmatpush1.bf16.msra.mxu0 %v6377_v45  ;;  %3909 = vmatpush1.bf16.msra.mxu1 %v6380_v46  ;;  %v6472_v45 = vld [vmem:[#allocation16 + $0xcc] ss:$16 sps:$4 sm:$0xff]   ;;  %v6467_v46 = vld [vmem:[#allocation16 + $0xc0] ss:$16 sps:$4 sm:$0xff]  }
 0x4b1   :  { %3828 = vmatprep.subr.bf16.mxu0 %v6385_v47  ;;  %3910 = vmatprep.subr.bf16.mxu1 %v6388_v48  ;;  %v6470_v47 = vld [vmem:[#allocation16 + $0xc8] ss:$16 sps:$4 sm:$0xff]   ;;  %v6475_v48 = vld [vmem:[#allocation16 + $0xe4] ss:$16 sps:$4 sm:$0xff]  }
 0x4b4   :  { %3829 = vmatpush1.bf16.msra.mxu0 %v6383_v51  ;;  %3911 = vmatpush1.bf16.msra.mxu1 %v6386_v54  ;;  %v6478_v51 = vld [vmem:[#allocation16 + $0xec] ss:$16 sps:$4 sm:$0xff]   ;;  %v6473_v54 = vld [vmem:[#allocation16 + $0xe0] ss:$16 sps:$4 sm:$0xff]  }
 0x4b5   :  { %3830 = vmatprep.subr.bf16.mxu0 %v6391_v55  ;;  %3912 = vmatprep.subr.bf16.mxu1 %v6394_v56  ;;  %v6476_v55 = vld [vmem:[#allocation16 + $0xe8] ss:$16 sps:$4 sm:$0xff]   ;;  %v6481_v56 = vld [vmem:[#allocation16 + $0x104] ss:$16 sps:$4 sm:$0xff]  }
 0x4b8   :  { %3831 = vmatpush1.bf16.msra.mxu0 %v6389_v57  ;;  %3913 = vmatpush1.bf16.msra.mxu1 %v6392_v58  ;;  %v6484_v57 = vld [vmem:[#allocation16 + $0x10c] ss:$16 sps:$4 sm:$0xff]   ;;  %v6479_v58 = vld [vmem:[#allocation16 + $0x100] ss:$16 sps:$4 sm:$0xff]  }
 0x4b9   :  { %3832 = vmatprep.subr.bf16.mxu0 %v6397_v59  ;;  %3914 = vmatprep.subr.bf16.mxu1 %v6400_v62  ;;  %v6482_v59 = vld [vmem:[#allocation16 + $0x108] ss:$16 sps:$4 sm:$0xff]   ;;  %v6487_v62 = vld [vmem:[#allocation16 + $0x124] ss:$16 sps:$4 sm:$0xff]  }
 0x4bc   :  { %3833 = vmatpush1.bf16.msra.mxu0 %v6395_v63  ;;  %3915 = vmatpush1.bf16.msra.mxu1 %v6398_v2  ;;  %v6490_v63 = vld [vmem:[#allocation16 + $0x12c] ss:$16 sps:$4 sm:$0xff]   ;;  %v6485_v2 = vld [vmem:[#allocation16 + $0x120] ss:$16 sps:$4 sm:$0xff]  }
 0x4bd   :  { %3834 = vmatprep.subr.bf16.mxu0 %v6403_v3  ;;  %3916 = vmatprep.subr.bf16.mxu1 %v6406_v4  ;;  %v6488_v3 = vld [vmem:[#allocation16 + $0x128] ss:$16 sps:$4 sm:$0xff]   ;;  %v6493_v4 = vld [vmem:[#allocation16 + $0x144] ss:$16 sps:$4 sm:$0xff]  }
 0x4c0   :  { %3835 = vmatpush1.bf16.msra.mxu0 %v6401_v5  ;;  %3917 = vmatpush1.bf16.msra.mxu1 %v6404_v6  ;;  %v6496_v5 = vld [vmem:[#allocation16 + $0x14c] ss:$16 sps:$4 sm:$0xff]   ;;  %v6491_v6 = vld [vmem:[#allocation16 + $0x140] ss:$16 sps:$4 sm:$0xff]  }
 0x4c1   :  { %3836 = vmatprep.subr.bf16.mxu0 %v6409_v7  ;;  %3918 = vmatprep.subr.bf16.mxu1 %v6412_v8  ;;  %v6494_v7 = vld [vmem:[#allocation16 + $0x148] ss:$16 sps:$4 sm:$0xff]   ;;  %v6499_v8 = vld [vmem:[#allocation16 + $0x164] ss:$16 sps:$4 sm:$0xff]  }
 0x4c4   :  { %3837 = vmatpush1.bf16.msra.mxu0 %v6407_v9  ;;  %3919 = vmatpush1.bf16.msra.mxu1 %v6410_v10  ;;  %v6502_v9 = vld [vmem:[#allocation16 + $0x16c] ss:$16 sps:$4 sm:$0xff]   ;;  %v6497_v10 = vld [vmem:[#allocation16 + $0x160] ss:$16 sps:$4 sm:$0xff]  }
 0x4c5   :  { %3838 = vmatprep.subr.bf16.mxu0 %v6415_v60  ;;  %3920 = vmatprep.subr.bf16.mxu1 %v6418_v12  ;;  %v6500_v60 = vld [vmem:[#allocation16 + $0x168] ss:$16 sps:$4 sm:$0xff]   ;;  %v6505_v12 = vld [vmem:[#allocation16 + $0x184] ss:$16 sps:$4 sm:$0xff]  }
 0x4c8   :  { %3839 = vmatpush1.bf16.msra.mxu0 %v6413_v13  ;;  %3921 = vmatpush1.bf16.msra.mxu1 %v6416_v16  ;;  %v6508_v13 = vld [vmem:[#allocation16 + $0x18c] ss:$16 sps:$4 sm:$0xff]   ;;  %v6503_v16 = vld [vmem:[#allocation16 + $0x180] ss:$16 sps:$4 sm:$0xff]  }
 0x4c9   :  { %3840 = vmatprep.subr.bf16.mxu0 %v6421_v18  ;;  %3922 = vmatprep.subr.bf16.mxu1 %v6424_v61  ;;  %v6506_v18 = vld [vmem:[#allocation16 + $0x188] ss:$16 sps:$4 sm:$0xff]   ;;  %v6511_v61 = vld [vmem:[#allocation16 + $0x1a4] ss:$16 sps:$4 sm:$0xff]  }
 0x4cc   :  { %3841 = vmatpush1.bf16.msra.mxu0 %v6419_v19  ;;  %3923 = vmatpush1.bf16.msra.mxu1 %v6422_v20  ;;  %v6514_v19 = vld [vmem:[#allocation16 + $0x1ac] ss:$16 sps:$4 sm:$0xff]   ;;  %v6509_v20 = vld [vmem:[#allocation16 + $0x1a0] ss:$16 sps:$4 sm:$0xff]  }
 0x4cd   :  { %3842 = vmatprep.subr.bf16.mxu0 %v6427_v11  ;;  %3924 = vmatprep.subr.bf16.mxu1 %v6430_v21  ;;  %v6512_v11 = vld [vmem:[#allocation16 + $0x1a8] ss:$16 sps:$4 sm:$0xff]   ;;  %v6517_v21 = vld [vmem:[#allocation16 + $0x1c4] ss:$16 sps:$4 sm:$0xff]  }
 0x4d0   :  { %3843 = vmatpush1.bf16.msra.mxu0 %v6425_v0  ;;  %3925 = vmatpush1.bf16.msra.mxu1 %v6428_v22  ;;  %v6520_v0 = vld [vmem:[#allocation16 + $0x1cc] ss:$16 sps:$4 sm:$0xff]   ;;  %v6515_v22 = vld [vmem:[#allocation16 + $0x1c0] ss:$16 sps:$4 sm:$0xff]  }
 0x4d1   :  { %4733 = vmatprep.subr.bf16.mxu0 %v6433_v1  ;;  %4815 = vmatprep.subr.bf16.mxu1 %v6436_v23  ;;  %v6518_v1 = vld [vmem:[#allocation16 + $0x1c8] ss:$16 sps:$4 sm:$0xff]   ;;  %v6523_v23 = vld [vmem:[#allocation16 + $0x1e4] ss:$16 sps:$4 sm:$0xff]  }
 0x4d3   :  { %3845 = vmatmul.mubr.bf16.vlgmr.msra.gmra.mrb[8].mxu0 %v2979_v25  ;;  %3927 = vmatmul.mubr.bf16.vlgmr.msra.gmra.mrb[8].mxu1 %v2979_v25  ;;  %v6524_v25 = vld [vmem:[#allocation16 + $0x1e8] ss:$16 sps:$4 sm:$0xff]  }
 0x4d4   :  { %4734 = vmatpush1.bf16.msra.mxu0 %v6431_v24  ;;  %4816 = vmatpush1.bf16.msra.mxu1 %v6434_v14  ;;  %v6526_v24 = vld [vmem:[#allocation16 + $0x1ec] ss:$16 sps:$4 sm:$0xff]   ;;  %v6521_v14 = vld [vmem:[#allocation16 + $0x1e0] ss:$16 sps:$4 sm:$0xff]  }
 0x4d5   :  { %4735 = vmatprep.subr.bf16.mxu0 %v6439_v26  ;;  %4817 = vmatprep.subr.bf16.mxu1 %v6442_v27  ;;  %v6529_v26 = vld [vmem:[#allocation16 + $0x204] ss:$16 sps:$4 sm:$0xff]   ;;  %v6532_v27 = vld [vmem:[#allocation16 + $0x20c] ss:$16 sps:$4 sm:$0xff]  }
 0x4d8   :  { %4736 = vmatpush1.bf16.msra.mxu0 %v6437_v28  ;;  %4818 = vmatpush1.bf16.msra.mxu1 %v6440_v29  ;;  %v7359_v28 = vld [vmem:[#allocation14] sm:$0xf] }
 0x4d9   :  { %4737 = vmatprep.subr.bf16.mxu0 %v6445_v30  ;;  %4819 = vmatprep.subr.bf16.mxu1 %v6448_v31  ;;  %v3114_v29 = vrot.slane %v7359_v28, %v7315_v49  ;;  %v3118_v30 = vrot.slane %v7359_v28, %v7319_v52  ;;  %v3126_v31 = vrot.slane %v7359_v28, %v7321_v53 }
 0x4dc   :  { %4738 = vmatpush1.bf16.msra.mxu0 %v6443_v32  ;;  %4820 = vmatpush1.bf16.msra.mxu1 %v6446_v33 }
 0x4dd   :  { %4739 = vmatprep.subr.bf16.mxu0 %v6451_v17  ;;  %4821 = vmatprep.subr.bf16.mxu1 %v6454_v34 }
 0x4e0   :  { %4740 = vmatpush1.bf16.msra.mxu0 %v6449_v35  ;;  %4822 = vmatpush1.bf16.msra.mxu1 %v6452_v15 }
 0x4e1   :  { %4741 = vmatprep.subr.bf16.mxu0 %v6457_v36  ;;  %4823 = vmatprep.subr.bf16.mxu1 %v6460_v37 }
 0x4e4   :  { %4742 = vmatpush1.bf16.msra.mxu0 %v6455_v38  ;;  %4824 = vmatpush1.bf16.msra.mxu1 %v6458_v39 }
 0x4e5   :  { %4743 = vmatprep.subr.bf16.mxu0 %v6463_v40  ;;  %4825 = vmatprep.subr.bf16.mxu1 %v6466_v41 }
 0x4e8   :  { %4744 = vmatpush1.bf16.msra.mxu0 %v6461_v42  ;;  %4826 = vmatpush1.bf16.msra.mxu1 %v6464_v43 }
 0x4e9   :  { %4745 = vmatprep.subr.bf16.mxu0 %v6469_v44  ;;  %4827 = vmatprep.subr.bf16.mxu1 %v6472_v45  ;;  %v6527_v45 = vld [vmem:[#allocation16 + $0x200] ss:$16 sps:$4 sm:$0xff]  }
 0x4ec   :  { %4746 = vmatpush1.bf16.msra.mxu0 %v6467_v46  ;;  %4828 = vmatpush1.bf16.msra.mxu1 %v6470_v47  ;;  %v6530_v46 = vld [vmem:[#allocation16 + $0x208] ss:$16 sps:$4 sm:$0xff]  }
 0x4ed   :  { %4747 = vmatprep.subr.bf16.mxu0 %v6475_v48  ;;  %4829 = vmatprep.subr.bf16.mxu1 %v6478_v51  ;;  %v6535_v48 = vld [vmem:[#allocation16 + $0x224] ss:$16 sps:$4 sm:$0xff]   ;;  %v6538_v51 = vld [vmem:[#allocation16 + $0x22c] ss:$16 sps:$4 sm:$0xff]  }
 0x4f0   :  { %4748 = vmatpush1.bf16.msra.mxu0 %v6473_v54  ;;  %4830 = vmatpush1.bf16.msra.mxu1 %v6476_v55  ;;  %v6533_v55 = vld [vmem:[#allocation16 + $0x220] ss:$16 sps:$4 sm:$0xff]  }
 0x4f1   :  { %4749 = vmatprep.subr.bf16.mxu0 %v6481_v56  ;;  %4831 = vmatprep.subr.bf16.mxu1 %v6484_v57  ;;  %v6536_v56 = vld [vmem:[#allocation16 + $0x228] ss:$16 sps:$4 sm:$0xff]   ;;  %v6541_v57 = vld [vmem:[#allocation16 + $0x244] ss:$16 sps:$4 sm:$0xff]  }
 0x4f4   :  { %4750 = vmatpush1.bf16.msra.mxu0 %v6479_v58  ;;  %4832 = vmatpush1.bf16.msra.mxu1 %v6482_v59  ;;  %v6544_v58 = vld [vmem:[#allocation16 + $0x24c] ss:$16 sps:$4 sm:$0xff]   ;;  %v6539_v59 = vld [vmem:[#allocation16 + $0x240] ss:$16 sps:$4 sm:$0xff]  }
 0x4f5   :  { %4751 = vmatprep.subr.bf16.mxu0 %v6487_v62  ;;  %4833 = vmatprep.subr.bf16.mxu1 %v6490_v63  ;;  %v6542_v62 = vld [vmem:[#allocation16 + $0x248] ss:$16 sps:$4 sm:$0xff]   ;;  %v6547_v63 = vld [vmem:[#allocation16 + $0x264] ss:$16 sps:$4 sm:$0xff]  }
 0x4f8   :  { %4752 = vmatpush1.bf16.msra.mxu0 %v6485_v2  ;;  %4834 = vmatpush1.bf16.msra.mxu1 %v6488_v3  ;;  %v6550_v2 = vld [vmem:[#allocation16 + $0x26c] ss:$16 sps:$4 sm:$0xff]   ;;  %v6545_v3 = vld [vmem:[#allocation16 + $0x260] ss:$16 sps:$4 sm:$0xff]  }
 0x4f9   :  { %4753 = vmatprep.subr.bf16.mxu0 %v6493_v4  ;;  %4835 = vmatprep.subr.bf16.mxu1 %v6496_v5  ;;  %v6548_v4 = vld [vmem:[#allocation16 + $0x268] ss:$16 sps:$4 sm:$0xff]   ;;  %v6553_v5 = vld [vmem:[#allocation16 + $0x284] ss:$16 sps:$4 sm:$0xff]  }
 0x4fc   :  { %4754 = vmatpush1.bf16.msra.mxu0 %v6491_v6  ;;  %4836 = vmatpush1.bf16.msra.mxu1 %v6494_v7  ;;  %v6556_v6 = vld [vmem:[#allocation16 + $0x28c] ss:$16 sps:$4 sm:$0xff]   ;;  %v6551_v7 = vld [vmem:[#allocation16 + $0x280] ss:$16 sps:$4 sm:$0xff]  }
 0x4fd   :  { %4755 = vmatprep.subr.bf16.mxu0 %v6499_v8  ;;  %4837 = vmatprep.subr.bf16.mxu1 %v6502_v9  ;;  %v6554_v8 = vld [vmem:[#allocation16 + $0x288] ss:$16 sps:$4 sm:$0xff]   ;;  %v6559_v9 = vld [vmem:[#allocation16 + $0x2a4] ss:$16 sps:$4 sm:$0xff]  }
 0x500   :  { %4756 = vmatpush1.bf16.msra.mxu0 %v6497_v10  ;;  %4838 = vmatpush1.bf16.msra.mxu1 %v6500_v60  ;;  %v6562_v10 = vld [vmem:[#allocation16 + $0x2ac] ss:$16 sps:$4 sm:$0xff]   ;;  %v6557_v60 = vld [vmem:[#allocation16 + $0x2a0] ss:$16 sps:$4 sm:$0xff]  }
 0x501   :  { %4757 = vmatprep.subr.bf16.mxu0 %v6505_v12  ;;  %4839 = vmatprep.subr.bf16.mxu1 %v6508_v13  ;;  %v6560_v12 = vld [vmem:[#allocation16 + $0x2a8] ss:$16 sps:$4 sm:$0xff]   ;;  %v6565_v13 = vld [vmem:[#allocation16 + $0x2c4] ss:$16 sps:$4 sm:$0xff]  }
 0x504   :  { %4758 = vmatpush1.bf16.msra.mxu0 %v6503_v16  ;;  %4840 = vmatpush1.bf16.msra.mxu1 %v6506_v18  ;;  %v6568_v16 = vld [vmem:[#allocation16 + $0x2cc] ss:$16 sps:$4 sm:$0xff]   ;;  %v6563_v18 = vld [vmem:[#allocation16 + $0x2c0] ss:$16 sps:$4 sm:$0xff]  }
 0x505   :  { %4759 = vmatprep.subr.bf16.mxu0 %v6511_v61  ;;  %4841 = vmatprep.subr.bf16.mxu1 %v6514_v19  ;;  %v6566_v61 = vld [vmem:[#allocation16 + $0x2c8] ss:$16 sps:$4 sm:$0xff]   ;;  %v6571_v19 = vld [vmem:[#allocation16 + $0x2e4] ss:$16 sps:$4 sm:$0xff]  }
 0x508   :  { %4760 = vmatpush1.bf16.msra.mxu0 %v6509_v20  ;;  %4842 = vmatpush1.bf16.msra.mxu1 %v6512_v11  ;;  %v6574_v20 = vld [vmem:[#allocation16 + $0x2ec] ss:$16 sps:$4 sm:$0xff]   ;;  %v6569_v11 = vld [vmem:[#allocation16 + $0x2e0] ss:$16 sps:$4 sm:$0xff]  }
 0x509   :  { %4761 = vmatprep.subr.bf16.mxu0 %v6517_v21  ;;  %4843 = vmatprep.subr.bf16.mxu1 %v6520_v0  ;;  %v6572_v21 = vld [vmem:[#allocation16 + $0x2e8] ss:$16 sps:$4 sm:$0xff]   ;;  %v6577_v0 = vld [vmem:[#allocation16 + $0x304] ss:$16 sps:$4 sm:$0xff]  }
 0x50c   :  { %4762 = vmatpush1.bf16.msra.mxu0 %v6515_v22  ;;  %4844 = vmatpush1.bf16.msra.mxu1 %v6518_v1  ;;  %v6580_v22 = vld [vmem:[#allocation16 + $0x30c] ss:$16 sps:$4 sm:$0xff]   ;;  %v6575_v1 = vld [vmem:[#allocation16 + $0x300] ss:$16 sps:$4 sm:$0xff]  }
 0x50d   :  { %4763 = vmatprep.subr.bf16.mxu0 %v6523_v23  ;;  %4845 = vmatprep.subr.bf16.mxu1 %v6526_v24  ;;  %v6578_v23 = vld [vmem:[#allocation16 + $0x308] ss:$16 sps:$4 sm:$0xff]   ;;  %v6583_v24 = vld [vmem:[#allocation16 + $0x324] ss:$16 sps:$4 sm:$0xff]  }
 0x510   :  { %4764 = vmatpush1.bf16.msra.mxu0 %v6521_v14  ;;  %4846 = vmatpush1.bf16.msra.mxu1 %v6524_v25  ;;  %v6586_v14 = vld [vmem:[#allocation16 + $0x32c] ss:$16 sps:$4 sm:$0xff]   ;;  %v6581_v25 = vld [vmem:[#allocation16 + $0x320] ss:$16 sps:$4 sm:$0xff]  }
 0x511   :  { %4774 = vmatprep.subr.bf16.mxu0 %v6529_v26  ;;  %4856 = vmatprep.subr.bf16.mxu1 %v6532_v27  ;;  %v6584_v26 = vld [vmem:[#allocation16 + $0x328] ss:$16 sps:$4 sm:$0xff]   ;;  %v6589_v27 = vld [vmem:[#allocation16 + $0x344] ss:$16 sps:$4 sm:$0xff]  }
 0x5a6   :  { %v3846_v32 = vpop.f32.mrb[8].mxu0  ;;  %v7367_v33 = vpop.f32.mrb[8].mxu1 }
 0x5a7   :  { %v5677_v17 = vadd.f32 %v3846_v32, %v3114_v29  ;;  %v3848_v34 = vpop.f32.mrb[9].mxu0  ;;  %v3930_v35 = vpop.f32.mrb[9].mxu1  ;;  %v6592_v29 = vld [vmem:[#allocation16 + $0x34c] ss:$16 sps:$4 sm:$0xff]   ;;  %v6595_v32 = vld [vmem:[#allocation16 + $0x364] ss:$16 sps:$4 sm:$0xff]  }
 0x5a8   :  { %v5678_v15 = vadd.f32 %v3848_v34, %v3118_v30  ;;  %v5680_v36 = vadd.f32 %v3930_v35, %v3126_v31  ;;  %v3850_v37 = vpop.f32.mrb[10].mxu0  ;;  %v3932_v38 = vpop.f32.mrb[10].mxu1  ;;  %v6587_v30 = vld [vmem:[#allocation16 + $0x340] ss:$16 sps:$4 sm:$0xff]   ;;  %v6590_v31 = vld [vmem:[#allocation16 + $0x348] ss:$16 sps:$4 sm:$0xff]  }
 0x5a9   :  { %v3935_v39 = vmax.f32 %v5677_v17, 0.0  ;;  %v3851_v40 = vpop.f32.mrb[11].mxu0  ;;  %v3933_v41 = vpop.f32.mrb[11].mxu1  ;;  %v6598_v17 = vld [vmem:[#allocation16 + $0x36c] ss:$16 sps:$4 sm:$0xff]  }
 0x5aa   :  { %v3936_v42 = vmax.f32 %v5678_v15, 0.0  ;;  %v3938_v43 = vmax.f32 %v5680_v36, 0.0  ;;  %v6593_v34 = vld [vmem:[#allocation16 + $0x360] ss:$16 sps:$4 sm:$0xff]   ;;  %v6596_v35 = vld [vmem:[#allocation16 + $0x368] ss:$16 sps:$4 sm:$0xff]  }
 0x5ab   :  { %v3939_v47 = vpack.c.bf16 %v3935_v39, %v3935_v39  ;;  %v6601_v15 = vld [vmem:[#allocation16 + $0x384] ss:$16 sps:$4 sm:$0xff]   ;;  %v6604_v36 = vld [vmem:[#allocation16 + $0x38c] ss:$16 sps:$4 sm:$0xff]   ;;  %v6599_v37 = vld [vmem:[#allocation16 + $0x380] ss:$16 sps:$4 sm:$0xff]  }
 0x5ac   :  { %v3940_v44 = vpack.c.bf16 %v3936_v42, %v3936_v42  ;;  %v3942_v54 = vpack.c.bf16 %v3938_v43, %v3938_v43  ;;  %v6602_v38 = vld [vmem:[#allocation16 + $0x388] ss:$16 sps:$4 sm:$0xff]   ;;  %v6607_v39 = vld [vmem:[#allocation16 + $0x3a4] ss:$16 sps:$4 sm:$0xff]   ;;  %v6610_v40 = vld [vmem:[#allocation16 + $0x3ac] ss:$16 sps:$4 sm:$0xff]   ;;  %v3122_v43 = vrot.slane %v7359_v28, %v7317_v50 }
 0x5ad   :  { %v6605_v41 = vld [vmem:[#allocation16 + $0x3a0] ss:$16 sps:$4 sm:$0xff]   ;;  %v6608_v42 = vld [vmem:[#allocation16 + $0x3a8] ss:$16 sps:$4 sm:$0xff]  }
 0x5ae   :  { %4765 = vmatprep.mubr.bf16.mxu0 %v3940_v44  ;;  %4847 = vmatprep.mubr.bf16.mxu1 %v3940_v44  ;;  %v6613_v44 = vld [vmem:[#allocation16 + $0x3c4] ss:$16 sps:$4 sm:$0xff]  }
 0x5af   :  { %4766 = vmatmul.mubr.bf16.vlgmr.msra.gmra.mrb[12].mxu0 %v3939_v47  ;;  %4848 = vmatmul.mubr.bf16.vlgmr.msra.gmra.mrb[12].mxu1 %v3939_v47  ;;  %v6614_v47 = vld [vmem:[#allocation16 + $0x3c8] ss:$16 sps:$4 sm:$0xff]  }
 0x5b0   :  { %4775 = vmatpush1.bf16.msra.mxu0 %v6527_v45  ;;  %4857 = vmatpush1.bf16.msra.mxu1 %v6530_v46  ;;  %v6616_v45 = vld [vmem:[#allocation16 + $0x3cc] ss:$16 sps:$4 sm:$0xff]   ;;  %v6611_v46 = vld [vmem:[#allocation16 + $0x3c0] ss:$16 sps:$4 sm:$0xff]  }
 0x5b1   :  { %4806 = vmatprep.mubr.bf16.mxu0 %v3942_v54  ;;  %4888 = vmatprep.mubr.bf16.mxu1 %v3942_v54  ;;  %v6622_v54 = vld [vmem:[#allocation16 + $0x3ec] ss:$16 sps:$4 sm:$0xff]  }
 0x5b2   :  { %4776 = vmatprep.subr.bf16.mxu0 %v6535_v48  ;;  %4858 = vmatprep.subr.bf16.mxu1 %v6538_v51  ;;  %v5679_v48 = vadd.f32 %v7367_v33, %v3122_v43  ;;  %v6619_v51 = vld [vmem:[#allocation16 + $0x3e4] ss:$16 sps:$4 sm:$0xff]  }
 0x5b4   :  { %4777 = vmatpush1.bf16.msra.mxu0 %v6533_v55  ;;  %4859 = vmatpush1.bf16.msra.mxu1 %v6536_v56  ;;  %v6617_v55 = vld [vmem:[#allocation16 + $0x3e0] ss:$16 sps:$4 sm:$0xff]   ;;  %v6620_v56 = vld [vmem:[#allocation16 + $0x3e8] ss:$16 sps:$4 sm:$0xff]  }
 0x5b5   :  { %4778 = vmatprep.subr.bf16.mxu0 %v6541_v57  ;;  %4860 = vmatprep.subr.bf16.mxu1 %v6544_v58  ;;  %v3937_v57 = vmax.f32 %v5679_v48, 0.0  ;;  %v4071_v58 = vld [vmem:[#allocation17] sm:$0xf] }
 0x5b6   :  { %v4084_v33 = vrot.slane %v4071_v58, %v7317_v50 }
 0x5b7   :  { %v3941_v28 = vpack.c.bf16 %v3937_v57, %v3937_v57 }
 0x5b8   :  { %4779 = vmatpush1.bf16.msra.mxu0 %v6539_v59  ;;  %4861 = vmatpush1.bf16.msra.mxu1 %v6542_v62  ;;  %v4076_v59 = vrot.slane %v4071_v58, %v7315_v49  ;;  %v4080_v62 = vrot.slane %v4071_v58, %v7319_v52 }
 0x5b9   :  { %4780 = vmatprep.subr.bf16.mxu0 %v6547_v63  ;;  %4862 = vmatprep.subr.bf16.mxu1 %v6550_v2  ;;  %v4088_v63 = vrot.slane %v4071_v58, %v7321_v53 }
 0x5bc   :  { %4781 = vmatpush1.bf16.msra.mxu0 %v6545_v3  ;;  %4863 = vmatpush1.bf16.msra.mxu1 %v6548_v4 }
 0x5bd   :  { %4782 = vmatprep.subr.bf16.mxu0 %v6553_v5  ;;  %4864 = vmatprep.subr.bf16.mxu1 %v6556_v6 }
 0x5c0   :  { %4783 = vmatpush1.bf16.msra.mxu0 %v6551_v7  ;;  %4865 = vmatpush1.bf16.msra.mxu1 %v6554_v8 }
 0x5c1   :  { %4784 = vmatprep.subr.bf16.mxu0 %v6559_v9  ;;  %4866 = vmatprep.subr.bf16.mxu1 %v6562_v10 }
 0x5c4   :  { %4785 = vmatpush1.bf16.msra.mxu0 %v6557_v60  ;;  %4867 = vmatpush1.bf16.msra.mxu1 %v6560_v12 }
 0x5c5   :  { %4786 = vmatprep.subr.bf16.mxu0 %v6565_v13  ;;  %4868 = vmatprep.subr.bf16.mxu1 %v6568_v16 }
 0x5c8   :  { %4787 = vmatpush1.bf16.msra.mxu0 %v6563_v18  ;;  %4869 = vmatpush1.bf16.msra.mxu1 %v6566_v61 }
 0x5c9   :  { %4788 = vmatprep.subr.bf16.mxu0 %v6571_v19  ;;  %4870 = vmatprep.subr.bf16.mxu1 %v6574_v20 }
 0x5cc   :  { %4789 = vmatpush1.bf16.msra.mxu0 %v6569_v11  ;;  %4871 = vmatpush1.bf16.msra.mxu1 %v6572_v21 }
 0x5cd   :  { %4790 = vmatprep.subr.bf16.mxu0 %v6577_v0  ;;  %4872 = vmatprep.subr.bf16.mxu1 %v6580_v22 }
 0x5d0   :  { %4791 = vmatpush1.bf16.msra.mxu0 %v6575_v1  ;;  %4873 = vmatpush1.bf16.msra.mxu1 %v6578_v23 }
 0x5d1   :  { %4792 = vmatprep.subr.bf16.mxu0 %v6583_v24  ;;  %4874 = vmatprep.subr.bf16.mxu1 %v6586_v14 }
 0x5d4   :  { %4793 = vmatpush1.bf16.msra.mxu0 %v6581_v25  ;;  %4875 = vmatpush1.bf16.msra.mxu1 %v6584_v26 }
 0x5d5   :  { %4794 = vmatprep.subr.bf16.mxu0 %v6589_v27  ;;  %4876 = vmatprep.subr.bf16.mxu1 %v6592_v29 }
 0x5d8   :  { %4795 = vmatpush1.bf16.msra.mxu0 %v6587_v30  ;;  %4877 = vmatpush1.bf16.msra.mxu1 %v6590_v31 }
 0x5d9   :  { %4796 = vmatprep.subr.bf16.mxu0 %v6595_v32  ;;  %4878 = vmatprep.subr.bf16.mxu1 %v6598_v17 }
 0x5dc   :  { %4797 = vmatpush1.bf16.msra.mxu0 %v6593_v34  ;;  %4879 = vmatpush1.bf16.msra.mxu1 %v6596_v35 }
 0x5dd   :  { %4798 = vmatprep.subr.bf16.mxu0 %v6601_v15  ;;  %4880 = vmatprep.subr.bf16.mxu1 %v6604_v36 }
 0x5e0   :  { %4799 = vmatpush1.bf16.msra.mxu0 %v6599_v37  ;;  %4881 = vmatpush1.bf16.msra.mxu1 %v6602_v38 }
 0x5e1   :  { %4800 = vmatprep.subr.bf16.mxu0 %v6607_v39  ;;  %4882 = vmatprep.subr.bf16.mxu1 %v6610_v40 }
 0x5e4   :  { %4801 = vmatpush1.bf16.msra.mxu0 %v6605_v41  ;;  %4883 = vmatpush1.bf16.msra.mxu1 %v6608_v42 }
 0x5e5   :  { %4802 = vmatprep.subr.bf16.mxu0 %v6613_v44  ;;  %4884 = vmatprep.subr.bf16.mxu1 %v6616_v45 }
 0x5e8   :  { %4803 = vmatpush1.bf16.msra.mxu0 %v6611_v46  ;;  %4885 = vmatpush1.bf16.msra.mxu1 %v6614_v47 }
 0x5e9   :  { %4804 = vmatprep.subr.bf16.mxu0 %v6619_v51  ;;  %4886 = vmatprep.subr.bf16.mxu1 %v6622_v54 }
 0x5ec   :  { %4805 = vmatpush1.bf16.msra.mxu0 %v6617_v55  ;;  %4887 = vmatpush1.bf16.msra.mxu1 %v6620_v56 }
 0x5ef   :  { %4807 = vmatmul.mubr.bf16.vlgmr.msra.gmra.mrb[12].mxu0 %v3941_v28  ;;  %4889 = vmatmul.mubr.bf16.vlgmr.msra.gmra.mrb[12].mxu1 %v3941_v28 }
 0x6c2   :  { %v4808_v2 = vpop.f32.mrb[12].mxu0  ;;  %v4890_v3 = vpop.f32.mrb[12].mxu1 }
 0x6c3   :  { %v5681_v4 = vadd.f32 %v4808_v2, %v4076_v59  ;;  %v5683_v5 = vadd.f32 %v4890_v3, %v4084_v33  ;;  %v4810_v6 = vpop.f32.mrb[13].mxu0  ;;  %v4892_v7 = vpop.f32.mrb[13].mxu1 }
 0x6c4   :  { %v5682_v8 = vadd.f32 %v4810_v6, %v4080_v62  ;;  %v5684_v9 = vadd.f32 %v4892_v7, %v4088_v63  ;;  %v4812_v10 = vpop.f32.mrb[14].mxu0  ;;  %v4894_v60 = vpop.f32.mrb[14].mxu1 }
 0x6c5   :  { %v4897_v12 = vmax.f32 %v5681_v4, 0.0  ;;  %v4899_v13 = vmax.f32 %v5683_v5, 0.0  ;;  %v4813_v16 = vpop.f32.mrb[15].mxu0  ;;  %v4895_v49 = vpop.f32.mrb[15].mxu1 }
 0x6c6   :  { %v4898_v50 = vmax.f32 %v5682_v8, 0.0  ;;  %v4900_v52 = vmax.f32 %v5684_v9, 0.0 }
 0x6c8   :  { %v5529_v18 = vpack.c.bf16 %v4898_v50, %v4897_v12  ;;  %v5530_v53 = vpack.c.bf16 %v4900_v52, %v4899_v13 }
 0x6ca   :  { %4917 = vst [vmem:[#allocation19] sm:$0xff] %v5529_v18  ;;  %4918 = vst [vmem:[#allocation19 + $0x8] sm:$0xff] %v5530_v53 }
 0x6cb   :  { %6862 = shalt.err (!%p6859_p0)
}
 0x6cc   :  { %s6863_s7 = scalar_lea.hbm %s7399_s11, 256 }
 0x6cd   :  { %p6864_p1 = scmp.ne.s32.totalorder %s7399_s11, %s6863_s7  ;;  %p6867_p2 = scmp.lt.u32.totalorder %s6863_s7, %s7399_s11 }
 0x6cf   :  { %p6869_p3 = pnand %p6867_p2, %p6864_p1 }
 0x6d1   :  { %6872 = shalt.err (!%p6869_p3)
}
 0x6d2   :  { %4928 = dma.vmem_to_hbm [thread:$0]  %s4926_s8, 256, %s7399_s11, [#allocation4]  }
 0x6d3   :  { %6885 = dma.done.wait [#allocation4], 256  }
 0x6d4   :  { %6886 = vsyncadd [#allocation4], 4294967040 }
 0x6d5   :  { %4932 = vsyncpa [#allocation3], 1 }
 0x6d6   :  { %4933 = vsyncpa [#allocation6], 1 }
 0x6d7   :  { %4934 = vsyncpa [#allocation9], 1 }
 0x6d8   :  { %4935 = vsyncpa [#allocation12], 1 }
 0x6d9   :  { %4936 = vsyncpa [#allocation15], 1 }
 0x6da   :  { %4937 = vsyncpa [#allocation18], 1 }
 0x6db   :  { %4938 = vsyncpa [#allocation4], 1 }

</bundles_post_ra>
